<compile_context>
chip_gen: v6e
topology: v6e:2x2x1
jax: 0.10.0
libtpu: 0.0.40
codegen_flags: <defaults>
</compile_context>

<pallas_src>
import jax
import jax.numpy as jnp
from jax.experimental import pallas as pl
from jax.experimental.pallas import tpu as pltpu

BN_EPS = 1e-5


# ----------------------------- Pallas kernel -----------------------------

def _fused_mlp_kernel(x_ref, wpre_ref, spre_ref, wres_ref, qres_ref, sres_ref,
                      wlast_ref, slast_ref, o_ref, h_ref, r_ref):
    """One grid step == one Linear->BN->ReLU leg of a ResBlock.

    step 0 additionally runs the pre_block; the final step additionally runs
    the last Linear and writes the (lane-dense, padded) output block.
    h_ref holds the running activation (bf16), r_ref the residual input (bf16).
    """
    step = pl.program_id(0)
    n_steps = pl.num_programs(0)

    # ---- pre_block: Linear(input_dim,1024) + folded BN + ReLU (first step only)
    @pl.when(step == 0)
    def _():
        xb = x_ref[...].astype(jnp.bfloat16)
        y0 = jnp.dot(xb, wpre_ref[...], preferred_element_type=jnp.float32)
        h_ref[...] = jnp.maximum(y0 + spre_ref[...], 0.0).astype(jnp.bfloat16)

    # ---- current ResBlock leg: relu((h @ dequant(Wq_l)) * qscale_l + shift_l)
    # int8 -> bf16 is exact (|q| <= 127 fits the bf16 mantissa); the per-output-
    # channel quant scale commutes with the matmul and is applied to the small
    # (B, H) f32 accumulator on the VPU.
    wq = wres_ref[0].astype(jnp.bfloat16)
    y = jnp.dot(h_ref[...], wq, preferred_element_type=jnp.float32)
    y = jnp.maximum(y * qres_ref[0] + sres_ref[0], 0.0)

    @pl.when(step % 2 == 0)          # first leg of a ResBlock: stash residual
    def _():
        r_ref[...] = h_ref[...]
        h_ref[...] = y.astype(jnp.bfloat16)

    @pl.when(step % 2 == 1)          # second leg: x + block(x)
    def _():
        h_ref[...] = (r_ref[...].astype(jnp.float32) + y).astype(jnp.bfloat16)

    # ---- last: Linear(1024, out_pad), no BN / no ReLU (final step only)
    @pl.when(step == n_steps - 1)
    def _():
        out = jnp.dot(h_ref[...], wlast_ref[...],
                      preferred_element_type=jnp.float32)
        o_ref[...] = (out + slast_ref[...]).astype(o_ref.dtype)


def simple_baseline_forward(x, params, out_dim):
    """Fused forward pass of SimpleBaseline (eval mode)."""
    B, in_dim = x.shape
    H = params["res_wq"].shape[-1]
    out_pad = params["last_w"].shape[-1]
    n_res = params["res_wq"].shape[0]          # 4 streamed Linear layers

    # Pad batch to a multiple of 16 (bf16 sublane packing); slice back at end.
    # NOTE: if B ever grows large, tile the batch with a leading grid axis
    # instead of growing the resident scratch (v7x VMEM guard).
    b_pad = ((B + 15) // 16) * 16
    xp = x if b_pad == B else jnp.pad(x, ((0, b_pad - B), (0, 0)))

    out = pl.pallas_call(
        _fused_mlp_kernel,
        out_shape=jax.ShapeDtypeStruct((b_pad, out_pad), jnp.float32),
        grid=(n_res,),
        in_specs=[
            pl.BlockSpec((b_pad, in_dim), lambda l: (0, 0)),    # x (resident)
            pl.BlockSpec((in_dim, H), lambda l: (0, 0)),        # pre weight (bf16)
            pl.BlockSpec((1, H), lambda l: (0, 0)),             # pre shift (f32)
            pl.BlockSpec((1, H, H), lambda l: (l, 0, 0)),       # streamed int8 weight
            pl.BlockSpec((1, 1, H), lambda l: (l, 0, 0)),       # streamed quant scale
            pl.BlockSpec((1, 1, H), lambda l: (l, 0, 0)),       # streamed BN shift
            pl.BlockSpec((H, out_pad), lambda l: (0, 0)),       # last weight (padded)
            pl.BlockSpec((1, out_pad), lambda l: (0, 0)),       # last bias (padded)
        ],
        out_specs=pl.BlockSpec((b_pad, out_pad), lambda l: (0, 0)),
        scratch_shapes=[
            pltpu.VMEM((b_pad, H), jnp.bfloat16),   # running activation h
            pltpu.VMEM((b_pad, H), jnp.bfloat16),   # residual-branch input
        ],
        compiler_params=pltpu.CompilerParams(
            dimension_semantics=("arbitrary",)),    # layers are sequential
    )(xp, params["pre_w"], params["pre_shift"], params["res_wq"],
      params["res_qscale"], params["res_shift"], params["last_w"],
      params["last_shift"])

    return out[:B, :out_dim]


# --------------------------- parameter construction ---------------------------

def init_params(key, input_dim, out_dim, hidden=1024):
    """Synthetic SimpleBaseline params: BN(eval) folded, res weights int8."""
    ks = iter(jax.random.split(key, 48))

    def linear(fan_in, fan_out):
        w = jax.random.normal(next(ks), (fan_in, fan_out), jnp.float32) * 0.02
        b = jax.random.normal(next(ks), (fan_out,), jnp.float32) * 0.01
        return w, b

    def fold_bn(w, b, dim):
        gamma = 1.0 + 0.1 * jax.random.normal(next(ks), (dim,), jnp.float32)
        beta = 0.1 * jax.random.normal(next(ks), (dim,), jnp.float32)
        mean = 0.1 * jax.random.normal(next(ks), (dim,), jnp.float32)
        var = 1.0 + 0.1 * jax.random.uniform(next(ks), (dim,), jnp.float32)
        scale = gamma / jnp.sqrt(var + BN_EPS)
        w_folded = w * scale[None, :]                      # x@(W*s) == (x@W)*s
        shift = (b - mean) * scale + beta
        return w_folded, shift

    # pre_block: Linear(input_dim, hidden) + BN, kept bf16 (tiny).
    w, b = linear(input_dim, hidden)
    wf, sf = fold_bn(w, b, hidden)
    pre_w = wf.astype(jnp.bfloat16)
    pre_shift = sf.reshape(1, hidden).astype(jnp.float32)

    # res_block1 / res_block2: 4x Linear(hidden,hidden)+BN, int8 per-out-channel.
    res_wq, res_qscale, res_shift = [], [], []
    for _ in range(4):
        w, b = linear(hidden, hidden)
        wf, sf = fold_bn(w, b, hidden)
        amax = jnp.max(jnp.abs(wf), axis=0)                # per output channel
        qs = jnp.where(amax == 0, 1.0, amax / 127.0)
        wq = jnp.clip(jnp.round(wf / qs[None, :]), -127, 127).astype(jnp.int8)
        res_wq.append(wq)
        res_qscale.append(qs.astype(jnp.float32))
        res_shift.append(sf.astype(jnp.float32))
    res_wq = jnp.stack(res_wq)                          # (4, H, H) int8
    res_qscale = jnp.stack(res_qscale)[:, None, :]      # (4, 1, H) f32
    res_shift = jnp.stack(res_shift)[:, None, :]        # (4, 1, H) f32

    # last: Linear(hidden, out_dim), no BN.  Pad output features to 128 lanes.
    out_pad = ((out_dim + 127) // 128) * 128
    w, b = linear(hidden, out_dim)
    last_w = jnp.zeros((hidden, out_pad), jnp.float32).at[:, :out_dim].set(w)
    last_w = last_w.astype(jnp.bfloat16)
    last_shift = jnp.zeros((1, out_pad), jnp.float32).at[0, :out_dim].set(b)

    return dict(pre_w=pre_w, pre_shift=pre_shift,
                res_wq=res_wq, res_qscale=res_qscale, res_shift=res_shift,
                last_w=last_w, last_shift=last_shift)


# ------------------------------ reference ------------------------------

def reference_forward(x, params, out_dim):
    """Pure-JAX reference using exactly the same folded / quantized params.

    NOTE: bf16 weights + int8 res weights are an intentional approximation of
    the f32 PyTorch module; this check validates the kernel, not quantization.
    """
    f32 = jnp.float32
    h = jnp.dot(x.astype(jnp.bfloat16), params["pre_w"],
                preferred_element_type=f32) + params["pre_shift"]
    h = jnp.maximum(h, 0.0).astype(jnp.bfloat16)

    r = h
    for l in range(params["res_wq"].shape[0]):
        wq = params["res_wq"][l].astype(jnp.bfloat16)
        y = jnp.dot(h, wq, preferred_element_type=f32)
        y = jnp.maximum(y * params["res_qscale"][l] + params["res_shift"][l], 0.0)
        if l % 2 == 0:
            r = h
            h = y.astype(jnp.bfloat16)
        else:
            h = (r.astype(f32) + y).astype(jnp.bfloat16)

    out = jnp.dot(h, params["last_w"], preferred_element_type=f32)
    out = out + params["last_shift"]
    return out[:, :out_dim]


# ---------------------------------- main ----------------------------------

if __name__ == "__main__":
    INPUT_DIM, OUT_DIM, BATCH = 32, 16, 8

    key = jax.random.PRNGKey(0)
    k_x, k_p = jax.random.split(key)
    x = jax.random.normal(k_x, (BATCH, INPUT_DIM), jnp.float32)
    params = init_params(k_p, INPUT_DIM, OUT_DIM)

    out = simple_baseline_forward(x, params, OUT_DIM)
    out = jax.block_until_ready(out)

    ref = reference_forward(x, params, OUT_DIM)
    assert out.shape == (BATCH, OUT_DIM), out.shape
    assert jnp.allclose(out, ref, atol=5e-3, rtol=5e-3), "mismatch vs reference"

    print("KERNEL_OK")
</pallas_src>

<mosaic_0001>
module attributes {stable_mosaic.version = 11 : i64} {
  func.func @_fused_mlp_kernel(%arg0: i32, %arg1: memref<16x32xf32, #tpu.memory_space<vmem>>, %arg2: memref<32x1024xbf16, #tpu.memory_space<vmem>>, %arg3: memref<1x1024xf32, #tpu.memory_space<vmem>>, %arg4: memref<1x1024x1024xi8, #tpu.memory_space<vmem>>, %arg5: memref<1x1x1024xf32, #tpu.memory_space<vmem>>, %arg6: memref<1x1x1024xf32, #tpu.memory_space<vmem>>, %arg7: memref<1024x128xbf16, #tpu.memory_space<vmem>>, %arg8: memref<1x128xf32, #tpu.memory_space<vmem>>, %arg9: memref<16x128xf32, #tpu.memory_space<vmem>>, %arg10: memref<16x1024xbf16, #tpu.memory_space<vmem>>, %arg11: memref<16x1024xbf16, #tpu.memory_space<vmem>>) attributes {dimension_semantics = [#tpu.dimension_semantics<arbitrary>], iteration_bounds = array<i64: 4>, scalar_prefetch = 0 : i64, scratch_operands = 2 : i64, tpu.core_type = #tpu.core_type<tc>, window_params = [{pipeline_mode = #tpu.pipeline_mode<synchronous>, transform_indices = @transform_0, window_bounds = array<i64: 16, 32>}, {pipeline_mode = #tpu.pipeline_mode<synchronous>, transform_indices = @transform_1, window_bounds = array<i64: 32, 1024>}, {pipeline_mode = #tpu.pipeline_mode<synchronous>, transform_indices = @transform_2, window_bounds = array<i64: 1, 1024>}, {transform_indices = @transform_3, window_bounds = array<i64: 1, 1024, 1024>}, {transform_indices = @transform_4, window_bounds = array<i64: 1, 1, 1024>}, {transform_indices = @transform_5, window_bounds = array<i64: 1, 1, 1024>}, {pipeline_mode = #tpu.pipeline_mode<synchronous>, transform_indices = @transform_6, window_bounds = array<i64: 1024, 128>}, {pipeline_mode = #tpu.pipeline_mode<synchronous>, transform_indices = @transform_7, window_bounds = array<i64: 1, 128>}, {pipeline_mode = #tpu.pipeline_mode<synchronous>, transform_indices = @transform_8, window_bounds = array<i64: 16, 128>}]} {
    %c0_i32 = arith.constant 0 : i32
    %0 = arith.cmpi eq, %arg0, %c0_i32 : i32
    %1 = arith.extui %0 : i1 to i32
    %c0_i32_0 = arith.constant 0 : i32
    %2 = arith.cmpi ne, %1, %c0_i32_0 : i32
    scf.if %2 {
      %c0_27 = arith.constant 0 : index
      %c0_28 = arith.constant 0 : index
      %47 = vector.load %arg1[%c0_27, %c0_28] : memref<16x32xf32, #tpu.memory_space<vmem>>, vector<16x32xf32>
      %48 = arith.truncf %47 : vector<16x32xf32> to vector<16x32xbf16>
      %c0_29 = arith.constant 0 : index
      %c0_30 = arith.constant 0 : index
      %49 = vector.load %arg2[%c0_29, %c0_30] : memref<32x1024xbf16, #tpu.memory_space<vmem>>, vector<32x1024xbf16>
      %cst_31 = arith.constant dense<0.000000e+00> : vector<16x1024xf32>
      %50 = tpu.matmul %48, %49, %cst_31 {dimension_numbers = #tpu.dot_dimension_numbers<[1], [0], [0], [1], [0, 0, 1, 1], [], []>} : vector<16x32xbf16>, vector<32x1024xbf16>, vector<16x1024xf32> -> vector<16x1024xf32>
      %c0_32 = arith.constant 0 : index
      %c0_33 = arith.constant 0 : index
      %51 = vector.load %arg3[%c0_32, %c0_33] : memref<1x1024xf32, #tpu.memory_space<vmem>>, vector<1x1024xf32>
      %52 = vector.broadcast %51 : vector<1x1024xf32> to vector<16x1024xf32>
      %53 = arith.addf %50, %52 : vector<16x1024xf32>
      %cst_34 = arith.constant 0.000000e+00 : f32
      %54 = vector.broadcast %cst_34 : f32 to vector<16x1024xf32>
      %55 = arith.maximumf %53, %54 : vector<16x1024xf32>
      %56 = arith.truncf %55 : vector<16x1024xf32> to vector<16x1024xbf16>
      %c0_35 = arith.constant 0 : index
      %c0_36 = arith.constant 0 : index
      %57 = vector.load %arg10[%c0_35, %c0_36] : memref<16x1024xbf16, #tpu.memory_space<vmem>>, vector<16x1024xbf16>
      tpu.vector_store %arg10[%c0_35, %c0_36], %56 {strides = array<i32>} : memref<16x1024xbf16, #tpu.memory_space<vmem>>, vector<16x1024xbf16>,
    } else {
    }
    %c0 = arith.constant 0 : index
    %c0_1 = arith.constant 0 : index
    %c0_2 = arith.constant 0 : index
    %3 = vector.load %arg4[%c0, %c0_1, %c0_2] : memref<1x1024x1024xi8, #tpu.memory_space<vmem>>, vector<1x1024x1024xi8>
    %4 = vector.shape_cast %3 : vector<1x1024x1024xi8> to vector<1024x1024xi8>
    %5 = arith.sitofp %4 : vector<1024x1024xi8> to vector<1024x1024xbf16>
    %c0_3 = arith.constant 0 : index
    %c0_4 = arith.constant 0 : index
    %6 = vector.load %arg10[%c0_3, %c0_4] : memref<16x1024xbf16, #tpu.memory_space<vmem>>, vector<16x1024xbf16>
    %cst = arith.constant dense<0.000000e+00> : vector<16x1024xf32>
    %7 = tpu.matmul %6, %5, %cst {dimension_numbers = #tpu.dot_dimension_numbers<[1], [0], [0], [1], [0, 0, 1, 1], [], []>} : vector<16x1024xbf16>, vector<1024x1024xbf16>, vector<16x1024xf32> -> vector<16x1024xf32>
    %c0_5 = arith.constant 0 : index
    %c0_6 = arith.constant 0 : index
    %c0_7 = arith.constant 0 : index
    %8 = vector.load %arg5[%c0_5, %c0_6, %c0_7] : memref<1x1x1024xf32, #tpu.memory_space<vmem>>, vector<1x1x1024xf32>
    %9 = vector.shape_cast %8 : vector<1x1x1024xf32> to vector<1x1024xf32>
    %10 = vector.broadcast %9 : vector<1x1024xf32> to vector<16x1024xf32>
    %11 = arith.mulf %7, %10 : vector<16x1024xf32>
    %c0_8 = arith.constant 0 : index
    %c0_9 = arith.constant 0 : index
    %c0_10 = arith.constant 0 : index
    %12 = vector.load %arg6[%c0_8, %c0_9, %c0_10] : memref<1x1x1024xf32, #tpu.memory_space<vmem>>, vector<1x1x1024xf32>
    %13 = vector.shape_cast %12 : vector<1x1x1024xf32> to vector<1x1024xf32>
    %14 = vector.broadcast %13 : vector<1x1024xf32> to vector<16x1024xf32>
    %15 = arith.addf %11, %14 : vector<16x1024xf32>
    %cst_11 = arith.constant 0.000000e+00 : f32
    %16 = vector.broadcast %cst_11 : f32 to vector<16x1024xf32>
    %17 = arith.maximumf %15, %16 : vector<16x1024xf32>
    %c2_i32 = arith.constant 2 : i32
    %c0_i32_12 = arith.constant 0 : i32
    %18 = arith.cmpi eq, %c2_i32, %c0_i32_12 : i32
    %c1_i32 = arith.constant 1 : i32
    %19 = arith.select %18, %c1_i32, %c2_i32 : i32
    %20 = arith.remsi %arg0, %19 : i32
    %c0_i32_13 = arith.constant 0 : i32
    %21 = arith.cmpi ne, %20, %c0_i32_13 : i32
    %c0_i32_14 = arith.constant 0 : i32
    %22 = arith.cmpi slt, %20, %c0_i32_14 : i32
    %c0_i32_15 = arith.constant 0 : i32
    %23 = arith.cmpi slt, %19, %c0_i32_15 : i32
    %24 = arith.xori %22, %23 : i1
    %25 = arith.andi %24, %21 : i1
    %26 = arith.addi %20, %19 : i32
    %27 = arith.select %25, %26, %20 : i32
    %c0_i32_16 = arith.constant 0 : i32
    %28 = arith.cmpi eq, %27, %c0_i32_16 : i32
    %29 = arith.extui %28 : i1 to i32
    %c0_i32_17 = arith.constant 0 : i32
    %30 = arith.cmpi ne, %29, %c0_i32_17 : i32
    scf.if %30 {
      %c0_27 = arith.constant 0 : index
      %c0_28 = arith.constant 0 : index
      %47 = vector.load %arg10[%c0_27, %c0_28] : memref<16x1024xbf16, #tpu.memory_space<vmem>>, vector<16x1024xbf16>
      %c0_29 = arith.constant 0 : index
      %c0_30 = arith.constant 0 : index
      %48 = vector.load %arg11[%c0_29, %c0_30] : memref<16x1024xbf16, #tpu.memory_space<vmem>>, vector<16x1024xbf16>
      tpu.vector_store %arg11[%c0_29, %c0_30], %47 {strides = array<i32>} : memref<16x1024xbf16, #tpu.memory_space<vmem>>, vector<16x1024xbf16>,
      %49 = arith.truncf %17 : vector<16x1024xf32> to vector<16x1024xbf16>
      %c0_31 = arith.constant 0 : index
      %c0_32 = arith.constant 0 : index
      %50 = vector.load %arg10[%c0_31, %c0_32] : memref<16x1024xbf16, #tpu.memory_space<vmem>>, vector<16x1024xbf16>
      tpu.vector_store %arg10[%c0_31, %c0_32], %49 {strides = array<i32>} : memref<16x1024xbf16, #tpu.memory_space<vmem>>, vector<16x1024xbf16>,
    } else {
    }
    %c2_i32_18 = arith.constant 2 : i32
    %c0_i32_19 = arith.constant 0 : i32
    %31 = arith.cmpi eq, %c2_i32_18, %c0_i32_19 : i32
    %c1_i32_20 = arith.constant 1 : i32
    %32 = arith.select %31, %c1_i32_20, %c2_i32_18 : i32
    %33 = arith.remsi %arg0, %32 : i32
    %c0_i32_21 = arith.constant 0 : i32
    %34 = arith.cmpi ne, %33, %c0_i32_21 : i32
    %c0_i32_22 = arith.constant 0 : i32
    %35 = arith.cmpi slt, %33, %c0_i32_22 : i32
    %c0_i32_23 = arith.constant 0 : i32
    %36 = arith.cmpi slt, %32, %c0_i32_23 : i32
    %37 = arith.xori %35, %36 : i1
    %38 = arith.andi %37, %34 : i1
    %39 = arith.addi %33, %32 : i32
    %40 = arith.select %38, %39, %33 : i32
    %c1_i32_24 = arith.constant 1 : i32
    %41 = arith.cmpi eq, %40, %c1_i32_24 : i32
    %42 = arith.extui %41 : i1 to i32
    %c0_i32_25 = arith.constant 0 : i32
    %43 = arith.cmpi ne, %42, %c0_i32_25 : i32
    scf.if %43 {
      %c0_27 = arith.constant 0 : index
      %c0_28 = arith.constant 0 : index
      %47 = vector.load %arg11[%c0_27, %c0_28] : memref<16x1024xbf16, #tpu.memory_space<vmem>>, vector<16x1024xbf16>
      %48 = arith.extf %47 : vector<16x1024xbf16> to vector<16x1024xf32>
      %49 = arith.addf %48, %17 : vector<16x1024xf32>
      %50 = arith.truncf %49 : vector<16x1024xf32> to vector<16x1024xbf16>
      %c0_29 = arith.constant 0 : index
      %c0_30 = arith.constant 0 : index
      %51 = vector.load %arg10[%c0_29, %c0_30] : memref<16x1024xbf16, #tpu.memory_space<vmem>>, vector<16x1024xbf16>
      tpu.vector_store %arg10[%c0_29, %c0_30], %50 {strides = array<i32>} : memref<16x1024xbf16, #tpu.memory_space<vmem>>, vector<16x1024xbf16>,
    } else {
    }
    %c3_i32 = arith.constant 3 : i32
    %44 = arith.cmpi eq, %arg0, %c3_i32 : i32
    %45 = arith.extui %44 : i1 to i32
    %c0_i32_26 = arith.constant 0 : i32
    %46 = arith.cmpi ne, %45, %c0_i32_26 : i32
    scf.if %46 {
      %c0_27 = arith.constant 0 : index
      %c0_28 = arith.constant 0 : index
      %47 = vector.load %arg10[%c0_27, %c0_28] : memref<16x1024xbf16, #tpu.memory_space<vmem>>, vector<16x1024xbf16>
      %c0_29 = arith.constant 0 : index
      %c0_30 = arith.constant 0 : index
      %48 = vector.load %arg7[%c0_29, %c0_30] : memref<1024x128xbf16, #tpu.memory_space<vmem>>, vector<1024x128xbf16>
      %cst_31 = arith.constant dense<0.000000e+00> : vector<16x128xf32>
      %49 = tpu.matmul %47, %48, %cst_31 {dimension_numbers = #tpu.dot_dimension_numbers<[1], [0], [0], [1], [0, 0, 1, 1], [], []>} : vector<16x1024xbf16>, vector<1024x128xbf16>, vector<16x128xf32> -> vector<16x128xf32>
      %c0_32 = arith.constant 0 : index
      %c0_33 = arith.constant 0 : index
      %50 = vector.load %arg8[%c0_32, %c0_33] : memref<1x128xf32, #tpu.memory_space<vmem>>, vector<1x128xf32>
      %51 = vector.broadcast %50 : vector<1x128xf32> to vector<16x128xf32>
      %52 = arith.addf %49, %51 : vector<16x128xf32>
      %c0_34 = arith.constant 0 : index
      %c0_35 = arith.constant 0 : index
      %53 = vector.load %arg9[%c0_34, %c0_35] : memref<16x128xf32, #tpu.memory_space<vmem>>, vector<16x128xf32>
      tpu.vector_store %arg9[%c0_34, %c0_35], %52 {strides = array<i32>} : memref<16x128xf32, #tpu.memory_space<vmem>>, vector<16x128xf32>,
    } else {
    }
    return
  }
  func.func @transform_0(%arg0: i32) -> (i32, i32) {
    %c0_i32 = arith.constant 0 : i32
    %c0_i32_0 = arith.constant 0 : i32
    %c0_i32_1 = arith.constant 0 : i32
    return %c0_i32, %c0_i32_0 : i32, i32
  }
  func.func @transform_1(%arg0: i32) -> (i32, i32) {
    %c0_i32 = arith.constant 0 : i32
    %c0_i32_0 = arith.constant 0 : i32
    %c0_i32_1 = arith.constant 0 : i32
    return %c0_i32, %c0_i32_0 : i32, i32
  }
  func.func @transform_2(%arg0: i32) -> (i32, i32) {
    %c0_i32 = arith.constant 0 : i32
    %c0_i32_0 = arith.constant 0 : i32
    %c0_i32_1 = arith.constant 0 : i32
    return %c0_i32, %c0_i32_0 : i32, i32
  }
  func.func @transform_3(%arg0: i32) -> (i32, i32, i32) {
    %c0_i32 = arith.constant 0 : i32
    %c0_i32_0 = arith.constant 0 : i32
    %c0_i32_1 = arith.constant 0 : i32
    return %arg0, %c0_i32, %c0_i32_0 : i32, i32, i32
  }
  func.func @transform_4(%arg0: i32) -> (i32, i32, i32) {
    %c0_i32 = arith.constant 0 : i32
    %c0_i32_0 = arith.constant 0 : i32
    %c0_i32_1 = arith.constant 0 : i32
    return %arg0, %c0_i32, %c0_i32_0 : i32, i32, i32
  }
  func.func @transform_5(%arg0: i32) -> (i32, i32, i32) {
    %c0_i32 = arith.constant 0 : i32
    %c0_i32_0 = arith.constant 0 : i32
    %c0_i32_1 = arith.constant 0 : i32
    return %arg0, %c0_i32, %c0_i32_0 : i32, i32, i32
  }
  func.func @transform_6(%arg0: i32) -> (i32, i32) {
    %c0_i32 = arith.constant 0 : i32
    %c0_i32_0 = arith.constant 0 : i32
    %c0_i32_1 = arith.constant 0 : i32
    return %c0_i32, %c0_i32_0 : i32, i32
  }
  func.func @transform_7(%arg0: i32) -> (i32, i32) {
    %c0_i32 = arith.constant 0 : i32
    %c0_i32_0 = arith.constant 0 : i32
    %c0_i32_1 = arith.constant 0 : i32
    return %c0_i32, %c0_i32_0 : i32, i32
  }
  func.func @transform_8(%arg0: i32) -> (i32, i32) {
    %c0_i32 = arith.constant 0 : i32
    %c0_i32_0 = arith.constant 0 : i32
    %c0_i32_1 = arith.constant 0 : i32
    return %c0_i32, %c0_i32_0 : i32, i32
  }
}

</mosaic_0001>

<bundles_post_ra>
// kernel: tpu_custom_call.1
= control target key start
LH: loop header
LB: loop body
LE: loop exit
PB: predicated region body
PF: predicated region fallthrough
CT: control target
= control target key end

     0   :  { %s5162_s0 = inlined_call_operand.hbm [shape: f32[16,32], index: 0, kind: input, shape index: {}]   ;;  %s5163_s1 = inlined_call_operand.hbm [shape: bf16[32,1024], index: 1, kind: input, shape index: {}]   ;;  %s5164_s2 = inlined_call_operand.hbm [shape: f32[1,1024], index: 2, kind: input, shape index: {}]   ;;  %s5165_s3 = inlined_call_operand.hbm [shape: s8[4,1024,1024], index: 3, kind: input, shape index: {}]   ;;  %s5166_s4 = inlined_call_operand.hbm [shape: f32[4,1,1024], index: 4, kind: input, shape index: {}]   ;;  %s5167_s5 = inlined_call_operand.hbm [shape: f32[4,1,1024], index: 5, kind: input, shape index: {}]   ;;  %s5168_s6 = inlined_call_operand.hbm [shape: bf16[1024,128], index: 6, kind: input, shape index: {}]   ;;  %s5169_s7 = inlined_call_operand.hbm [shape: f32[1,128], index: 7, kind: input, shape index: {}]   ;;  %s5170_s8 = inlined_call_operand.hbm [shape: f32[16,128], index: 8, kind: output, shape index: {}]  }
   0x1   :  { %5182 = sst [smem:[#allocation26_spill]] %s5163_s1 }
   0x2   :  { %5183 = sst [smem:[#allocation27_spill]] %s5168_s6 }
   0x3   :  { %13 = vsyncpa [#allocation5], 0 }
   0x4   :  { %14 = vsyncpa [#allocation8], 0 }
   0x5   :  { %15 = vsyncpa [#allocation11], 0 }
   0x6   :  { %17 = vsyncpa [#allocation11 + $0x1], 0 }
   0x7   :  { %18 = vsyncpa [#allocation14], 0 }
   0x8   :  { %20 = vsyncpa [#allocation14 + $0x1], 0 }
   0x9   :  { %21 = vsyncpa [#allocation17], 0 }
   0xa   :  { %22 = vsyncpa [#allocation6], 0  ;;  %s4407_s27 = smov 0   ;;  %s4409_s28 = smov 0  }
   0xb   :  { %s4411_s29 = smov 0   ;;  %s4413_s30 = smov 0  }
   0xc LB: > { %s4343_s9 = smov [#allocation7]   ;;  %s4428_s11 = sadd.s32 4294967295, %s4341_s30   ;;  %s4341_s30 = sphi %s4413_s30, %s5213_s30   ;;  %s4337_s29 = sphi %s4411_s29, %s5212_s29   ;;  %s4333_s28 = sphi %s4409_s28, %s5211_s28   ;;  %s4329_s27 = sphi %s4407_s27, %s5210_s27  }
   0xd   : > { %s262_s10 = sshll.u32 %s4343_s9, 4  ;;  %p3562_p0 = scmp.ge.s32.totalorder %s4341_s30, 1  ;;  %s263_s10 = int_to_ptr.vmem [resolvable:$true] %s262_s10 }
   0xe   : > { %p5171_p1 = scmp.eq.s32.totalorder %s4428_s11, 0  ;;  %p237_p2 = scmp.lt.s32.totalorder %s4341_s30, 5 }
   0xf   : > { %s4344_s13 = smov [#allocation15]   ;;  %s4056_s17 = scalar_lea.vmem %s263_s10, 2048 }
  0x10   : > { %p4434_p4 = pnand %p3562_p0, %p237_p2  ;;  %s286_s14 = sshll.u32 %s4344_s13, 4  ;;  %s287_s14 = int_to_ptr.vmem [resolvable:$true] %s286_s14 }
  0x11   : > { %p4057_p8 = scmp.ne.s32.totalorder %s263_s10, %s4056_s17  ;;  %p4064_p11 = scmp.lt.s32.totalorder %s263_s10, %s263_s10 }
  0x12   : > { %s5184_s12 = scalar_select %p4434_p4, 1, 0 }
  0x13   : > { %p3868_p5 = pneg %p4434_p4  ;;  %p4065_p12 = scmp.lt.s32.totalorder %s4056_s17, %s4056_s17 }
  0x15   : > { %p4442_p6 = pnand %p3868_p5, %p5171_p1  ;;  %p4066_p13 = por %p4065_p12, %p4064_p11 }
  0x17   : > { %s5185_s15 = scalar_select %p4442_p6, 1, 0 }
  0x18   : > { %p4448_p7 = pneg %p4442_p6 }
  0x1a   : > { %s5186_s16 = scalar_select %p4448_p7, 1, 0 }
  0x1b   : > { %p4059_p9 = pnand %p4057_p8, %p4448_p7 }
  0x1d   : > { %p4060_p10 = pneg %p4059_p9 }
  0x1f   : > { %p4067_p0 = pnand %p4066_p13, %p4060_p10 }
  0x21   : > { %4070 = shalt.err (!%p4067_p0)
}
  0x22   : > { %s4345_s18 = smov 512   ;;  %s4346_s19 = smov 32  }
  0x23   : > { %s5187_s1 = sld [smem:[#allocation26_spill]]  ;;  %s4082_s22 = scalar_lea.vmem %s287_s14, 8192 }
  0x24   : > { %p4083_p2 = scmp.ne.s32.totalorder %s287_s14, %s4082_s22  ;;  %p4090_p9 = scmp.lt.s32.totalorder %s287_s14, %s287_s14 }
  0x25   : > { %p4091_p3 = scmp.lt.s32.totalorder %s4082_s22, %s4082_s22 }
  0x26   : > { %p4085_p5 = pnand %p4083_p2, %p4448_p7 }
  0x27   : > { %p4092_p1 = por %p4091_p3, %p4090_p9 }
  0x28   : > { %p4086_p8 = pneg %p4085_p5 }
  0x29   : > { %3874 = dma.hbm_to_vmem [thread:$0]  (!%p4442_p6), %s5187_s1, 2048, %s263_s10, [#allocation8], %s4345_s18, %s4345_s18, %s4346_s19  }
  0x2a   : > { %p4093_p11 = pnand %p4092_p1, %p4086_p8 }
  0x2c   : > { %4096 = shalt.err (!%p4093_p11)
}
  0x2d   : > { %s5173_s23 = smov 64   ;;  %s4348_s24 = smov 4  }
  0x2e   : > { %s5188_s6 = sld [smem:[#allocation27_spill]]  ;;  %s4469_s9 = sadd.s32 1, %s4341_s30  }
  0x2f   : > { %s98_s10 = sadd.s32 1, %s4337_s29  ;;  %s95_s13 = ssub.s32 %s4341_s30, %s4469_s9 }
  0x30   : > { %p105_p1 = scmp.ne.s32.totalorder %s4337_s29, %s4333_s28  ;;  %p96_p3 = scmp.eq.s32.totalorder %s95_s13, 0 }
  0x31   : > { %p106_p10 = scmp.eq.s32.totalorder %s4341_s30, 0  ;;  %p111_p12 = scmp.ne.s32.totalorder %s4333_s28, %s4329_s27 }
  0x32   : > { %p3899_p13 = scmp.lt.s32.totalorder %s4341_s30, 4  ;;  %p5189_p2 = scmp.eq.s32.totalorder %s4428_s11, 0 }
  0x33   : > { %s4481_s17 = scalar_select %p96_p3, %s4337_s29, %s98_s10  }
  0x34   : > { %3880 = dma.hbm_to_vmem [thread:$0]  (!%p4442_p6), %s5188_s6, 8192, %s287_s14, [#allocation14], %s5173_s23, %s5173_s23, %s4348_s24  }
  0x35   : > { %p107_p0 = por %p106_p10, %p105_p1  ;;  %p4485_p5 = por %p5189_p2, %p111_p12 }
  0x36   : > { %s5174_s14 = sand.u32 1, %s4341_s30   ;;  %s5172_s19 = sand.u32 1, %s4337_s29  }
  0x37   : > { %s5190_s18 = scalar_select %p4485_p5, 1, 0 }
  0x38   : > { %s3569_s20 = sshll.u32 %s5172_s19, 11  ;;  %s3723_s21 = sshll.u32 %s4341_s30, 15 }
  0x39   : > { %s4497_s25 = scalar_lea.hbm %s5165_s3, %s3723_s21  ;;  %s315_s27 = scalar_lea.vmem [#allocation10], %s3569_s20 }
  0x3a   : > { %s322_s26 = sshll.u32 %s315_s27, 4  ;;  %p4501_p8 = pnand %p3899_p13, %p107_p0  ;;  %s4499_s26 = int_to_ptr.vmem [resolvable:$true] %s322_s26 }
  0x3b   : > { %s4349_s13 = smov [#allocation4]   ;;  %s4509_s23 = scalar_lea.sflag [#allocation11], %s5174_s14 }
  0x3c   : > { %s4505_s19 = sshll.u32 %s4349_s13, 4  ;;  %s4097_s21 = scalar_lea.hbm %s4497_s25, 32768  ;;  %s250_s19 = int_to_ptr.vmem [resolvable:$true] %s4505_s19 }
  0x3d   : > { %p4098_p9 = scmp.ne.s32.totalorder %s4497_s25, %s4097_s21  ;;  %p4515_p11 = pneg %p4501_p8 }
  0x3e   : > { %s4102_s27 = scalar_lea.hbm %s5165_s3, 131072  ;;  %p4103_p10 = scmp.lt.s32.totalorder %s4497_s25, %s5165_s3 }
  0x3f   : > { %p4100_p1 = pnand %p4515_p11, %p4098_p9  ;;  %p4104_p12 = scmp.lt.s32.totalorder %s4102_s27, %s4097_s21 }
  0x41   : > { %p4101_p3 = pneg %p4100_p1  ;;  %p4105_p13 = por %p4104_p12, %p4103_p10 }
  0x43   : > { %p4106_p0 = pnand %p4105_p13, %p4101_p3 }
  0x45   : > { %4109 = shalt.err (!%p4106_p0)
}
  0x46   : > { %s4110_s14 = scalar_lea.vmem %s4499_s26, 32768  ;;  %s4350_s6 = smov [#allocation10]  }
  0x47   : > { %p4111_p2 = scmp.ne.s32.totalorder %s4499_s26, %s4110_s14  ;;  %s4115_s20 = sshll.u32 %s4350_s6, 4  ;;  %s4116_s20 = int_to_ptr.vmem [resolvable:$false] %s4115_s20 }
  0x48   : > { %s4117_s24 = scalar_lea.vmem %s4116_s20, 65536  ;;  %p4118_p5 = scmp.lt.s32.totalorder %s4499_s26, %s4116_s20 }
  0x49   : > { %p4113_p9 = pnand %p4111_p2, %p4515_p11  ;;  %p4119_p4 = scmp.lt.s32.totalorder %s4117_s24, %s4110_s14 }
  0x4b   : > { %p4114_p1 = pneg %p4113_p9  ;;  %p4120_p6 = por %p4119_p4, %p4118_p5 }
  0x4d   : > { %p4121_p7 = pnand %p4120_p6, %p4114_p1 }
  0x4f   : > { %4124 = shalt.err (!%p4121_p7)
}
  0x50   : > { %s4351_s1 = smov 1024   ;;  %s5193_s21 = smov 64  }
  0x51   : > { %3887 = dma.hbm_to_vmem [thread:$0]  (!%p4501_p8), %s4497_s25, 32768, %s4499_s26, %s4509_s23, %s4351_s1, %s4351_s1, %s5193_s21  }
  0x52   : > { %s4136_s27 = scalar_lea.vmem %s250_s19, 256  ;;  %p5194_p10 = scmp.ne.s32.totalorder %s5186_s16, 0 }
  0x53   : > { %p4137_p3 = scmp.ne.s32.totalorder %s250_s19, %s4136_s27  ;;  %p4144_p0 = scmp.lt.s32.totalorder %s250_s19, %s250_s19 }
  0x54   : > { %p4145_p4 = scmp.lt.s32.totalorder %s4136_s27, %s4136_s27 }
  0x55   : > { %p4139_p12 = pnand %p4137_p3, %p5194_p10 }
  0x56   : > { %p4146_p6 = por %p4145_p4, %p4144_p0 }
  0x57   : > { %p4140_p13 = pneg %p4139_p12 }
  0x59   : > { %p4147_p7 = pnand %p4146_p6, %p4140_p13 }
  0x5b   : > { %4150 = shalt.err (!%p4147_p7)
}
  0x5c   : > { %s4352_s6 = smov 128   ;;  %s4353_s14 = smov 8  }
  0x5d   : > { %p5195_p5 = scmp.ne.s32.totalorder %s5185_s15, 0  ;;  %s4354_s25 = smov [#allocation9]  }
  0x5e   : > { %s276_s26 = sshll.u32 %s4354_s25, 4  ;;  %s4355_s24 = smov [#allocation16]   ;;  %s277_s26 = int_to_ptr.vmem [resolvable:$true] %s276_s26 }
  0x5f   : > { %3871 = dma.hbm_to_vmem [thread:$0]  (!%p5195_p5), %s5162_s0, 256, %s250_s19, [#allocation5], %s4352_s6, %s4352_s6, %s4353_s14  }
  0x60   : > { %s300_s1 = sshll.u32 %s4355_s24, 4  ;;  %s4162_s21 = scalar_lea.vmem %s277_s26, 128  ;;  %s301_s1 = int_to_ptr.vmem [resolvable:$true] %s300_s1 }
  0x61   : > { %p4163_p2 = scmp.ne.s32.totalorder %s277_s26, %s4162_s21  ;;  %p4170_p3 = scmp.lt.s32.totalorder %s277_s26, %s277_s26 }
  0x62   : > { %p4171_p12 = scmp.lt.s32.totalorder %s4162_s21, %s4162_s21 }
  0x63   : > { %p4165_p9 = pnand %p4163_p2, %p5194_p10 }
  0x64   : > { %p4172_p13 = por %p4171_p12, %p4170_p3 }
  0x65   : > { %p4166_p1 = pneg %p4165_p9 }
  0x67   : > { %p4173_p0 = pnand %p4172_p13, %p4166_p1 }
  0x69   : > { %4176 = shalt.err (!%p4173_p0)
}
  0x6a   : > { %3877 = dma.hbm_to_vmem [thread:$0]  (!%p5195_p5), %s5164_s2, 128, %s277_s26, [#allocation8]  }
  0x6b   : > { %s5196_s19 = sand.u32 1, %s4337_s29   ;;  %s4188_s14 = scalar_lea.vmem %s301_s1, 16 }
  0x6c   : > { %s4556_s6 = sshll.u32 %s5196_s19, 3  ;;  %p4189_p4 = scmp.ne.s32.totalorder %s301_s1, %s4188_s14 }
  0x6d   : > { %s4195_s20 = scalar_lea.vmem %s301_s1, 32  ;;  %p4196_p2 = scmp.lt.s32.totalorder %s301_s1, %s301_s1 }
  0x6e   : > { %p4191_p6 = pnand %p4189_p4, %p5194_p10  ;;  %p4197_p9 = scmp.lt.s32.totalorder %s4195_s20, %s4188_s14 }
  0x70   : > { %p4192_p7 = pneg %p4191_p6  ;;  %p4198_p1 = por %p4197_p9, %p4196_p2 }
  0x72   : > { %p4199_p3 = pnand %p4198_p1, %p4192_p7 }
  0x74   : > { %4202 = shalt.err (!%p4199_p3)
}
  0x75   : > { %3883 = dma.hbm_to_vmem [thread:$0]  (!%p5195_p5), %s5169_s7, 16, %s301_s1, [#allocation17]  }
  0x76   : > { %s5181_s26 = sshll.u32 %s4341_s30, 7  ;;  %s336_s13 = scalar_lea.vmem [#allocation12], %s4556_s6 }
  0x77   : > { %s342_s27 = scalar_lea.hbm %s5166_s4, %s5181_s26  ;;  %s344_s19 = sshll.u32 %s336_s13, 4  ;;  %s345_s19 = int_to_ptr.vmem [resolvable:$true] %s344_s19 }
  0x78   : > { %s4203_s14 = scalar_lea.hbm %s342_s27, 128  ;;  %s4208_s25 = scalar_lea.hbm %s5166_s4, 512 }
  0x79   : > { %p4204_p10 = scmp.ne.s32.totalorder %s342_s27, %s4203_s14  ;;  %p4209_p5 = scmp.lt.s32.totalorder %s342_s27, %s5166_s4 }
  0x7a   : > { %p4210_p0 = scmp.lt.s32.totalorder %s4208_s25, %s4203_s14 }
  0x7b   : > { %p4206_p12 = pnand %p4204_p10, %p4515_p11 }
  0x7c   : > { %p4211_p4 = por %p4210_p0, %p4209_p5 }
  0x7d   : > { %p4207_p13 = pneg %p4206_p12 }
  0x7f   : > { %p4212_p6 = pnand %p4211_p4, %p4207_p13 }
  0x81   : > { %4215 = shalt.err (!%p4212_p6)
}
  0x82   : > { %s4216_s16 = scalar_lea.vmem %s345_s19, 128  ;;  %s4356_s21 = smov [#allocation12]  }
  0x83   : > { %p4217_p7 = scmp.ne.s32.totalorder %s345_s19, %s4216_s16  ;;  %s4221_s13 = sshll.u32 %s4356_s21, 4  ;;  %s4222_s13 = int_to_ptr.vmem [resolvable:$false] %s4221_s13 }
  0x84   : > { %s4223_s26 = scalar_lea.vmem %s4222_s13, 256  ;;  %p4224_p1 = scmp.lt.s32.totalorder %s345_s19, %s4222_s13 }
  0x85   : > { %p4219_p2 = pnand %p4217_p7, %p4515_p11  ;;  %p4225_p3 = scmp.lt.s32.totalorder %s4223_s26, %s4216_s16 }
  0x87   : > { %p4220_p9 = pneg %p4219_p2  ;;  %p4226_p10 = por %p4225_p3, %p4224_p1 }
  0x89   : > { %p4227_p12 = pnand %p4226_p10, %p4220_p9 }
  0x8b   : > { %4230 = shalt.err (!%p4227_p12)
}
  0x8c   : > { %3890 = dma.hbm_to_vmem [thread:$0]  (!%p4501_p8), %s342_s27, 128, %s345_s19, %s4509_s23  }
  0x8d   : > { %s5197_s14 = sshll.u32 %s4341_s30, 7  ;;  %s355_s26 = scalar_lea.vmem [#allocation13], %s4556_s6 }
  0x8e   : > { %s4590_s25 = scalar_lea.hbm %s5167_s5, %s5197_s14  ;;  %s363_s24 = sshll.u32 %s355_s26, 4  ;;  %s364_s24 = int_to_ptr.vmem [resolvable:$true] %s363_s24 }
  0x8f   : > { %s5198_s1 = sand.u32 1, %s4341_s30   ;;  %s4231_s21 = scalar_lea.hbm %s4590_s25, 128 }
  0x90   : > { %s352_s16 = scalar_lea.sflag [#allocation14], %s5198_s1  ;;  %p4232_p13 = scmp.ne.s32.totalorder %s4590_s25, %s4231_s21 }
  0x91   : > { %s4236_s19 = scalar_lea.hbm %s5167_s5, 512  ;;  %p4237_p4 = scmp.lt.s32.totalorder %s4590_s25, %s5167_s5 }
  0x92   : > { %p4234_p5 = pnand %p4232_p13, %p4515_p11  ;;  %p4238_p6 = scmp.lt.s32.totalorder %s4236_s19, %s4231_s21 }
  0x94   : > { %p4235_p0 = pneg %p4234_p5  ;;  %p4239_p7 = por %p4238_p6, %p4237_p4 }
  0x96   : > { %p4240_p2 = pnand %p4239_p7, %p4235_p0 }
  0x98   : > { %4243 = shalt.err (!%p4240_p2)
}
  0x99   : > { %s4244_s6 = scalar_lea.vmem %s364_s24, 128  ;;  %s4357_s30 = smov [#allocation13]  }
  0x9a   : > { %p4245_p9 = scmp.ne.s32.totalorder %s364_s24, %s4244_s6  ;;  %s4249_s15 = sshll.u32 %s4357_s30, 4  ;;  %s4250_s15 = int_to_ptr.vmem [resolvable:$false] %s4249_s15 }
  0x9b   : > { %s4251_s20 = scalar_lea.vmem %s4250_s15, 256  ;;  %p4252_p10 = scmp.lt.s32.totalorder %s364_s24, %s4250_s15 }
  0x9c   : > { %p4247_p1 = pnand %p4245_p9, %p4515_p11  ;;  %p4253_p12 = scmp.lt.s32.totalorder %s4251_s20, %s4244_s6 }
  0x9e   : > { %p4248_p3 = pneg %p4247_p1  ;;  %p4254_p13 = por %p4253_p12, %p4252_p10 }
  0xa0   : > { %p4255_p5 = pnand %p4254_p13, %p4248_p3 }
  0xa2   : > { %4258 = shalt.err (!%p4255_p5)
}
  0xa3   : > { %3893 = dma.hbm_to_vmem [thread:$0]  (!%p4501_p8), %s4590_s25, 128, %s364_s24, %s352_s16  }
  0xa4   : > { %p5199_p0 = scmp.ne.s32.totalorder %s5184_s12, 0 }
  0xa5   : > { %p5200_p4 = scmp.eq.s32.totalorder (!%p5199_p0), %s4428_s11, 0 }
  0xa6   : > { %372 = sbr.rel (%p5199_p0) target bundleno = 1471 (0x5bf), region = 52 }
  0xab   : > { %4300 = dma.done.wait (%p5200_p4), [#allocation5], 256   ;;  %p5201_p11 = pmov %p5200_p4 }
  0xac   : > { %p5202_p6 = pmov %p5200_p4 }
  0xad   : > { %4302 = vsyncadd (%p5201_p11), [#allocation5], 4294967040 }
  0xae   : > { %4304 = dma.done.wait (%p5202_p6), [#allocation8], 2176   ;;  %p5203_p7 = pmov %p5200_p4 }
  0xaf   : > { %s386_s10 = sand.u32 1, %s4428_s11   ;;  %s388_s22 = sand.u32 1, %s4333_s28  }
  0xb0   : > { %4306 = vsyncadd (%p5203_p7), [#allocation8], 4294965120  ;;  %s3582_s25 = sshll.u32 %s388_s22, 11  ;;  %s387_s12 = scalar_lea.sflag [#allocation11], %s386_s10 }
  0xb1   : > { %s4623_s26 = scalar_lea.vmem [#allocation10], %s3582_s25  ;;  %p5204_p8 = scmp.ne.s32.totalorder %s5190_s18, 0 }
  0xb3   : > { %4308 = dma.done.wait (%p5204_p8), %s387_s12, 32896  }
  0xb4   : > { %4310 = vsyncadd (%p5204_p8), %s387_s12, 4294934400  ;;  %s4629_s24 = sshll.u32 %s388_s22, 3  ;;  %s405_s16 = scalar_lea.sflag [#allocation14], %s386_s10 }
  0xb5   : > { %s399_s1 = scalar_lea.vmem [#allocation12], %s4629_s24  ;;  %s408_s21 = scalar_lea.vmem [#allocation13], %s4629_s24 }
  0xb6   : > { %4312 = dma.done.wait (%p5204_p8), %s405_s16, 128  }
  0xb7   : > { %4314 = vsyncadd (%p5204_p8), %s405_s16, 4294967168  ;;  %p5205_p2 = pmov %p5200_p4 }
  0xb9   : > { %4316 = dma.done.wait (%p5205_p2), [#allocation14], 8192   ;;  %p5206_p9 = pmov %p5205_p2 }
  0xba   : > { %p5207_p1 = pmov %p5205_p2 }
  0xbb   : > { %4318 = vsyncadd (%p5206_p9), [#allocation14], 4294959104 }
  0xbc   : > { %4320 = dma.done.wait (%p5207_p1), [#allocation17], 16   ;;  %p5208_p3 = pmov %p5207_p1 }
  0xbd   : > { %p5209_p10 = scmp.ne.s32.totalorder %s4428_s11, 0 }
  0xbe   : > { %4322 = vsyncadd (%p5208_p3), [#allocation17], 4294967280 }
  0xbf   : > { %458 = sbr.rel (%p5209_p10) target bundleno = 422 (0x1a6), region = 88 }
  0xc4   : > { %v470_v0 = vld [vmem:[#allocation7 + $0x40] sm:$0xff]  ;;  %v471_v2 = vld [vmem:[#allocation7 + $0x48] sm:$0xff]  ;;  %v4358_v8 = vmov 0   ;;  %v459_v15 = vld [vmem:[#allocation4] sm:$0xff]  ;;  %vm600_vm0 = vcmask 261120   ;;  %v480_v36 = vlaneseq }
  0xc5   : > { %v474_v1 = vld [vmem:[#allocation7 + $0x60] sm:$0xff]  ;;  %v475_v4 = vld [vmem:[#allocation7 + $0x68] sm:$0xff]  ;;  %636 = vmatprep.mubr.bf16.mxu0 %v4358_v8  ;;  %679 = vmatprep.mubr.bf16.mxu1 %v4358_v8  ;;  %v472_v16 = vld [vmem:[#allocation7 + $0x50] sm:$0xff] }
  0xc6   : > { %v3597_v3 = vcombine.high %v470_v0, %v474_v1  ;;  %v3596_v5 = vcombine.low %v470_v0, %v474_v1  ;;  %v462_v6 = vld [vmem:[#allocation7] sm:$0xff]  ;;  %v3599_v9 = vcombine.high %v471_v2, %v475_v4  ;;  %v3598_v10 = vcombine.low %v471_v2, %v475_v4  ;;  %v463_v12 = vld [vmem:[#allocation7 + $0x8] sm:$0xff]  ;;  %v476_v17 = vld [vmem:[#allocation7 + $0x70] sm:$0xff] }
  0xc7   : > { %v466_v7 = vld [vmem:[#allocation7 + $0x20] sm:$0xff]  ;;  %v467_v13 = vld [vmem:[#allocation7 + $0x28] sm:$0xff]  ;;  %v460_v19 = vld [vmem:[#allocation4 + $0x8] sm:$0xff]  ;;  %v3601_v23 = vcombine.high %v472_v16, %v476_v17  ;;  %v3600_v30 = vcombine.low %v472_v16, %v476_v17  ;;  %v481_v37 = vshrl.u32 %v480_v36, 7 }
  0xc8   : > { %v3589_v11 = vcombine.high %v462_v6, %v466_v7  ;;  %616 = vmatprep.subr.bf16.mxu0 %v3597_v3  ;;  %v3591_v14 = vcombine.high %v463_v12, %v467_v13  ;;  %659 = vmatprep.subr.bf16.mxu1 %v3599_v9  ;;  %v3588_v18 = vcombine.low %v462_v6, %v466_v7  ;;  %v473_v20 = vld [vmem:[#allocation7 + $0x58] sm:$0xff]  ;;  %v464_v25 = vld [vmem:[#allocation7 + $0x10] sm:$0xff]  ;;  %v478_v39 = vld [vmem:[#allocation9] sm:$0xff] }
  0xc9   : > { %617 = vmatpush1.bf16.msra.mxu0 %v3596_v5  ;;  %v477_v21 = vld [vmem:[#allocation7 + $0x78] sm:$0xff]  ;;  %660 = vmatpush1.bf16.msra.mxu1 %v3598_v10  ;;  %v3590_v22 = vcombine.low %v463_v12, %v467_v13  ;;  %v468_v26 = vld [vmem:[#allocation7 + $0x30] sm:$0xff]  ;;  %v461_v27 = vpack.c.bf16 %v460_v19, %v459_v15  ;;  %v482_v38 = vsub.s32 0, %v481_v37  ;;  %v490_v40 = vsub.s32 2, %v481_v37 }
  0xca   : > { %618 = vmatprep.subr.bf16.mxu0 %v3589_v11  ;;  %661 = vmatprep.subr.bf16.mxu1 %v3591_v14  ;;  %v3603_v24 = vcombine.high %v473_v20, %v477_v21  ;;  %v465_v28 = vld [vmem:[#allocation7 + $0x18] sm:$0xff]  ;;  %v3602_v31 = vcombine.low %v473_v20, %v477_v21  ;;  %v3593_v32 = vcombine.high %v464_v25, %v468_v26  ;;  %v486_v41 = vsub.s32 1, %v481_v37 }
  0xcb   : > { %v469_v29 = vld [vmem:[#allocation7 + $0x38] sm:$0xff]  ;;  %v3592_v34 = vcombine.low %v464_v25, %v468_v26  ;;  %v494_v42 = vsub.s32 3, %v481_v37  ;;  %v483_v43 = vrot.slane %v478_v39, %v482_v38  ;;  %v491_v44 = vrot.slane %v478_v39, %v490_v40 }
  0xcc   : > { %v3595_v33 = vcombine.high %v465_v28, %v469_v29  ;;  %v3594_v35 = vcombine.low %v465_v28, %v469_v29  ;;  %v487_v45 = vrot.slane %v478_v39, %v486_v41  ;;  %v498_v50 = vsub.s32 4, %v481_v37 }
  0xcd   : > { %619 = vmatpush1.bf16.msra.mxu0 %v3588_v18  ;;  %662 = vmatpush1.bf16.msra.mxu1 %v3590_v22  ;;  %v495_v47 = vrot.slane %v478_v39, %v494_v42  ;;  %v506_v53 = vsub.s32 6, %v481_v37  ;;  %v502_v56 = vsub.s32 5, %v481_v37  ;;  %v510_v59 = vsub.s32 7, %v481_v37 }
  0xce   : > { %702 = vmatprep.subr.bf16.mxu0 %v3601_v23  ;;  %745 = vmatprep.subr.bf16.mxu1 %v3603_v24  ;;  %v499_v0 = vrot.slane %v478_v39, %v498_v50 }
  0xcf   : > { %v507_v5 = vrot.slane %v478_v39, %v506_v53  ;;  %v503_v9 = vrot.slane %v478_v39, %v502_v56  ;;  %v511_v13 = vrot.slane %v478_v39, %v510_v59 }
  0xd0   : > { %3604 = vmatmul.mubr.msk.bf16.vlgmr.msra.gmra.mxu0 %vm600_vm0, %v461_v27  ;;  %3605 = vmatmul.mubr.msk.bf16.vlgmr.msra.gmra.mxu1 %vm600_vm0, %v461_v27 }
  0xd1   : > { %703 = vmatpush1.bf16.msra.mxu0 %v3600_v30  ;;  %746 = vmatpush1.bf16.msra.mxu1 %v3602_v31 }
  0xd2   : > { %704 = vmatprep.subr.bf16.mxu0 %v3593_v32  ;;  %747 = vmatprep.subr.bf16.mxu1 %v3595_v33 }
  0xd3   : > { %722 = vmatprep.mubr.bf16.mxu0 %v4358_v8  ;;  %765 = vmatprep.mubr.bf16.mxu1 %v4358_v8 }
  0xd5   : > { %705 = vmatpush1.bf16.msra.mxu0 %v3592_v34  ;;  %748 = vmatpush1.bf16.msra.mxu1 %v3594_v35 }
  0xd8   : > { %3606 = vmatmul.mubr.msk.bf16.vlgmr.msra.gmra.mxu0 %vm600_vm0, %v461_v27  ;;  %3607 = vmatmul.mubr.msk.bf16.vlgmr.msra.gmra.mxu1 %vm600_vm0, %v461_v27 }
 0x190   : > { %v638_v46 = vpop.f32.mrf.mxu0  ;;  %v681_v49 = vpop.f32.mrf.mxu1 }
 0x191   : > { %v639_v48 = vadd.f32 %v638_v46, %v483_v43  ;;  %v682_v51 = vadd.f32 %v681_v49, %v491_v44 }
 0x192   : > { %v640_v52 = vpop.f32.mrf.mxu0  ;;  %v683_v55 = vpop.f32.mrf.mxu1 }
 0x193   : > { %v641_v54 = vadd.f32 %v640_v52, %v487_v45  ;;  %v684_v57 = vadd.f32 %v683_v55, %v495_v47  ;;  %v776_v60 = vmax.f32 %v639_v48, 0.0  ;;  %v778_v1 = vmax.f32 %v682_v51, 0.0 }
 0x194   : > { %v642_v58 = vpop.f32.mrf.mxu0  ;;  %v685_v63 = vpop.f32.mrf.mxu1 }
 0x195   : > { %v777_v61 = vmax.f32 %v641_v54, 0.0  ;;  %v643_v62 = vadd.f32 %v642_v58, %v483_v43  ;;  %v779_v2 = vmax.f32 %v684_v57, 0.0  ;;  %v686_v3 = vadd.f32 %v685_v63, %v491_v44 }
 0x196   : > { %v644_v4 = vpop.f32.mrf.mxu0  ;;  %v687_v8 = vpop.f32.mrf.mxu1 }
 0x197   : > { %v3726_v6 = vpack.c.bf16 %v777_v61, %v776_v60  ;;  %v645_v7 = vadd.f32 %v644_v4, %v487_v45  ;;  %v3727_v10 = vpack.c.bf16 %v779_v2, %v778_v1  ;;  %v688_v11 = vadd.f32 %v687_v8, %v495_v47 }
 0x198   : > { %v724_v12 = vpop.f32.mrf.mxu0  ;;  %v784_v14 = vmax.f32 %v643_v62, 0.0  ;;  %v767_v17 = vpop.f32.mrf.mxu1  ;;  %v786_v18 = vmax.f32 %v686_v3, 0.0 }
 0x199   : > { %840 = vst [vmem:[#allocation2 + $0x30] sm:$0xff] %v3726_v6  ;;  %v785_v15 = vmax.f32 %v645_v7, 0.0  ;;  %v725_v16 = vadd.f32 %v724_v12, %v499_v0  ;;  %841 = vst [vmem:[#allocation2] sm:$0xff] %v3727_v10  ;;  %v787_v19 = vmax.f32 %v688_v11, 0.0  ;;  %v768_v20 = vadd.f32 %v767_v17, %v507_v5 }
 0x19a   : > { %v726_v21 = vpop.f32.mrf.mxu0  ;;  %v769_v24 = vpop.f32.mrf.mxu1 }
 0x19b   : > { %v3730_v22 = vpack.c.bf16 %v785_v15, %v784_v14  ;;  %v727_v23 = vadd.f32 %v726_v21, %v503_v9  ;;  %v3731_v25 = vpack.c.bf16 %v787_v19, %v786_v18  ;;  %v770_v26 = vadd.f32 %v769_v24, %v511_v13 }
 0x19c   : > { %v728_v27 = vpop.f32.mrf.mxu0  ;;  %v780_v28 = vmax.f32 %v725_v16, 0.0  ;;  %v771_v31 = vpop.f32.mrf.mxu1  ;;  %v782_v32 = vmax.f32 %v768_v20, 0.0 }
 0x19d   : > { %844 = vst [vmem:[#allocation2 + $0x8] sm:$0xff] %v3730_v22  ;;  %v781_v29 = vmax.f32 %v727_v23, 0.0  ;;  %v729_v30 = vadd.f32 %v728_v27, %v499_v0  ;;  %845 = vst [vmem:[#allocation2 + $0x20] sm:$0xff] %v3731_v25  ;;  %v783_v33 = vmax.f32 %v770_v26, 0.0  ;;  %v772_v34 = vadd.f32 %v771_v31, %v507_v5 }
 0x19e   : > { %v730_v35 = vpop.f32.mrf.mxu0  ;;  %v773_v38 = vpop.f32.mrf.mxu1 }
 0x19f   : > { %v3728_v36 = vpack.c.bf16 %v781_v29, %v780_v28  ;;  %v731_v37 = vadd.f32 %v730_v35, %v503_v9  ;;  %v3729_v39 = vpack.c.bf16 %v783_v33, %v782_v32  ;;  %v774_v40 = vadd.f32 %v773_v38, %v511_v13 }
 0x1a0   : > { %v788_v41 = vmax.f32 %v729_v30, 0.0  ;;  %v790_v43 = vmax.f32 %v772_v34, 0.0 }
 0x1a1   : > { %842 = vst [vmem:[#allocation2 + $0x18] sm:$0xff] %v3728_v36  ;;  %v789_v42 = vmax.f32 %v731_v37, 0.0  ;;  %843 = vst [vmem:[#allocation2 + $0x10] sm:$0xff] %v3729_v39  ;;  %v791_v44 = vmax.f32 %v774_v40, 0.0 }
 0x1a3   : > { %v3732_v45 = vpack.c.bf16 %v789_v42, %v788_v41  ;;  %v3733_v46 = vpack.c.bf16 %v791_v44, %v790_v43 }
 0x1a5   : > { %846 = vst [vmem:[#allocation2 + $0x28] sm:$0xff] %v3732_v45  ;;  %847 = vst [vmem:[#allocation2 + $0x38] sm:$0xff] %v3733_v46 }
 0x1a6 PF: > { %v873_v47 = vld [vmem:[%s4623_s26 + $0xc8] sm:$0xff]  ;;  %v872_v49 = vld [vmem:[%s4623_s26 + $0xc0] sm:$0xff]  ;;  %v4661_v7 = vld [vmem:[#allocation2 + $0x34] ss:$-40 sps:$4 sm:$0xff]   ;;  %s2485_s18 = ssub.s32 0, %s4428_s11  ;;  %p2484_p12 = scmp.lt.s32.totalorder %s4428_s11, 0 }
 0x1a7   : > { %v937_v48 = vld [vmem:[%s4623_s26 + $0x2c8] sm:$0xff]  ;;  %v1153_v50 = vunpack.c.l.s8.bf16 %v873_v47  ;;  %v1161_v51 = vunpack.c.h.s8.bf16 %v873_v47  ;;  %v936_v54 = vld [vmem:[%s4623_s26 + $0x2c0] sm:$0xff]  ;;  %v1160_v55 = vunpack.c.h.s8.bf16 %v872_v49  ;;  %v1152_v59 = vunpack.c.l.s8.bf16 %v872_v49  ;;  %1696 = vmatprep.mubr.bf16.mxu0 %v4661_v7  ;;  %s3624_s23 = smin.u32 %s4428_s11, %s2485_s18 }
 0x1a8   : > { %v1281_v52 = vunpack.c.l.s8.bf16 %v937_v48  ;;  %v1289_v53 = vunpack.c.h.s8.bf16 %v937_v48  ;;  %v1288_v56 = vunpack.c.h.s8.bf16 %v936_v54  ;;  %v865_v57 = vld [vmem:[%s4623_s26 + $0x88] sm:$0xff]  ;;  %v1280_v60 = vunpack.c.l.s8.bf16 %v936_v54  ;;  %v864_v63 = vld [vmem:[%s4623_s26 + $0x80] sm:$0xff]  ;;  %s2487_s27 = sand.u32 1, %s3624_s23  }
 0x1a9   : > { %v929_v58 = vld [vmem:[%s4623_s26 + $0x288] sm:$0xff]  ;;  %1664 = vmatprep.subr.bf16.mxu0 %v1161_v51  ;;  %v1145_v61 = vunpack.c.h.s8.bf16 %v865_v57  ;;  %v928_v0 = vld [vmem:[%s4623_s26 + $0x280] sm:$0xff]  ;;  %v1144_v1 = vunpack.c.h.s8.bf16 %v864_v63  ;;  %v1137_v3 = vunpack.c.l.s8.bf16 %v865_v57  ;;  %v1136_v8 = vunpack.c.l.s8.bf16 %v864_v63  ;;  %s2488_s19 = ssub.s32 0, %s2487_s27 }
 0x1aa   : > { %1707 = vmatprep.subr.bf16.mxu1 %v1289_v53  ;;  %1665 = vmatpush1.bf16.msra.mxu0 %v1160_v55  ;;  %v1273_v62 = vunpack.c.h.s8.bf16 %v929_v58  ;;  %v1272_v2 = vunpack.c.h.s8.bf16 %v928_v0  ;;  %v1265_v4 = vunpack.c.l.s8.bf16 %v929_v58  ;;  %v857_v5 = vld [vmem:[%s4623_s26 + $0x48] sm:$0xff]  ;;  %v1264_v9 = vunpack.c.l.s8.bf16 %v928_v0  ;;  %v856_v12 = vld [vmem:[%s4623_s26 + $0x40] sm:$0xff]  ;;  %s5215_s19 = smov (!%p2484_p12, %s2488_s19), %s2487_s27 }
 0x1ab   : > { %1708 = vmatpush1.bf16.msra.mxu1 %v1288_v56  ;;  %1666 = vmatprep.subr.bf16.mxu0 %v1153_v50  ;;  %v921_v6 = vld [vmem:[%s4623_s26 + $0x248] sm:$0xff]  ;;  %v1129_v10 = vunpack.c.h.s8.bf16 %v857_v5  ;;  %v920_v13 = vld [vmem:[%s4623_s26 + $0x240] sm:$0xff]  ;;  %v1128_v16 = vunpack.c.h.s8.bf16 %v856_v12  ;;  %v1121_v18 = vunpack.c.l.s8.bf16 %v857_v5  ;;  %v1120_v23 = vunpack.c.l.s8.bf16 %v856_v12  ;;  %p3626_p13 = scmp.lt.s32.totalorder %s5215_s19, 0  ;;  %s2494_s13 = sadd.s32 2, %s5215_s19 }
 0x1ac   : > { %1709 = vmatprep.subr.bf16.mxu1 %v1281_v52  ;;  %v1257_v11 = vunpack.c.h.s8.bf16 %v921_v6  ;;  %v4666_v14 = vld [vmem:[#allocation2] sm:$0xff]  ;;  %v1256_v17 = vunpack.c.h.s8.bf16 %v920_v13  ;;  %v1249_v19 = vunpack.c.l.s8.bf16 %v921_v6  ;;  %v1248_v24 = vunpack.c.l.s8.bf16 %v920_v13  ;;  %v848_v27 = vld [vmem:[%s4623_s26] sm:$0xff] }
 0x1ad   : > { %v4668_v15 = vld [vmem:[#allocation2 + $0x20] sm:$0xff]  ;;  %v912_v28 = vld [vmem:[%s4623_s26 + $0x200] sm:$0xff]  ;;  %v1112_v29 = vunpack.c.h.s8.bf16 %v848_v27  ;;  %v1104_v35 = vunpack.c.l.s8.bf16 %v848_v27  ;;  %s5217_s13 = smov (!%p3626_p13, %s2494_s13), %s5215_s19 }
 0x1ae   : > { %1667 = vmatpush1.bf16.msra.mxu0 %v1152_v59  ;;  %v4672_v20 = vcombine.high %v4666_v14, %v4668_v15  ;;  %v849_v21 = vld [vmem:[%s4623_s26 + $0x8] sm:$0xff]  ;;  %v1240_v30 = vunpack.c.h.s8.bf16 %v912_v28  ;;  %v1232_v36 = vunpack.c.l.s8.bf16 %v912_v28  ;;  %v904_v39 = vld [vmem:[%s4623_s26 + $0x1c0] sm:$0xff]  ;;  %p3627_p5 = scmp.ne.s32.totalorder %s5217_s13, 0 }
 0x1af   : > { %1710 = vmatpush1.bf16.msra.mxu1 %v1280_v60  ;;  %1668 = vmatprep.subr.bf16.mxu0 %v1145_v61  ;;  %v913_v22 = vld [vmem:[%s4623_s26 + $0x208] sm:$0xff]  ;;  %v1113_v25 = vunpack.c.h.s8.bf16 %v849_v21  ;;  %v1105_v31 = vunpack.c.l.s8.bf16 %v849_v21  ;;  %v968_v40 = vld [vmem:[%s4623_s26 + $0x3c0] sm:$0xff]  ;;  %v1224_v41 = vunpack.c.h.s8.bf16 %v904_v39  ;;  %v1216_v47 = vunpack.c.l.s8.bf16 %v904_v39 }
 0x1b0   : > { %1711 = vmatprep.subr.bf16.mxu1 %v1273_v62  ;;  %1739 = vmatprep.mubr.bf16.mxu1 %v4672_v20  ;;  %v1241_v26 = vunpack.c.h.s8.bf16 %v913_v22  ;;  %v1233_v32 = vunpack.c.l.s8.bf16 %v913_v22  ;;  %v905_v33 = vld [vmem:[%s4623_s26 + $0x1c8] sm:$0xff]  ;;  %v1352_v42 = vunpack.c.h.s8.bf16 %v968_v40  ;;  %v1344_v48 = vunpack.c.l.s8.bf16 %v968_v40  ;;  %v896_v51 = vld [vmem:[%s4623_s26 + $0x180] sm:$0xff] }
 0x1b1   : > { %v969_v34 = vld [vmem:[%s4623_s26 + $0x3c8] sm:$0xff]  ;;  %v1225_v37 = vunpack.c.h.s8.bf16 %v905_v33  ;;  %v1217_v43 = vunpack.c.l.s8.bf16 %v905_v33  ;;  %v960_v52 = vld [vmem:[%s4623_s26 + $0x380] sm:$0xff]  ;;  %v1208_v53 = vunpack.c.h.s8.bf16 %v896_v51  ;;  %v1200_v59 = vunpack.c.l.s8.bf16 %v896_v51 }
 0x1b2   : > { %1669 = vmatpush1.bf16.msra.mxu0 %v1144_v1  ;;  %v1353_v38 = vunpack.c.h.s8.bf16 %v969_v34  ;;  %v1345_v44 = vunpack.c.l.s8.bf16 %v969_v34  ;;  %v897_v45 = vld [vmem:[%s4623_s26 + $0x188] sm:$0xff]  ;;  %v1336_v54 = vunpack.c.h.s8.bf16 %v960_v52  ;;  %v1328_v60 = vunpack.c.l.s8.bf16 %v960_v52  ;;  %v888_v63 = vld [vmem:[%s4623_s26 + $0x140] sm:$0xff] }
 0x1b3   : > { %1712 = vmatpush1.bf16.msra.mxu1 %v1272_v2  ;;  %1670 = vmatprep.subr.bf16.mxu0 %v1137_v3  ;;  %v961_v46 = vld [vmem:[%s4623_s26 + $0x388] sm:$0xff]  ;;  %v1209_v49 = vunpack.c.h.s8.bf16 %v897_v45  ;;  %v1201_v55 = vunpack.c.l.s8.bf16 %v897_v45  ;;  %v952_v0 = vld [vmem:[%s4623_s26 + $0x340] sm:$0xff]  ;;  %v1192_v1 = vunpack.c.h.s8.bf16 %v888_v63 }
 0x1b4   : > { %1713 = vmatprep.subr.bf16.mxu1 %v1265_v4  ;;  %v1337_v50 = vunpack.c.h.s8.bf16 %v961_v46  ;;  %v1329_v56 = vunpack.c.l.s8.bf16 %v961_v46  ;;  %v889_v57 = vld [vmem:[%s4623_s26 + $0x148] sm:$0xff]  ;;  %v1320_v2 = vunpack.c.h.s8.bf16 %v952_v0  ;;  %v880_v12 = vld [vmem:[%s4623_s26 + $0x100] sm:$0xff] }
 0x1b5   : > { %v953_v58 = vld [vmem:[%s4623_s26 + $0x348] sm:$0xff]  ;;  %v1193_v61 = vunpack.c.h.s8.bf16 %v889_v57  ;;  %v1185_v3 = vunpack.c.l.s8.bf16 %v889_v57  ;;  %v944_v13 = vld [vmem:[%s4623_s26 + $0x300] sm:$0xff] }
 0x1b6   : > { %1671 = vmatpush1.bf16.msra.mxu0 %v1136_v8  ;;  %v1321_v62 = vunpack.c.h.s8.bf16 %v953_v58  ;;  %v1313_v4 = vunpack.c.l.s8.bf16 %v953_v58  ;;  %v881_v5 = vld [vmem:[%s4623_s26 + $0x108] sm:$0xff]  ;;  %v1184_v8 = vunpack.c.l.s8.bf16 %v888_v63  ;;  %v1000_v27 = vld [vmem:[%s4623_s26 + $0x4c0] sm:$0xff] }
 0x1b7   : > { %1714 = vmatpush1.bf16.msra.mxu1 %v1264_v9  ;;  %1672 = vmatprep.subr.bf16.mxu0 %v1129_v10  ;;  %v945_v6 = vld [vmem:[%s4623_s26 + $0x308] sm:$0xff]  ;;  %v1312_v9 = vunpack.c.l.s8.bf16 %v952_v0  ;;  %v1177_v10 = vunpack.c.h.s8.bf16 %v881_v5  ;;  %v1064_v28 = vld [vmem:[%s4623_s26 + $0x6c0] sm:$0xff] }
 0x1b8   : > { %1715 = vmatprep.subr.bf16.mxu1 %v1257_v11  ;;  %v1305_v11 = vunpack.c.h.s8.bf16 %v945_v6  ;;  %v1001_v21 = vld [vmem:[%s4623_s26 + $0x4c8] sm:$0xff] }
 0x1b9   : > { %v1065_v22 = vld [vmem:[%s4623_s26 + $0x6c8] sm:$0xff]  ;;  %v1409_v33 = vunpack.c.l.s8.bf16 %v1001_v21 }
 0x1ba   : > { %1673 = vmatpush1.bf16.msra.mxu0 %v1128_v16  ;;  %v1176_v16 = vunpack.c.h.s8.bf16 %v880_v12  ;;  %v1537_v34 = vunpack.c.l.s8.bf16 %v1065_v22 }
 0x1bb   : > { %1716 = vmatpush1.bf16.msra.mxu1 %v1256_v17  ;;  %1674 = vmatprep.subr.bf16.mxu0 %v1121_v18  ;;  %v1304_v17 = vunpack.c.h.s8.bf16 %v944_v13  ;;  %v1169_v18 = vunpack.c.l.s8.bf16 %v881_v5 }
 0x1bc   : > { %1717 = vmatprep.subr.bf16.mxu1 %v1249_v19  ;;  %v1297_v19 = vunpack.c.l.s8.bf16 %v945_v6 }
 0x1be   : > { %1675 = vmatpush1.bf16.msra.mxu0 %v1120_v23  ;;  %v1168_v23 = vunpack.c.l.s8.bf16 %v880_v12 }
 0x1bf   : > { %1718 = vmatpush1.bf16.msra.mxu1 %v1248_v24  ;;  %1676 = vmatprep.subr.bf16.mxu0 %v1113_v25  ;;  %v1296_v24 = vunpack.c.l.s8.bf16 %v944_v13  ;;  %v1417_v25 = vunpack.c.h.s8.bf16 %v1001_v21 }
 0x1c0   : > { %1719 = vmatprep.subr.bf16.mxu1 %v1241_v26  ;;  %v1545_v26 = vunpack.c.h.s8.bf16 %v1065_v22 }
 0x1c2   : > { %1677 = vmatpush1.bf16.msra.mxu0 %v1112_v29  ;;  %v4699_v29 = vld [vmem:[#allocation2 + $0x30] ss:$-40 sps:$4 sm:$0xff]  }
 0x1c3   : > { %1720 = vmatpush1.bf16.msra.mxu1 %v1240_v30  ;;  %1678 = vmatprep.subr.bf16.mxu0 %v1105_v31  ;;  %v4703_v30 = vcombine.low %v4666_v14, %v4668_v15  ;;  %v1416_v31 = vunpack.c.h.s8.bf16 %v1000_v27  ;;  %v1408_v14 = vunpack.c.l.s8.bf16 %v1000_v27  ;;  %v1536_v15 = vunpack.c.l.s8.bf16 %v1064_v28 }
 0x1c4   : > { %1721 = vmatprep.subr.bf16.mxu1 %v1233_v32  ;;  %v1544_v32 = vunpack.c.h.s8.bf16 %v1064_v28 }
 0x1c6   : > { %1679 = vmatpush1.bf16.msra.mxu0 %v1104_v35  ;;  %v993_v35 = vld [vmem:[%s4623_s26 + $0x488] sm:$0xff] }
 0x1c7   : > { %1722 = vmatpush1.bf16.msra.mxu1 %v1232_v36  ;;  %1680 = vmatprep.subr.bf16.mxu0 %v1225_v37  ;;  %v1057_v36 = vld [vmem:[%s4623_s26 + $0x688] sm:$0xff]  ;;  %v4707_v37 = vld [vmem:[#allocation2 + $0x1c] ss:$16 sps:$4 sm:$0xff]   ;;  %v1401_v39 = vunpack.c.h.s8.bf16 %v993_v35  ;;  %v1393_v45 = vunpack.c.l.s8.bf16 %v993_v35 }
 0x1c8   : > { %1723 = vmatprep.subr.bf16.mxu1 %v1353_v38  ;;  %v4709_v38 = vld [vmem:[#allocation2 + $0x14] ss:$40 sps:$4 sm:$0xff]   ;;  %v1529_v40 = vunpack.c.h.s8.bf16 %v1057_v36  ;;  %v1521_v46 = vunpack.c.l.s8.bf16 %v1057_v36 }
 0x1ca   : > { %1681 = vmatpush2.bf16.msra.mxu0 %v1224_v41  ;;  %v992_v41 = vld [vmem:[%s4623_s26 + $0x480] sm:$0xff] }
 0x1cb   : > { %1724 = vmatpush2.bf16.msra.mxu1 %v1352_v42  ;;  %1682 = vmatprep.subr.bf16.mxu0 %v1217_v43  ;;  %v1056_v42 = vld [vmem:[%s4623_s26 + $0x680] sm:$0xff]  ;;  %v1400_v43 = vunpack.c.h.s8.bf16 %v992_v41 }
 0x1cc   : > { %1725 = vmatprep.subr.bf16.mxu1 %v1345_v44  ;;  %v1528_v44 = vunpack.c.h.s8.bf16 %v1056_v42 }
 0x1ce   : > { %1683 = vmatpush2.bf16.msra.mxu0 %v1216_v47  ;;  %v985_v47 = vld [vmem:[%s4623_s26 + $0x448] sm:$0xff] }
 0x1cf   : > { %1726 = vmatpush2.bf16.msra.mxu1 %v1344_v48  ;;  %1684 = vmatprep.subr.bf16.mxu0 %v1209_v49  ;;  %v1049_v48 = vld [vmem:[%s4623_s26 + $0x648] sm:$0xff]  ;;  %v1392_v49 = vunpack.c.l.s8.bf16 %v992_v41  ;;  %v1385_v51 = vunpack.c.h.s8.bf16 %v985_v47  ;;  %v1377_v57 = vunpack.c.l.s8.bf16 %v985_v47 }
 0x1d0   : > { %1727 = vmatprep.subr.bf16.mxu1 %v1337_v50  ;;  %v1520_v50 = vunpack.c.l.s8.bf16 %v1056_v42  ;;  %v1513_v52 = vunpack.c.h.s8.bf16 %v1049_v48  ;;  %v1505_v58 = vunpack.c.l.s8.bf16 %v1049_v48 }
 0x1d2   : > { %1685 = vmatpush2.bf16.msra.mxu0 %v1208_v53  ;;  %v984_v53 = vld [vmem:[%s4623_s26 + $0x440] sm:$0xff] }
 0x1d3   : > { %1728 = vmatpush2.bf16.msra.mxu1 %v1336_v54  ;;  %1686 = vmatprep.subr.bf16.mxu0 %v1201_v55  ;;  %v1048_v54 = vld [vmem:[%s4623_s26 + $0x640] sm:$0xff]  ;;  %v1384_v55 = vunpack.c.h.s8.bf16 %v984_v53 }
 0x1d4   : > { %1729 = vmatprep.subr.bf16.mxu1 %v1329_v56  ;;  %v1512_v56 = vunpack.c.h.s8.bf16 %v1048_v54 }
 0x1d6   : > { %1687 = vmatpush2.bf16.msra.mxu0 %v1200_v59  ;;  %v977_v59 = vld [vmem:[%s4623_s26 + $0x408] sm:$0xff] }
 0x1d7   : > { %1730 = vmatpush2.bf16.msra.mxu1 %v1328_v60  ;;  %1688 = vmatprep.subr.bf16.mxu0 %v1193_v61  ;;  %v1041_v60 = vld [vmem:[%s4623_s26 + $0x608] sm:$0xff]  ;;  %v1376_v61 = vunpack.c.l.s8.bf16 %v984_v53  ;;  %v1369_v63 = vunpack.c.h.s8.bf16 %v977_v59  ;;  %v1361_v5 = vunpack.c.l.s8.bf16 %v977_v59 }
 0x1d8   : > { %1731 = vmatprep.subr.bf16.mxu1 %v1321_v62  ;;  %v1504_v62 = vunpack.c.l.s8.bf16 %v1048_v54  ;;  %v1497_v0 = vunpack.c.h.s8.bf16 %v1041_v60  ;;  %v1489_v6 = vunpack.c.l.s8.bf16 %v1041_v60 }
 0x1da   : > { %1689 = vmatpush2.bf16.msra.mxu0 %v1192_v1  ;;  %v976_v1 = vld [vmem:[%s4623_s26 + $0x400] sm:$0xff] }
 0x1db   : > { %1732 = vmatpush2.bf16.msra.mxu1 %v1320_v2  ;;  %1690 = vmatprep.subr.bf16.mxu0 %v1185_v3  ;;  %v1040_v2 = vld [vmem:[%s4623_s26 + $0x600] sm:$0xff]  ;;  %v1368_v3 = vunpack.c.h.s8.bf16 %v976_v1 }
 0x1dc   : > { %1733 = vmatprep.subr.bf16.mxu1 %v1313_v4  ;;  %v1496_v4 = vunpack.c.h.s8.bf16 %v1040_v2 }
 0x1de   : > { %1691 = vmatpush2.bf16.msra.mxu0 %v1184_v8  ;;  %v1033_v8 = vld [vmem:[%s4623_s26 + $0x5c8] sm:$0xff] }
 0x1df   : > { %1734 = vmatpush2.bf16.msra.mxu1 %v1312_v9  ;;  %1692 = vmatprep.subr.bf16.mxu0 %v1177_v10  ;;  %v1097_v9 = vld [vmem:[%s4623_s26 + $0x7c8] sm:$0xff]  ;;  %v1360_v10 = vunpack.c.l.s8.bf16 %v976_v1  ;;  %v1481_v12 = vunpack.c.h.s8.bf16 %v1033_v8  ;;  %v1473_v21 = vunpack.c.l.s8.bf16 %v1033_v8 }
 0x1e0   : > { %1735 = vmatprep.subr.bf16.mxu1 %v1305_v11  ;;  %v1488_v11 = vunpack.c.l.s8.bf16 %v1040_v2  ;;  %v1609_v13 = vunpack.c.h.s8.bf16 %v1097_v9  ;;  %v1601_v22 = vunpack.c.l.s8.bf16 %v1097_v9 }
 0x1e2   : > { %1693 = vmatpush2.bf16.msra.mxu0 %v1176_v16  ;;  %v1032_v16 = vld [vmem:[%s4623_s26 + $0x5c0] sm:$0xff] }
 0x1e3   : > { %1736 = vmatpush2.bf16.msra.mxu1 %v1304_v17  ;;  %1694 = vmatprep.subr.bf16.mxu0 %v1169_v18  ;;  %v1096_v17 = vld [vmem:[%s4623_s26 + $0x7c0] sm:$0xff]  ;;  %v1480_v18 = vunpack.c.h.s8.bf16 %v1032_v16 }
 0x1e4   : > { %1737 = vmatprep.subr.bf16.mxu1 %v1297_v19  ;;  %v1608_v19 = vunpack.c.h.s8.bf16 %v1096_v17 }
 0x1e6   : > { %1695 = vmatpush2.bf16.msra.mxu0 %v1168_v23  ;;  %v1025_v23 = vld [vmem:[%s4623_s26 + $0x588] sm:$0xff] }
 0x1e7   : > { %1738 = vmatpush2.bf16.msra.mxu1 %v1296_v24  ;;  %1750 = vmatprep.subr.bf16.mxu0 %v1417_v25  ;;  %v1089_v24 = vld [vmem:[%s4623_s26 + $0x788] sm:$0xff]  ;;  %v1472_v25 = vunpack.c.l.s8.bf16 %v1032_v16  ;;  %v1465_v27 = vunpack.c.h.s8.bf16 %v1025_v23  ;;  %v1457_v35 = vunpack.c.l.s8.bf16 %v1025_v23 }
 0x1e8   : > { %1793 = vmatprep.subr.bf16.mxu1 %v1545_v26  ;;  %v1600_v26 = vunpack.c.l.s8.bf16 %v1096_v17  ;;  %v1593_v28 = vunpack.c.h.s8.bf16 %v1089_v24  ;;  %v1585_v36 = vunpack.c.l.s8.bf16 %v1089_v24 }
 0x1e9   : > { %1697 = vmatmul.mubr.bf16.vlgmr.msra.gmra.mxu0 %v4699_v29 }
 0x1ea   : > { %1740 = vmatmul.mubr.bf16.vlgmr.msra.gmra.mxu1 %v4703_v30  ;;  %1751 = vmatpush1.bf16.msra.mxu0 %v1416_v31  ;;  %v1024_v31 = vld [vmem:[%s4623_s26 + $0x580] sm:$0xff] }
 0x1eb   : > { %1794 = vmatpush1.bf16.msra.mxu1 %v1544_v32  ;;  %1752 = vmatprep.subr.bf16.mxu0 %v1409_v33  ;;  %v1088_v32 = vld [vmem:[%s4623_s26 + $0x780] sm:$0xff]  ;;  %v1464_v33 = vunpack.c.h.s8.bf16 %v1024_v31 }
 0x1ec   : > { %1795 = vmatprep.subr.bf16.mxu1 %v1537_v34  ;;  %1782 = vmatprep.mubr.bf16.mxu0 %v4707_v37  ;;  %v1592_v34 = vunpack.c.h.s8.bf16 %v1088_v32 }
 0x1ed   : > { %1825 = vmatprep.mubr.bf16.mxu1 %v4709_v38 }
 0x1ee   : > { %1753 = vmatpush1.bf16.msra.mxu0 %v1408_v14  ;;  %v1017_v14 = vld [vmem:[%s4623_s26 + $0x548] sm:$0xff] }
 0x1ef   : > { %1796 = vmatpush1.bf16.msra.mxu1 %v1536_v15  ;;  %1754 = vmatprep.subr.bf16.mxu0 %v1401_v39  ;;  %v1081_v15 = vld [vmem:[%s4623_s26 + $0x748] sm:$0xff]  ;;  %v1456_v39 = vunpack.c.l.s8.bf16 %v1024_v31  ;;  %v1449_v41 = vunpack.c.h.s8.bf16 %v1017_v14  ;;  %v1441_v47 = vunpack.c.l.s8.bf16 %v1017_v14 }
 0x1f0   : > { %1797 = vmatprep.subr.bf16.mxu1 %v1529_v40  ;;  %v1584_v40 = vunpack.c.l.s8.bf16 %v1088_v32  ;;  %v1577_v42 = vunpack.c.h.s8.bf16 %v1081_v15  ;;  %v1569_v48 = vunpack.c.l.s8.bf16 %v1081_v15 }
 0x1f2   : > { %1755 = vmatpush1.bf16.msra.mxu0 %v1400_v43  ;;  %v1016_v43 = vld [vmem:[%s4623_s26 + $0x540] sm:$0xff] }
 0x1f3   : > { %1798 = vmatpush1.bf16.msra.mxu1 %v1528_v44  ;;  %1756 = vmatprep.subr.bf16.mxu0 %v1393_v45  ;;  %v1080_v44 = vld [vmem:[%s4623_s26 + $0x740] sm:$0xff]  ;;  %v1448_v45 = vunpack.c.h.s8.bf16 %v1016_v43 }
 0x1f4   : > { %1799 = vmatprep.subr.bf16.mxu1 %v1521_v46  ;;  %v1576_v46 = vunpack.c.h.s8.bf16 %v1080_v44 }
 0x1f6   : > { %1757 = vmatpush1.bf16.msra.mxu0 %v1392_v49  ;;  %v1009_v49 = vld [vmem:[%s4623_s26 + $0x508] sm:$0xff] }
 0x1f7   : > { %1800 = vmatpush1.bf16.msra.mxu1 %v1520_v50  ;;  %1758 = vmatprep.subr.bf16.mxu0 %v1385_v51  ;;  %v1073_v50 = vld [vmem:[%s4623_s26 + $0x708] sm:$0xff]  ;;  %v1440_v51 = vunpack.c.l.s8.bf16 %v1016_v43  ;;  %v1433_v53 = vunpack.c.h.s8.bf16 %v1009_v49  ;;  %v1425_v59 = vunpack.c.l.s8.bf16 %v1009_v49 }
 0x1f8   : > { %1801 = vmatprep.subr.bf16.mxu1 %v1513_v52  ;;  %v1568_v52 = vunpack.c.l.s8.bf16 %v1080_v44  ;;  %v1561_v54 = vunpack.c.h.s8.bf16 %v1073_v50  ;;  %v1553_v60 = vunpack.c.l.s8.bf16 %v1073_v50 }
 0x1fa   : > { %1759 = vmatpush1.bf16.msra.mxu0 %v1384_v55  ;;  %v1008_v55 = vld [vmem:[%s4623_s26 + $0x500] sm:$0xff] }
 0x1fb   : > { %1802 = vmatpush1.bf16.msra.mxu1 %v1512_v56  ;;  %1760 = vmatprep.subr.bf16.mxu0 %v1377_v57  ;;  %v1072_v56 = vld [vmem:[%s4623_s26 + $0x700] sm:$0xff]  ;;  %v1432_v57 = vunpack.c.h.s8.bf16 %v1008_v55 }
 0x1fc   : > { %1803 = vmatprep.subr.bf16.mxu1 %v1505_v58  ;;  %v1560_v58 = vunpack.c.h.s8.bf16 %v1072_v56 }
 0x1fe   : > { %1761 = vmatpush1.bf16.msra.mxu0 %v1376_v61  ;;  %v875_v61 = vld [vmem:[%s4623_s26 + $0xd8] sm:$0xff] }
 0x1ff   : > { %1804 = vmatpush1.bf16.msra.mxu1 %v1504_v62  ;;  %1762 = vmatprep.subr.bf16.mxu0 %v1369_v63  ;;  %v939_v62 = vld [vmem:[%s4623_s26 + $0x2d8] sm:$0xff]  ;;  %v1424_v63 = vunpack.c.l.s8.bf16 %v1008_v55  ;;  %v1163_v1 = vunpack.c.h.s8.bf16 %v875_v61 }
 0x200   : > { %1805 = vmatprep.subr.bf16.mxu1 %v1497_v0  ;;  %v1552_v0 = vunpack.c.l.s8.bf16 %v1072_v56  ;;  %v1291_v2 = vunpack.c.h.s8.bf16 %v939_v62 }
 0x202   : > { %1763 = vmatpush1.bf16.msra.mxu0 %v1368_v3  ;;  %v874_v3 = vld [vmem:[%s4623_s26 + $0xd0] sm:$0xff] }
 0x203   : > { %1806 = vmatpush1.bf16.msra.mxu1 %v1496_v4  ;;  %1764 = vmatprep.subr.bf16.mxu0 %v1361_v5  ;;  %v938_v4 = vld [vmem:[%s4623_s26 + $0x2d0] sm:$0xff]  ;;  %v1162_v8 = vunpack.c.h.s8.bf16 %v874_v3  ;;  %v1154_v16 = vunpack.c.l.s8.bf16 %v874_v3 }
 0x204   : > { %1807 = vmatprep.subr.bf16.mxu1 %v1489_v6  ;;  %v4745_v5 = vld [vmem:[#allocation2 + $0x18] ss:$16 sps:$4 sm:$0xff]   ;;  %v1290_v9 = vunpack.c.h.s8.bf16 %v938_v4  ;;  %v1282_v17 = vunpack.c.l.s8.bf16 %v938_v4 }
 0x205   : > { %v4747_v6 = vld [vmem:[#allocation2 + $0x10] ss:$40 sps:$4 sm:$0xff]  }
 0x206   : > { %1765 = vmatpush1.bf16.msra.mxu0 %v1360_v10  ;;  %v1155_v10 = vunpack.c.l.s8.bf16 %v875_v61 }
 0x207   : > { %1808 = vmatpush1.bf16.msra.mxu1 %v1488_v11  ;;  %1766 = vmatprep.subr.bf16.mxu0 %v1481_v12  ;;  %v1283_v11 = vunpack.c.l.s8.bf16 %v939_v62  ;;  %v867_v12 = vld [vmem:[%s4623_s26 + $0x98] sm:$0xff] }
 0x208   : > { %1809 = vmatprep.subr.bf16.mxu1 %v1609_v13  ;;  %v931_v13 = vld [vmem:[%s4623_s26 + $0x298] sm:$0xff] }
 0x20a   : > { %1767 = vmatpush2.bf16.msra.mxu0 %v1480_v18  ;;  %v1147_v18 = vunpack.c.h.s8.bf16 %v867_v12 }
 0x20b   : > { %1810 = vmatpush2.bf16.msra.mxu1 %v1608_v19  ;;  %1768 = vmatprep.subr.bf16.mxu0 %v1473_v21  ;;  %v1275_v19 = vunpack.c.h.s8.bf16 %v931_v13  ;;  %v866_v21 = vld [vmem:[%s4623_s26 + $0x90] sm:$0xff] }
 0x20c   : > { %1811 = vmatprep.subr.bf16.mxu1 %v1601_v22  ;;  %v930_v22 = vld [vmem:[%s4623_s26 + $0x290] sm:$0xff]  ;;  %v1146_v23 = vunpack.c.h.s8.bf16 %v866_v21  ;;  %v1138_v31 = vunpack.c.l.s8.bf16 %v866_v21 }
 0x20d   : > { %v1274_v24 = vunpack.c.h.s8.bf16 %v930_v22  ;;  %v1266_v32 = vunpack.c.l.s8.bf16 %v930_v22 }
 0x20e   : > { %1769 = vmatpush2.bf16.msra.mxu0 %v1472_v25  ;;  %v1139_v25 = vunpack.c.l.s8.bf16 %v867_v12 }
 0x20f   : > { %1812 = vmatpush2.bf16.msra.mxu1 %v1600_v26  ;;  %1770 = vmatprep.subr.bf16.mxu0 %v1465_v27  ;;  %v1267_v26 = vunpack.c.l.s8.bf16 %v931_v13  ;;  %v859_v27 = vld [vmem:[%s4623_s26 + $0x58] sm:$0xff] }
 0x210   : > { %1813 = vmatprep.subr.bf16.mxu1 %v1593_v28  ;;  %v923_v28 = vld [vmem:[%s4623_s26 + $0x258] sm:$0xff]  ;;  %v1123_v15 = vunpack.c.l.s8.bf16 %v859_v27 }
 0x212   : > { %1771 = vmatpush2.bf16.msra.mxu0 %v1464_v33  ;;  %v1259_v33 = vunpack.c.h.s8.bf16 %v923_v28 }
 0x213   : > { %1814 = vmatpush2.bf16.msra.mxu1 %v1592_v34  ;;  %1772 = vmatprep.subr.bf16.mxu0 %v1457_v35  ;;  %v858_v34 = vld [vmem:[%s4623_s26 + $0x50] sm:$0xff] }
 0x214   : > { %1815 = vmatprep.subr.bf16.mxu1 %v1585_v36  ;;  %v922_v35 = vld [vmem:[%s4623_s26 + $0x250] sm:$0xff]  ;;  %v1130_v36 = vunpack.c.h.s8.bf16 %v858_v34 }
 0x215   : > { %v1258_v14 = vunpack.c.h.s8.bf16 %v922_v35  ;;  %v1250_v43 = vunpack.c.l.s8.bf16 %v922_v35 }
 0x216   : > { %1773 = vmatpush2.bf16.msra.mxu0 %v1456_v39  ;;  %v1251_v39 = vunpack.c.l.s8.bf16 %v923_v28 }
 0x217   : > { %1816 = vmatpush2.bf16.msra.mxu1 %v1584_v40  ;;  %1774 = vmatprep.subr.bf16.mxu0 %v1449_v41  ;;  %v851_v40 = vld [vmem:[%s4623_s26 + $0x18] sm:$0xff] }
 0x218   : > { %1817 = vmatprep.subr.bf16.mxu1 %v1577_v42  ;;  %v915_v41 = vld [vmem:[%s4623_s26 + $0x218] sm:$0xff]  ;;  %v1122_v42 = vunpack.c.l.s8.bf16 %v858_v34  ;;  %v1115_v44 = vunpack.c.h.s8.bf16 %v851_v40  ;;  %v1107_v50 = vunpack.c.l.s8.bf16 %v851_v40 }
 0x21a   : > { %1775 = vmatpush2.bf16.msra.mxu0 %v1448_v45  ;;  %v1243_v45 = vunpack.c.h.s8.bf16 %v915_v41 }
 0x21b   : > { %1818 = vmatpush2.bf16.msra.mxu1 %v1576_v46  ;;  %1776 = vmatprep.subr.bf16.mxu0 %v1441_v47  ;;  %v850_v46 = vld [vmem:[%s4623_s26 + $0x10] sm:$0xff] }
 0x21c   : > { %1819 = vmatprep.subr.bf16.mxu1 %v1569_v48  ;;  %v914_v47 = vld [vmem:[%s4623_s26 + $0x210] sm:$0xff]  ;;  %v1114_v48 = vunpack.c.h.s8.bf16 %v850_v46 }
 0x21d   : > { %v1242_v49 = vunpack.c.h.s8.bf16 %v914_v47  ;;  %v1234_v55 = vunpack.c.l.s8.bf16 %v914_v47 }
 0x21e   : > { %1777 = vmatpush2.bf16.msra.mxu0 %v1440_v51  ;;  %v1235_v51 = vunpack.c.l.s8.bf16 %v915_v41 }
 0x21f   : > { %1820 = vmatpush2.bf16.msra.mxu1 %v1568_v52  ;;  %1778 = vmatprep.subr.bf16.mxu0 %v1433_v53  ;;  %v907_v52 = vld [vmem:[%s4623_s26 + $0x1d8] sm:$0xff] }
 0x220   : > { %1821 = vmatprep.subr.bf16.mxu1 %v1561_v54  ;;  %v971_v53 = vld [vmem:[%s4623_s26 + $0x3d8] sm:$0xff]  ;;  %v1106_v54 = vunpack.c.l.s8.bf16 %v850_v46  ;;  %v1227_v56 = vunpack.c.h.s8.bf16 %v907_v52  ;;  %v1219_v62 = vunpack.c.l.s8.bf16 %v907_v52 }
 0x222   : > { %1779 = vmatpush2.bf16.msra.mxu0 %v1432_v57  ;;  %v1355_v57 = vunpack.c.h.s8.bf16 %v971_v53 }
 0x223   : > { %1822 = vmatpush2.bf16.msra.mxu1 %v1560_v58  ;;  %1780 = vmatprep.subr.bf16.mxu0 %v1425_v59  ;;  %v906_v58 = vld [vmem:[%s4623_s26 + $0x1d0] sm:$0xff] }
 0x224   : > { %1823 = vmatprep.subr.bf16.mxu1 %v1553_v60  ;;  %v970_v59 = vld [vmem:[%s4623_s26 + $0x3d0] sm:$0xff]  ;;  %v1226_v60 = vunpack.c.h.s8.bf16 %v906_v58 }
 0x225   : > { %v1354_v61 = vunpack.c.h.s8.bf16 %v970_v59  ;;  %v1346_v3 = vunpack.c.l.s8.bf16 %v970_v59 }
 0x226   : > { %1781 = vmatpush2.bf16.msra.mxu0 %v1424_v63  ;;  %v1347_v63 = vunpack.c.l.s8.bf16 %v971_v53 }
 0x227   : > { %1824 = vmatpush2.bf16.msra.mxu1 %v1552_v0  ;;  %1836 = vmatprep.subr.bf16.mxu0 %v1163_v1  ;;  %v899_v0 = vld [vmem:[%s4623_s26 + $0x198] sm:$0xff] }
 0x228   : > { %1879 = vmatprep.subr.bf16.mxu1 %v1291_v2  ;;  %v963_v1 = vld [vmem:[%s4623_s26 + $0x398] sm:$0xff]  ;;  %v1218_v2 = vunpack.c.l.s8.bf16 %v906_v58  ;;  %v1211_v4 = vunpack.c.h.s8.bf16 %v899_v0  ;;  %v1203_v13 = vunpack.c.l.s8.bf16 %v899_v0 }
 0x229   : > { %1783 = vmatmul.mubr.bf16.vlgmr.msra.gmra.mxu0 %v4745_v5 }
 0x22a   : > { %1826 = vmatmul.mubr.bf16.vlgmr.msra.gmra.mxu1 %v4747_v6  ;;  %1837 = vmatpush1.bf16.msra.mxu0 %v1162_v8  ;;  %v1339_v8 = vunpack.c.h.s8.bf16 %v963_v1 }
 0x22b   : > { %1880 = vmatpush1.bf16.msra.mxu1 %v1290_v9  ;;  %1838 = vmatprep.subr.bf16.mxu0 %v1155_v10  ;;  %v898_v9 = vld [vmem:[%s4623_s26 + $0x190] sm:$0xff] }
 0x22c   : > { %1881 = vmatprep.subr.bf16.mxu1 %v1283_v11  ;;  %1868 = vmatprep.mubr.bf16.mxu0 %v4661_v7  ;;  %v1131_v7 = vunpack.c.h.s8.bf16 %v859_v27  ;;  %v962_v10 = vld [vmem:[%s4623_s26 + $0x390] sm:$0xff]  ;;  %v1210_v11 = vunpack.c.h.s8.bf16 %v898_v9 }
 0x22d   : > { %1911 = vmatprep.mubr.bf16.mxu1 %v4672_v20  ;;  %v1338_v12 = vunpack.c.h.s8.bf16 %v962_v10  ;;  %v1330_v21 = vunpack.c.l.s8.bf16 %v962_v10  ;;  %v1050_v10 = vld [vmem:[%s4623_s26 + $0x650] sm:$0xff] }
 0x22e   : > { %1839 = vmatpush1.bf16.msra.mxu0 %v1154_v16  ;;  %v1331_v16 = vunpack.c.l.s8.bf16 %v963_v1 }
 0x22f   : > { %1882 = vmatpush1.bf16.msra.mxu1 %v1282_v17  ;;  %1840 = vmatprep.subr.bf16.mxu0 %v1147_v18  ;;  %v891_v17 = vld [vmem:[%s4623_s26 + $0x158] sm:$0xff] }
 0x230   : > { %1883 = vmatprep.subr.bf16.mxu1 %v1275_v19  ;;  %v955_v18 = vld [vmem:[%s4623_s26 + $0x358] sm:$0xff]  ;;  %v1202_v19 = vunpack.c.l.s8.bf16 %v898_v9  ;;  %v1195_v22 = vunpack.c.h.s8.bf16 %v891_v17  ;;  %v1187_v28 = vunpack.c.l.s8.bf16 %v891_v17  ;;  %v986_v9 = vld [vmem:[%s4623_s26 + $0x450] sm:$0xff] }
 0x231   : > { %v979_v17 = vld [vmem:[%s4623_s26 + $0x418] sm:$0xff] }
 0x232   : > { %1841 = vmatpush1.bf16.msra.mxu0 %v1146_v23  ;;  %v1323_v23 = vunpack.c.h.s8.bf16 %v955_v18 }
 0x233   : > { %1884 = vmatpush1.bf16.msra.mxu1 %v1274_v24  ;;  %1842 = vmatprep.subr.bf16.mxu0 %v1139_v25  ;;  %v890_v24 = vld [vmem:[%s4623_s26 + $0x150] sm:$0xff] }
 0x234   : > { %1885 = vmatprep.subr.bf16.mxu1 %v1267_v26  ;;  %v954_v25 = vld [vmem:[%s4623_s26 + $0x350] sm:$0xff]  ;;  %v1194_v26 = vunpack.c.h.s8.bf16 %v890_v24 }
 0x235   : > { %v1322_v27 = vunpack.c.h.s8.bf16 %v954_v25  ;;  %v1314_v34 = vunpack.c.l.s8.bf16 %v954_v25  ;;  %v1042_v25 = vld [vmem:[%s4623_s26 + $0x610] sm:$0xff] }
 0x236   : > { %1843 = vmatpush1.bf16.msra.mxu0 %v1138_v31  ;;  %v1315_v31 = vunpack.c.l.s8.bf16 %v955_v18  ;;  %v1043_v18 = vld [vmem:[%s4623_s26 + $0x618] sm:$0xff] }
 0x237   : > { %1886 = vmatpush1.bf16.msra.mxu1 %v1266_v32  ;;  %1844 = vmatprep.subr.bf16.mxu0 %v1131_v7  ;;  %v883_v32 = vld [vmem:[%s4623_s26 + $0x118] sm:$0xff] }
 0x238   : > { %1887 = vmatprep.subr.bf16.mxu1 %v1259_v33  ;;  %v947_v7 = vld [vmem:[%s4623_s26 + $0x318] sm:$0xff]  ;;  %v1186_v33 = vunpack.c.l.s8.bf16 %v890_v24  ;;  %v1179_v35 = vunpack.c.h.s8.bf16 %v883_v32  ;;  %v1171_v41 = vunpack.c.l.s8.bf16 %v883_v32  ;;  %v978_v24 = vld [vmem:[%s4623_s26 + $0x410] sm:$0xff] }
 0x239   : > { %v1035_v32 = vld [vmem:[%s4623_s26 + $0x5d8] sm:$0xff] }
 0x23a   : > { %1845 = vmatpush1.bf16.msra.mxu0 %v1130_v36  ;;  %v1307_v36 = vunpack.c.h.s8.bf16 %v947_v7 }
 0x23b   : > { %1888 = vmatpush1.bf16.msra.mxu1 %v1258_v14  ;;  %1846 = vmatprep.subr.bf16.mxu0 %v1123_v15  ;;  %v882_v14 = vld [vmem:[%s4623_s26 + $0x110] sm:$0xff] }
 0x23c   : > { %1889 = vmatprep.subr.bf16.mxu1 %v1251_v39  ;;  %v946_v15 = vld [vmem:[%s4623_s26 + $0x310] sm:$0xff]  ;;  %v1178_v39 = vunpack.c.h.s8.bf16 %v882_v14 }
 0x23d   : > { %v1306_v40 = vunpack.c.h.s8.bf16 %v946_v15  ;;  %v1298_v46 = vunpack.c.l.s8.bf16 %v946_v15  ;;  %v1098_v15 = vld [vmem:[%s4623_s26 + $0x7d0] sm:$0xff] }
 0x23e   : > { %1847 = vmatpush1.bf16.msra.mxu0 %v1122_v42  ;;  %v1299_v42 = vunpack.c.l.s8.bf16 %v947_v7  ;;  %v1099_v7 = vld [vmem:[%s4623_s26 + $0x7d8] sm:$0xff] }
 0x23f   : > { %1890 = vmatpush1.bf16.msra.mxu1 %v1250_v43  ;;  %1848 = vmatprep.subr.bf16.mxu0 %v1115_v44  ;;  %v1003_v43 = vld [vmem:[%s4623_s26 + $0x4d8] sm:$0xff] }
 0x240   : > { %1891 = vmatprep.subr.bf16.mxu1 %v1243_v45  ;;  %v1067_v44 = vld [vmem:[%s4623_s26 + $0x6d8] sm:$0xff]  ;;  %v1170_v45 = vunpack.c.l.s8.bf16 %v882_v14  ;;  %v1419_v47 = vunpack.c.h.s8.bf16 %v1003_v43  ;;  %v1411_v53 = vunpack.c.l.s8.bf16 %v1003_v43  ;;  %v1034_v14 = vld [vmem:[%s4623_s26 + $0x5d0] sm:$0xff] }
 0x241   : > { %v1027_v43 = vld [vmem:[%s4623_s26 + $0x598] sm:$0xff] }
 0x242   : > { %1849 = vmatpush1.bf16.msra.mxu0 %v1114_v48  ;;  %v1547_v48 = vunpack.c.h.s8.bf16 %v1067_v44 }
 0x243   : > { %1892 = vmatpush1.bf16.msra.mxu1 %v1242_v49  ;;  %1850 = vmatprep.subr.bf16.mxu0 %v1107_v50  ;;  %v1002_v49 = vld [vmem:[%s4623_s26 + $0x4d0] sm:$0xff] }
 0x244   : > { %1893 = vmatprep.subr.bf16.mxu1 %v1235_v51  ;;  %v1066_v50 = vld [vmem:[%s4623_s26 + $0x6d0] sm:$0xff]  ;;  %v1418_v51 = vunpack.c.h.s8.bf16 %v1002_v49 }
 0x245   : > { %v1546_v52 = vunpack.c.h.s8.bf16 %v1066_v50  ;;  %v1538_v58 = vunpack.c.l.s8.bf16 %v1066_v50  ;;  %v1090_v50 = vld [vmem:[%s4623_s26 + $0x790] sm:$0xff] }
 0x246   : > { %1851 = vmatpush1.bf16.msra.mxu0 %v1106_v54  ;;  %v1539_v54 = vunpack.c.l.s8.bf16 %v1067_v44  ;;  %v1091_v44 = vld [vmem:[%s4623_s26 + $0x798] sm:$0xff] }
 0x247   : > { %1894 = vmatpush1.bf16.msra.mxu1 %v1234_v55  ;;  %1852 = vmatprep.subr.bf16.mxu0 %v1227_v56  ;;  %v995_v55 = vld [vmem:[%s4623_s26 + $0x498] sm:$0xff] }
 0x248   : > { %1895 = vmatprep.subr.bf16.mxu1 %v1355_v57  ;;  %v1059_v56 = vld [vmem:[%s4623_s26 + $0x698] sm:$0xff]  ;;  %v1410_v57 = vunpack.c.l.s8.bf16 %v1002_v49  ;;  %v1403_v59 = vunpack.c.h.s8.bf16 %v995_v55  ;;  %v1395_v0 = vunpack.c.l.s8.bf16 %v995_v55  ;;  %v1026_v49 = vld [vmem:[%s4623_s26 + $0x590] sm:$0xff] }
 0x249   : > { %v1523_v1 = vunpack.c.l.s8.bf16 %v1059_v56  ;;  %v1019_v55 = vld [vmem:[%s4623_s26 + $0x558] sm:$0xff] }
 0x24a   : > { %1853 = vmatpush2.bf16.msra.mxu0 %v1226_v60  ;;  %v1531_v60 = vunpack.c.h.s8.bf16 %v1059_v56  ;;  %v1083_v56 = vld [vmem:[%s4623_s26 + $0x758] sm:$0xff] }
 0x24b   : > { %1896 = vmatpush2.bf16.msra.mxu1 %v1354_v61  ;;  %1854 = vmatprep.subr.bf16.mxu0 %v1219_v62  ;;  %v994_v61 = vld [vmem:[%s4623_s26 + $0x490] sm:$0xff] }
 0x24c   : > { %1897 = vmatprep.subr.bf16.mxu1 %v1347_v63  ;;  %v1058_v62 = vld [vmem:[%s4623_s26 + $0x690] sm:$0xff] }
 0x24d   : > { %v1530_v63 = vunpack.c.h.s8.bf16 %v1058_v62 }
 0x24e   : > { %1855 = vmatpush2.bf16.msra.mxu0 %v1218_v2  ;;  %v987_v2 = vld [vmem:[%s4623_s26 + $0x458] sm:$0xff] }
 0x24f   : > { %1898 = vmatpush2.bf16.msra.mxu1 %v1346_v3  ;;  %1856 = vmatprep.subr.bf16.mxu0 %v1211_v4  ;;  %v1051_v3 = vld [vmem:[%s4623_s26 + $0x658] sm:$0xff]  ;;  %v1394_v4 = vunpack.c.l.s8.bf16 %v994_v61 }
 0x250   : > { %1899 = vmatprep.subr.bf16.mxu1 %v1339_v8  ;;  %v1522_v8 = vunpack.c.l.s8.bf16 %v1058_v62  ;;  %v1082_v62 = vld [vmem:[%s4623_s26 + $0x750] sm:$0xff] }
 0x252   : > { %1857 = vmatpush2.bf16.msra.mxu0 %v1210_v11  ;;  %v1386_v11 = vunpack.c.h.s8.bf16 %v986_v9 }
 0x253   : > { %1900 = vmatpush2.bf16.msra.mxu1 %v1338_v12  ;;  %1858 = vmatprep.subr.bf16.mxu0 %v1203_v13  ;;  %v1514_v12 = vunpack.c.h.s8.bf16 %v1050_v10  ;;  %v1379_v13 = vunpack.c.l.s8.bf16 %v987_v2 }
 0x254   : > { %1901 = vmatprep.subr.bf16.mxu1 %v1331_v16  ;;  %v1507_v16 = vunpack.c.l.s8.bf16 %v1051_v3 }
 0x256   : > { %1859 = vmatpush2.bf16.msra.mxu0 %v1202_v19  ;;  %v1378_v19 = vunpack.c.l.s8.bf16 %v986_v9  ;;  %v1010_v9 = vld [vmem:[%s4623_s26 + $0x510] sm:$0xff] }
 0x257   : > { %1902 = vmatpush2.bf16.msra.mxu1 %v1330_v21  ;;  %1860 = vmatprep.subr.bf16.mxu0 %v1195_v22  ;;  %v1506_v21 = vunpack.c.l.s8.bf16 %v1050_v10  ;;  %v1371_v22 = vunpack.c.h.s8.bf16 %v979_v17  ;;  %v1074_v10 = vld [vmem:[%s4623_s26 + $0x710] sm:$0xff] }
 0x258   : > { %1903 = vmatprep.subr.bf16.mxu1 %v1323_v23  ;;  %v1499_v23 = vunpack.c.h.s8.bf16 %v1043_v18 }
 0x25a   : > { %1861 = vmatpush2.bf16.msra.mxu0 %v1194_v26  ;;  %v1370_v26 = vunpack.c.h.s8.bf16 %v978_v24 }
 0x25b   : > { %1904 = vmatpush2.bf16.msra.mxu1 %v1322_v27  ;;  %1862 = vmatprep.subr.bf16.mxu0 %v1187_v28  ;;  %v1498_v27 = vunpack.c.h.s8.bf16 %v1042_v25  ;;  %v1363_v28 = vunpack.c.l.s8.bf16 %v979_v17  ;;  %v877_v17 = vld [vmem:[%s4623_s26 + $0xe8] sm:$0xff] }
 0x25c   : > { %1905 = vmatprep.subr.bf16.mxu1 %v1315_v31  ;;  %v1491_v31 = vunpack.c.l.s8.bf16 %v1043_v18  ;;  %v941_v18 = vld [vmem:[%s4623_s26 + $0x2e8] sm:$0xff] }
 0x25e   : > { %1863 = vmatpush2.bf16.msra.mxu0 %v1186_v33  ;;  %v1362_v33 = vunpack.c.l.s8.bf16 %v978_v24  ;;  %v876_v24 = vld [vmem:[%s4623_s26 + $0xe0] sm:$0xff] }
 0x25f   : > { %1906 = vmatpush2.bf16.msra.mxu1 %v1314_v34  ;;  %1864 = vmatprep.subr.bf16.mxu0 %v1179_v35  ;;  %v1490_v34 = vunpack.c.l.s8.bf16 %v1042_v25  ;;  %v1483_v35 = vunpack.c.h.s8.bf16 %v1035_v32  ;;  %v940_v25 = vld [vmem:[%s4623_s26 + $0x2e0] sm:$0xff] }
 0x260   : > { %1907 = vmatprep.subr.bf16.mxu1 %v1307_v36  ;;  %v1611_v36 = vunpack.c.h.s8.bf16 %v1099_v7 }
 0x262   : > { %1865 = vmatpush2.bf16.msra.mxu0 %v1178_v39  ;;  %v1482_v39 = vunpack.c.h.s8.bf16 %v1034_v14 }
 0x263   : > { %1908 = vmatpush2.bf16.msra.mxu1 %v1306_v40  ;;  %1866 = vmatprep.subr.bf16.mxu0 %v1171_v41  ;;  %v1610_v40 = vunpack.c.h.s8.bf16 %v1098_v15  ;;  %v1475_v41 = vunpack.c.l.s8.bf16 %v1035_v32  ;;  %v869_v32 = vld [vmem:[%s4623_s26 + $0xa8] sm:$0xff] }
 0x264   : > { %1909 = vmatprep.subr.bf16.mxu1 %v1299_v42  ;;  %v1603_v42 = vunpack.c.l.s8.bf16 %v1099_v7  ;;  %v933_v7 = vld [vmem:[%s4623_s26 + $0x2a8] sm:$0xff] }
 0x266   : > { %1867 = vmatpush2.bf16.msra.mxu0 %v1170_v45  ;;  %v1474_v45 = vunpack.c.l.s8.bf16 %v1034_v14  ;;  %v868_v14 = vld [vmem:[%s4623_s26 + $0xa0] sm:$0xff] }
 0x267   : > { %1910 = vmatpush2.bf16.msra.mxu1 %v1298_v46  ;;  %1922 = vmatprep.subr.bf16.mxu0 %v1419_v47  ;;  %v1602_v46 = vunpack.c.l.s8.bf16 %v1098_v15  ;;  %v1467_v47 = vunpack.c.h.s8.bf16 %v1027_v43  ;;  %v932_v15 = vld [vmem:[%s4623_s26 + $0x2a0] sm:$0xff] }
 0x268   : > { %1965 = vmatprep.subr.bf16.mxu1 %v1547_v48  ;;  %v1595_v48 = vunpack.c.h.s8.bf16 %v1091_v44 }
 0x269   : > { %1869 = vmatmul.mubr.bf16.vlgmr.msra.gmra.mxu0 %v4699_v29  ;;  %v1402_v29 = vunpack.c.h.s8.bf16 %v994_v61  ;;  %v1018_v61 = vld [vmem:[%s4623_s26 + $0x550] sm:$0xff] }
 0x26a   : > { %1912 = vmatmul.mubr.bf16.vlgmr.msra.gmra.mxu1 %v4703_v30  ;;  %1923 = vmatpush1.bf16.msra.mxu0 %v1418_v51  ;;  %v1466_v51 = vunpack.c.h.s8.bf16 %v1026_v49 }
 0x26b   : > { %1966 = vmatpush1.bf16.msra.mxu1 %v1546_v52  ;;  %1924 = vmatprep.subr.bf16.mxu0 %v1411_v53  ;;  %v1594_v52 = vunpack.c.h.s8.bf16 %v1090_v50  ;;  %v1459_v53 = vunpack.c.l.s8.bf16 %v1027_v43  ;;  %v925_v43 = vld [vmem:[%s4623_s26 + $0x268] sm:$0xff] }
 0x26c   : > { %1967 = vmatprep.subr.bf16.mxu1 %v1539_v54  ;;  %1954 = vmatprep.mubr.bf16.mxu0 %v4707_v37  ;;  %v1387_v37 = vunpack.c.h.s8.bf16 %v987_v2  ;;  %v1587_v54 = vunpack.c.l.s8.bf16 %v1091_v44  ;;  %v1011_v2 = vld [vmem:[%s4623_s26 + $0x518] sm:$0xff]  ;;  %v1140_v44 = vunpack.c.l.s8.bf16 %v868_v14 }
 0x26d   : > { %1997 = vmatprep.mubr.bf16.mxu1 %v4709_v38  ;;  %v1515_v38 = vunpack.c.h.s8.bf16 %v1051_v3  ;;  %v1075_v3 = vld [vmem:[%s4623_s26 + $0x718] sm:$0xff] }
 0x26e   : > { %1925 = vmatpush1.bf16.msra.mxu0 %v1410_v57  ;;  %v1458_v57 = vunpack.c.l.s8.bf16 %v1026_v49  ;;  %v924_v49 = vld [vmem:[%s4623_s26 + $0x260] sm:$0xff] }
 0x26f   : > { %1968 = vmatpush1.bf16.msra.mxu1 %v1538_v58  ;;  %1926 = vmatprep.subr.bf16.mxu0 %v1403_v59  ;;  %v1586_v58 = vunpack.c.l.s8.bf16 %v1090_v50  ;;  %v1451_v59 = vunpack.c.h.s8.bf16 %v1019_v55 }
 0x270   : > { %1969 = vmatprep.subr.bf16.mxu1 %v1531_v60  ;;  %v1579_v60 = vunpack.c.h.s8.bf16 %v1083_v56 }
 0x272   : > { %1927 = vmatpush1.bf16.msra.mxu0 %v1402_v29  ;;  %v1450_v29 = vunpack.c.h.s8.bf16 %v1018_v61 }
 0x273   : > { %1970 = vmatpush1.bf16.msra.mxu1 %v1530_v63  ;;  %1928 = vmatprep.subr.bf16.mxu0 %v1395_v0  ;;  %v1578_v63 = vunpack.c.h.s8.bf16 %v1082_v62  ;;  %v1443_v0 = vunpack.c.l.s8.bf16 %v1019_v55  ;;  %v917_v55 = vld [vmem:[%s4623_s26 + $0x228] sm:$0xff] }
 0x274   : > { %1971 = vmatprep.subr.bf16.mxu1 %v1523_v1  ;;  %v1571_v1 = vunpack.c.l.s8.bf16 %v1083_v56 }
 0x276   : > { %1929 = vmatpush1.bf16.msra.mxu0 %v1394_v4  ;;  %v1442_v4 = vunpack.c.l.s8.bf16 %v1018_v61  ;;  %v916_v61 = vld [vmem:[%s4623_s26 + $0x220] sm:$0xff] }
 0x277   : > { %1972 = vmatpush1.bf16.msra.mxu1 %v1522_v8  ;;  %1930 = vmatprep.subr.bf16.mxu0 %v1387_v37  ;;  %v1570_v8 = vunpack.c.l.s8.bf16 %v1082_v62  ;;  %v1435_v37 = vunpack.c.h.s8.bf16 %v1011_v2 }
 0x278   : > { %1973 = vmatprep.subr.bf16.mxu1 %v1515_v38  ;;  %v1563_v38 = vunpack.c.h.s8.bf16 %v1075_v3 }
 0x27a   : > { %1931 = vmatpush1.bf16.msra.mxu0 %v1386_v11  ;;  %v1434_v11 = vunpack.c.h.s8.bf16 %v1010_v9 }
 0x27b   : > { %1974 = vmatpush1.bf16.msra.mxu1 %v1514_v12  ;;  %1932 = vmatprep.subr.bf16.mxu0 %v1379_v13  ;;  %v1562_v12 = vunpack.c.h.s8.bf16 %v1074_v10  ;;  %v1427_v13 = vunpack.c.l.s8.bf16 %v1011_v2  ;;  %v973_v2 = vld [vmem:[%s4623_s26 + $0x3e8] sm:$0xff] }
 0x27c   : > { %1975 = vmatprep.subr.bf16.mxu1 %v1507_v16  ;;  %v1555_v16 = vunpack.c.l.s8.bf16 %v1075_v3 }
 0x27e   : > { %1933 = vmatpush1.bf16.msra.mxu0 %v1378_v19  ;;  %v1426_v19 = vunpack.c.l.s8.bf16 %v1010_v9  ;;  %v972_v9 = vld [vmem:[%s4623_s26 + $0x3e0] sm:$0xff] }
 0x27f   : > { %1976 = vmatpush1.bf16.msra.mxu1 %v1506_v21  ;;  %1934 = vmatprep.subr.bf16.mxu0 %v1371_v22  ;;  %v1554_v21 = vunpack.c.l.s8.bf16 %v1074_v10  ;;  %v1165_v22 = vunpack.c.h.s8.bf16 %v877_v17 }
 0x280   : > { %1977 = vmatprep.subr.bf16.mxu1 %v1499_v23  ;;  %v1293_v23 = vunpack.c.h.s8.bf16 %v941_v18 }
 0x282   : > { %1935 = vmatpush1.bf16.msra.mxu0 %v1370_v26  ;;  %v1164_v26 = vunpack.c.h.s8.bf16 %v876_v24 }
 0x283   : > { %1978 = vmatpush1.bf16.msra.mxu1 %v1498_v27  ;;  %1936 = vmatprep.subr.bf16.mxu0 %v1363_v28  ;;  %v1292_v27 = vunpack.c.h.s8.bf16 %v940_v25  ;;  %v1157_v28 = vunpack.c.l.s8.bf16 %v877_v17  ;;  %v965_v17 = vld [vmem:[%s4623_s26 + $0x3a8] sm:$0xff] }
 0x284   : > { %1979 = vmatprep.subr.bf16.mxu1 %v1491_v31  ;;  %v1285_v31 = vunpack.c.l.s8.bf16 %v941_v18 }
 0x286   : > { %1937 = vmatpush1.bf16.msra.mxu0 %v1362_v33  ;;  %v1156_v33 = vunpack.c.l.s8.bf16 %v876_v24  ;;  %v964_v24 = vld [vmem:[%s4623_s26 + $0x3a0] sm:$0xff] }
 0x287   : > { %1980 = vmatpush1.bf16.msra.mxu1 %v1490_v34  ;;  %1938 = vmatprep.subr.bf16.mxu0 %v1483_v35  ;;  %v1284_v34 = vunpack.c.l.s8.bf16 %v940_v25  ;;  %v1149_v35 = vunpack.c.h.s8.bf16 %v869_v32 }
 0x288   : > { %1981 = vmatprep.subr.bf16.mxu1 %v1611_v36  ;;  %v1277_v36 = vunpack.c.h.s8.bf16 %v933_v7 }
 0x28a   : > { %1939 = vmatpush2.bf16.msra.mxu0 %v1482_v39  ;;  %v4827_v39 = vld [vmem:[#allocation2 + $0x34] ss:$-40 sps:$4 sm:$0xff]  }
 0x28b   : > { %1982 = vmatpush2.bf16.msra.mxu1 %v1610_v40  ;;  %1940 = vmatprep.subr.bf16.mxu0 %v1475_v41  ;;  %v1141_v40 = vunpack.c.l.s8.bf16 %v869_v32  ;;  %v1269_v41 = vunpack.c.l.s8.bf16 %v933_v7  ;;  %v957_v32 = vld [vmem:[%s4623_s26 + $0x368] sm:$0xff] }
 0x28c   : > { %1983 = vmatprep.subr.bf16.mxu1 %v1603_v42  ;;  %v861_v42 = vld [vmem:[%s4623_s26 + $0x68] sm:$0xff] }
 0x28e   : > { %1941 = vmatpush2.bf16.msra.mxu0 %v1474_v45  ;;  %v1268_v45 = vunpack.c.l.s8.bf16 %v932_v15 }
 0x28f   : > { %1984 = vmatpush2.bf16.msra.mxu1 %v1602_v46  ;;  %1942 = vmatprep.subr.bf16.mxu0 %v1467_v47  ;;  %v1133_v46 = vunpack.c.h.s8.bf16 %v861_v42  ;;  %v1261_v47 = vunpack.c.h.s8.bf16 %v925_v43 }
 0x290   : > { %1985 = vmatprep.subr.bf16.mxu1 %v1595_v48  ;;  %v860_v48 = vld [vmem:[%s4623_s26 + $0x60] sm:$0xff] }
 0x291   : > { %v1132_v50 = vunpack.c.h.s8.bf16 %v860_v48  ;;  %v1124_v56 = vunpack.c.l.s8.bf16 %v860_v48 }
 0x292   : > { %1943 = vmatpush2.bf16.msra.mxu0 %v1466_v51  ;;  %v1260_v51 = vunpack.c.h.s8.bf16 %v924_v49 }
 0x293   : > { %1986 = vmatpush2.bf16.msra.mxu1 %v1594_v52  ;;  %1944 = vmatprep.subr.bf16.mxu0 %v1459_v53  ;;  %v1125_v52 = vunpack.c.l.s8.bf16 %v861_v42  ;;  %v1253_v53 = vunpack.c.l.s8.bf16 %v925_v43  ;;  %v949_v42 = vld [vmem:[%s4623_s26 + $0x328] sm:$0xff] }
 0x294   : > { %1987 = vmatprep.subr.bf16.mxu1 %v1587_v54  ;;  %v853_v54 = vld [vmem:[%s4623_s26 + $0x28] sm:$0xff]  ;;  %v1309_v48 = vunpack.c.h.s8.bf16 %v949_v42 }
 0x296   : > { %1945 = vmatpush2.bf16.msra.mxu0 %v1458_v57  ;;  %v1252_v57 = vunpack.c.l.s8.bf16 %v924_v49  ;;  %v884_v49 = vld [vmem:[%s4623_s26 + $0x120] sm:$0xff] }
 0x297   : > { %1988 = vmatpush2.bf16.msra.mxu1 %v1586_v58  ;;  %1946 = vmatprep.subr.bf16.mxu0 %v1451_v59  ;;  %v1117_v58 = vunpack.c.h.s8.bf16 %v853_v54  ;;  %v1245_v59 = vunpack.c.h.s8.bf16 %v917_v55 }
 0x298   : > { %1989 = vmatprep.subr.bf16.mxu1 %v1579_v60  ;;  %v852_v60 = vld [vmem:[%s4623_s26 + $0x20] sm:$0xff] }
 0x299   : > { %v1116_v62 = vunpack.c.h.s8.bf16 %v852_v60  ;;  %v1108_v3 = vunpack.c.l.s8.bf16 %v852_v60 }
 0x29a   : > { %1947 = vmatpush2.bf16.msra.mxu0 %v1450_v29  ;;  %v1244_v29 = vunpack.c.h.s8.bf16 %v916_v61 }
 0x29b   : > { %1990 = vmatpush2.bf16.msra.mxu1 %v1578_v63  ;;  %1948 = vmatprep.subr.bf16.mxu0 %v1443_v0  ;;  %v1109_v63 = vunpack.c.l.s8.bf16 %v853_v54  ;;  %v1237_v0 = vunpack.c.l.s8.bf16 %v917_v55 }
 0x29c   : > { %1991 = vmatprep.subr.bf16.mxu1 %v1571_v1  ;;  %v909_v1 = vld [vmem:[%s4623_s26 + $0x1e8] sm:$0xff] }
 0x29e   : > { %1949 = vmatpush2.bf16.msra.mxu0 %v1442_v4  ;;  %v1236_v4 = vunpack.c.l.s8.bf16 %v916_v61  ;;  %v1172_v61 = vunpack.c.l.s8.bf16 %v884_v49 }
 0x29f   : > { %1992 = vmatpush2.bf16.msra.mxu1 %v1570_v8  ;;  %1950 = vmatprep.subr.bf16.mxu0 %v1435_v37  ;;  %v1229_v8 = vunpack.c.h.s8.bf16 %v909_v1  ;;  %v1357_v37 = vunpack.c.h.s8.bf16 %v973_v2 }
 0x2a0   : > { %1993 = vmatprep.subr.bf16.mxu1 %v1563_v38  ;;  %v908_v38 = vld [vmem:[%s4623_s26 + $0x1e0] sm:$0xff] }
 0x2a1   : > { %v1228_v10 = vunpack.c.h.s8.bf16 %v908_v38  ;;  %v1220_v18 = vunpack.c.l.s8.bf16 %v908_v38 }
 0x2a2   : > { %1951 = vmatpush2.bf16.msra.mxu0 %v1434_v11  ;;  %v1356_v11 = vunpack.c.h.s8.bf16 %v972_v9 }
 0x2a3   : > { %1994 = vmatpush2.bf16.msra.mxu1 %v1562_v12  ;;  %1952 = vmatprep.subr.bf16.mxu0 %v1427_v13  ;;  %v1221_v12 = vunpack.c.l.s8.bf16 %v909_v1  ;;  %v1349_v13 = vunpack.c.l.s8.bf16 %v973_v2  ;;  %v1004_v2 = vld [vmem:[%s4623_s26 + $0x4e0] sm:$0xff] }
 0x2a4   : > { %1995 = vmatprep.subr.bf16.mxu1 %v1555_v16  ;;  %v901_v16 = vld [vmem:[%s4623_s26 + $0x1a8] sm:$0xff] }
 0x2a6   : > { %1953 = vmatpush2.bf16.msra.mxu0 %v1426_v19  ;;  %v1348_v19 = vunpack.c.l.s8.bf16 %v972_v9 }
 0x2a7   : > { %1996 = vmatpush2.bf16.msra.mxu1 %v1554_v21  ;;  %2008 = vmatprep.subr.bf16.mxu0 %v1165_v22  ;;  %v1213_v21 = vunpack.c.h.s8.bf16 %v901_v16  ;;  %v1341_v22 = vunpack.c.h.s8.bf16 %v965_v17 }
 0x2a8   : > { %2051 = vmatprep.subr.bf16.mxu1 %v1293_v23  ;;  %v900_v23 = vld [vmem:[%s4623_s26 + $0x1a0] sm:$0xff] }
 0x2a9   : > { %1955 = vmatmul.mubr.bf16.vlgmr.msra.gmra.mxu0 %v4745_v5  ;;  %v1148_v5 = vunpack.c.h.s8.bf16 %v868_v14  ;;  %v1212_v25 = vunpack.c.h.s8.bf16 %v900_v23  ;;  %v1204_v7 = vunpack.c.l.s8.bf16 %v900_v23  ;;  %v956_v14 = vld [vmem:[%s4623_s26 + $0x360] sm:$0xff] }
 0x2aa   : > { %1998 = vmatmul.mubr.bf16.vlgmr.msra.gmra.mxu1 %v4747_v6  ;;  %2009 = vmatpush1.bf16.msra.mxu0 %v1164_v26  ;;  %v1276_v6 = vunpack.c.h.s8.bf16 %v932_v15  ;;  %v1340_v26 = vunpack.c.h.s8.bf16 %v964_v24 }
 0x2ab   : > { %2052 = vmatpush1.bf16.msra.mxu1 %v1292_v27  ;;  %2010 = vmatprep.subr.bf16.mxu0 %v1157_v28  ;;  %v1205_v27 = vunpack.c.l.s8.bf16 %v901_v16  ;;  %v1333_v28 = vunpack.c.l.s8.bf16 %v965_v17  ;;  %v4869_v17 = vld [vmem:[%s408_s21] sm:$0xff] }
 0x2ac   : > { %2053 = vmatprep.subr.bf16.mxu1 %v1285_v31  ;;  %2040 = vmatprep.mubr.bf16.mxu0 %v4827_v39  ;;  %v893_v31 = vld [vmem:[%s4623_s26 + $0x168] sm:$0xff] }
 0x2ad   : > { %2083 = vmatprep.mubr.bf16.mxu1 %v4672_v20 }
 0x2ae   : > { %2011 = vmatpush1.bf16.msra.mxu0 %v1156_v33  ;;  %v1332_v33 = vunpack.c.l.s8.bf16 %v964_v24  ;;  %v4874_v24 = vld [vmem:[#allocation2 + $0x30] ss:$-40 sps:$4 sm:$0xff]  }
 0x2af   : > { %2054 = vmatpush1.bf16.msra.mxu1 %v1284_v34  ;;  %2012 = vmatprep.subr.bf16.mxu0 %v1149_v35  ;;  %v1197_v34 = vunpack.c.h.s8.bf16 %v893_v31  ;;  %v1325_v35 = vunpack.c.h.s8.bf16 %v957_v32 }
 0x2b0   : > { %2055 = vmatprep.subr.bf16.mxu1 %v1277_v36  ;;  %v892_v36 = vld [vmem:[%s4623_s26 + $0x160] sm:$0xff] }
 0x2b1   : > { %v1196_v15 = vunpack.c.h.s8.bf16 %v892_v36  ;;  %v1188_v43 = vunpack.c.l.s8.bf16 %v892_v36 }
 0x2b2   : > { %2013 = vmatpush1.bf16.msra.mxu0 %v1148_v5  ;;  %v1324_v5 = vunpack.c.h.s8.bf16 %v956_v14 }
 0x2b3   : > { %2056 = vmatpush1.bf16.msra.mxu1 %v1276_v6  ;;  %2014 = vmatprep.subr.bf16.mxu0 %v1141_v40  ;;  %v1189_v6 = vunpack.c.l.s8.bf16 %v893_v31  ;;  %v1317_v40 = vunpack.c.l.s8.bf16 %v957_v32  ;;  %v996_v31 = vld [vmem:[%s4623_s26 + $0x4a0] sm:$0xff] }
 0x2b4   : > { %2057 = vmatprep.subr.bf16.mxu1 %v1269_v41  ;;  %v885_v41 = vld [vmem:[%s4623_s26 + $0x128] sm:$0xff] }
 0x2b6   : > { %2015 = vmatpush1.bf16.msra.mxu0 %v1140_v44  ;;  %v1316_v44 = vunpack.c.l.s8.bf16 %v956_v14  ;;  %v1060_v14 = vld [vmem:[%s4623_s26 + $0x6a0] sm:$0xff] }
 0x2b7   : > { %2058 = vmatpush1.bf16.msra.mxu1 %v1268_v45  ;;  %2016 = vmatprep.subr.bf16.mxu0 %v1133_v46  ;;  %v1698_v45 = vpop.f32.mrf.mxu0  ;;  %v1741_v46 = vpop.f32.mrf.mxu1 }
 0x2b8   : > { %2059 = vmatprep.subr.bf16.mxu1 %v1261_v47  ;;  %v1181_v47 = vunpack.c.h.s8.bf16 %v885_v41  ;;  %v1742_v16 = vadd.f32 %v1741_v46, %v1698_v45  ;;  %v1404_v46 = vunpack.c.h.s8.bf16 %v996_v31 }
 0x2b9   : > { %v1700_v54 = vpop.f32.mrf.mxu0  ;;  %v1743_v55 = vpop.f32.mrf.mxu1 }
 0x2ba   : > { %2017 = vmatpush1.bf16.msra.mxu0 %v1132_v50  ;;  %v948_v50 = vld [vmem:[%s4623_s26 + $0x320] sm:$0xff] }
 0x2bb   : > { %2060 = vmatpush1.bf16.msra.mxu1 %v1260_v51  ;;  %2018 = vmatprep.subr.bf16.mxu0 %v1125_v52  ;;  %v2354_v51 = vlaneseq  ;;  %v1180_v52 = vunpack.c.h.s8.bf16 %v884_v49 }
 0x2bc   : > { %2061 = vmatprep.subr.bf16.mxu1 %v1253_v53  ;;  %v1308_v53 = vunpack.c.h.s8.bf16 %v948_v50 }
 0x2bd   : > { %v4857_v60 = vshrl.u32 %v2354_v51, 7 }
 0x2be   : > { %2019 = vmatpush1.bf16.msra.mxu0 %v1124_v56  ;;  %v1173_v56 = vunpack.c.l.s8.bf16 %v885_v41  ;;  %v4885_v41 = vld [vmem:[#allocation2 + $0x14] ss:$40 sps:$4 sm:$0xff]  }
 0x2bf   : > { %2062 = vmatpush1.bf16.msra.mxu1 %v1252_v57  ;;  %2020 = vmatprep.subr.bf16.mxu0 %v1117_v58  ;;  %v1301_v57 = vunpack.c.l.s8.bf16 %v949_v42  ;;  %v1005_v58 = vld [vmem:[%s4623_s26 + $0x4e8] sm:$0xff] }
 0x2c0   : > { %2063 = vmatprep.subr.bf16.mxu1 %v1245_v59  ;;  %v1069_v59 = vld [vmem:[%s4623_s26 + $0x6e8] sm:$0xff] }
 0x2c1   : > { %v1549_v1 = vunpack.c.h.s8.bf16 %v1069_v59 }
 0x2c2   : > { %2021 = vmatpush1.bf16.msra.mxu0 %v1116_v62  ;;  %v1300_v62 = vunpack.c.l.s8.bf16 %v948_v50  ;;  %v1532_v50 = vunpack.c.h.s8.bf16 %v1060_v14 }
 0x2c3   : > { %2064 = vmatpush1.bf16.msra.mxu1 %v1244_v29  ;;  %2022 = vmatprep.subr.bf16.mxu0 %v1109_v63  ;;  %v1702_v29 = vpop.f32.mrf.mxu0  ;;  %v1745_v63 = vpop.f32.mrf.mxu1 }
 0x2c4   : > { %2065 = vmatprep.subr.bf16.mxu1 %v1237_v0  ;;  %v1421_v0 = vunpack.c.h.s8.bf16 %v1005_v58 }
 0x2c5   : > { %v1704_v9 = vpop.f32.mrf.mxu0 }
 0x2c6   : > { %2023 = vmatpush1.bf16.msra.mxu0 %v1108_v3  ;;  %v1068_v3 = vld [vmem:[%s4623_s26 + $0x6e0] sm:$0xff] }
 0x2c7   : > { %2066 = vmatpush1.bf16.msra.mxu1 %v1236_v4  ;;  %2024 = vmatprep.subr.bf16.mxu0 %v1229_v8  ;;  %v2356_v4 = vsub.s32 0, %v4857_v60  ;;  %v4864_v8 = vld [vmem:[%s399_s1] sm:$0xff]  ;;  %v1548_v38 = vunpack.c.h.s8.bf16 %v1068_v3 }
 0x2c8   : > { %2067 = vmatprep.subr.bf16.mxu1 %v1357_v37  ;;  %v1420_v37 = vunpack.c.h.s8.bf16 %v1004_v2 }
 0x2c9   : > { %v2357_v23 = vrot.slane %v4864_v8, %v2356_v4  ;;  %v2415_v32 = vrot.slane %v4869_v17, %v2356_v4 }
 0x2ca   : > { %2025 = vmatpush2.bf16.msra.mxu0 %v1228_v10  ;;  %v1747_v10 = vpop.f32.mrf.mxu1 }
 0x2cb   : > { %2068 = vmatpush2.bf16.msra.mxu1 %v1356_v11  ;;  %2026 = vmatprep.subr.bf16.mxu0 %v1221_v12  ;;  %v2360_v11 = vsub.s32 1, %v4857_v60  ;;  %v1413_v12 = vunpack.c.l.s8.bf16 %v1005_v58  ;;  %v1748_v42 = vadd.f32 %v1747_v10, %v1704_v9  ;;  %v989_v58 = vld [vmem:[%s4623_s26 + $0x468] sm:$0xff] }
 0x2cc   : > { %2069 = vmatprep.subr.bf16.mxu1 %v1349_v13  ;;  %v1541_v13 = vunpack.c.l.s8.bf16 %v1069_v59  ;;  %v1053_v59 = vld [vmem:[%s4623_s26 + $0x668] sm:$0xff] }
 0x2cd   : > { %v1517_v4 = vunpack.c.h.s8.bf16 %v1053_v59 }
 0x2ce   : > { %2027 = vmatpush2.bf16.msra.mxu0 %v1220_v18  ;;  %v997_v18 = vld [vmem:[%s4623_s26 + $0x4a8] sm:$0xff] }
 0x2cf   : > { %2070 = vmatpush2.bf16.msra.mxu1 %v1348_v19  ;;  %2028 = vmatprep.subr.bf16.mxu0 %v1213_v21  ;;  %v1061_v19 = vld [vmem:[%s4623_s26 + $0x6a8] sm:$0xff] }
 0x2d0   : > { %2071 = vmatprep.subr.bf16.mxu1 %v1341_v22  ;;  %v1533_v36 = vunpack.c.h.s8.bf16 %v1061_v19 }
 0x2d2   : > { %2029 = vmatpush2.bf16.msra.mxu0 %v1212_v25  ;;  %v1744_v25 = vadd.f32 %v1743_v55, %v1700_v54 }
 0x2d3   : > { %2072 = vmatpush2.bf16.msra.mxu1 %v1340_v26  ;;  %2030 = vmatprep.subr.bf16.mxu0 %v1205_v27  ;;  %v1412_v27 = vunpack.c.l.s8.bf16 %v1004_v2 }
 0x2d4   : > { %2073 = vmatprep.subr.bf16.mxu1 %v1333_v28  ;;  %v1540_v28 = vunpack.c.l.s8.bf16 %v1068_v3  ;;  %v1389_v3 = vunpack.c.h.s8.bf16 %v989_v58 }
 0x2d6   : > { %2031 = vmatpush2.bf16.msra.mxu0 %v1204_v7 }
 0x2d7   : > { %2074 = vmatpush2.bf16.msra.mxu1 %v1332_v33  ;;  %2032 = vmatprep.subr.bf16.mxu0 %v1197_v34  ;;  %v2361_v34 = vrot.slane %v4864_v8, %v2360_v11 }
 0x2d8   : > { %2075 = vmatprep.subr.bf16.mxu1 %v1325_v35  ;;  %v1405_v35 = vunpack.c.h.s8.bf16 %v997_v18 }
 0x2da   : > { %2033 = vmatpush2.bf16.msra.mxu0 %v1196_v15  ;;  %v1746_v15 = vadd.f32 %v1745_v63, %v1702_v29  ;;  %v1524_v29 = vunpack.c.l.s8.bf16 %v1060_v14  ;;  %v1037_v14 = vld [vmem:[%s4623_s26 + $0x5e8] sm:$0xff] }
 0x2db   : > { %2076 = vmatpush2.bf16.msra.mxu1 %v1324_v5  ;;  %2034 = vmatprep.subr.bf16.mxu0 %v1189_v6 }
 0x2dc   : > { %2077 = vmatprep.subr.bf16.mxu1 %v1317_v40  ;;  %v4882_v40 = vld [vmem:[#allocation2 + $0x1c] ss:$16 sps:$4 sm:$0xff]  }
 0x2de   : > { %2035 = vmatpush2.bf16.msra.mxu0 %v1188_v43  ;;  %v2419_v43 = vrot.slane %v4869_v17, %v2360_v11 }
 0x2df   : > { %2078 = vmatpush2.bf16.msra.mxu1 %v1316_v44  ;;  %2036 = vmatprep.subr.bf16.mxu0 %v1181_v47 }
 0x2e0   : > { %2079 = vmatprep.subr.bf16.mxu1 %v1309_v48 }
 0x2e2   : > { %2037 = vmatpush2.bf16.msra.mxu0 %v1180_v52  ;;  %v1397_v52 = vunpack.c.l.s8.bf16 %v997_v18 }
 0x2e3   : > { %2080 = vmatpush2.bf16.msra.mxu1 %v1308_v53  ;;  %2038 = vmatprep.subr.bf16.mxu0 %v1173_v56  ;;  %v1525_v53 = vunpack.c.l.s8.bf16 %v1061_v19  ;;  %v1381_v19 = vunpack.c.l.s8.bf16 %v989_v58  ;;  %v1092_v58 = vld [vmem:[%s4623_s26 + $0x7a0] sm:$0xff] }
 0x2e4   : > { %2081 = vmatprep.subr.bf16.mxu1 %v1301_v57 }
 0x2e6   : > { %2039 = vmatpush2.bf16.msra.mxu0 %v1172_v61 }
 0x2e7   : > { %2082 = vmatpush2.bf16.msra.mxu1 %v1300_v62  ;;  %2094 = vmatprep.subr.bf16.mxu0 %v1421_v0  ;;  %v1396_v62 = vunpack.c.l.s8.bf16 %v996_v31 }
 0x2e8   : > { %2137 = vmatprep.subr.bf16.mxu1 %v1549_v1 }
 0x2e9   : > { %v1784_v21 = vpop.f32.mrf.mxu0  ;;  %2041 = vmatmul.mubr.bf16.vlgmr.msra.gmra.mxu0 %v4874_v24 }
 0x2ea   : > { %v1827_v22 = vpop.f32.mrf.mxu1  ;;  %2084 = vmatmul.mubr.bf16.vlgmr.msra.gmra.mxu1 %v4703_v30  ;;  %v1785_v26 = vadd.f32 %v1784_v21, %v1742_v16  ;;  %2095 = vmatpush1.bf16.msra.mxu0 %v1420_v37  ;;  %v988_v37 = vld [vmem:[%s4623_s26 + $0x460] sm:$0xff]  ;;  %v1509_v21 = vunpack.c.l.s8.bf16 %v1053_v59 }
 0x2eb   : > { %2138 = vmatpush1.bf16.msra.mxu1 %v1548_v38  ;;  %v1786_v7 = vpop.f32.mrf.mxu0  ;;  %2096 = vmatprep.subr.bf16.mxu0 %v1413_v12  ;;  %v1052_v38 = vld [vmem:[%s4623_s26 + $0x660] sm:$0xff]  ;;  %v1388_v16 = vunpack.c.h.s8.bf16 %v988_v37 }
 0x2ec   : > { %v1829_v33 = vpop.f32.mrf.mxu1  ;;  %2139 = vmatprep.subr.bf16.mxu1 %v1541_v13  ;;  %v1828_v5 = vadd.f32 %v1827_v22, %v1785_v26  ;;  %v1787_v6 = vadd.f32 %v1786_v7, %v1744_v25  ;;  %2126 = vmatprep.mubr.bf16.mxu0 %v4882_v40  ;;  %v1516_v18 = vunpack.c.h.s8.bf16 %v1052_v38  ;;  %v1045_v25 = vld [vmem:[%s4623_s26 + $0x628] sm:$0xff]  ;;  %v1380_v26 = vunpack.c.l.s8.bf16 %v988_v37  ;;  %v1044_v7 = vld [vmem:[%s4623_s26 + $0x620] sm:$0xff] }
 0x2ed   : > { %2169 = vmatprep.mubr.bf16.mxu1 %v4885_v41  ;;  %v1788_v44 = vpop.f32.mrf.mxu0  ;;  %v1501_v31 = vunpack.c.h.s8.bf16 %v1045_v25 }
 0x2ee   : > { %v1831_v45 = vpop.f32.mrf.mxu1  ;;  %v2394_v47 = vmul.f32 %v2357_v23, %v1828_v5  ;;  %v1830_v48 = vadd.f32 %v1829_v33, %v1787_v6  ;;  %v1789_v49 = vadd.f32 %v1788_v44, %v1746_v15  ;;  %2097 = vmatpush1.bf16.msra.mxu0 %v1412_v27  ;;  %v1508_v27 = vunpack.c.l.s8.bf16 %v1052_v38  ;;  %v1101_v15 = vld [vmem:[%s4623_s26 + $0x7e8] sm:$0xff]  ;;  %v1036_v44 = vld [vmem:[%s4623_s26 + $0x5e0] sm:$0xff] }
 0x2ef   : > { %2140 = vmatpush1.bf16.msra.mxu1 %v1540_v28  ;;  %v1790_v51 = vpop.f32.mrf.mxu0  ;;  %2098 = vmatprep.subr.bf16.mxu0 %v1405_v35  ;;  %v1492_v6 = vunpack.c.l.s8.bf16 %v1044_v7 }
 0x2f0   : > { %2141 = vmatprep.subr.bf16.mxu1 %v1533_v36  ;;  %v4889_v54 = vadd.f32 %v2415_v32, %v2394_v47  ;;  %v2395_v55 = vmul.f32 %v2361_v34, %v1830_v48  ;;  %v1832_v56 = vadd.f32 %v1831_v45, %v1789_v49  ;;  %v1791_v57 = vadd.f32 %v1790_v51, %v1748_v42  ;;  %v1833_v61 = vpop.f32.mrf.mxu1  ;;  %v1100_v45 = vld [vmem:[%s4623_s26 + $0x7e0] sm:$0xff]  ;;  %v1093_v51 = vld [vmem:[%s4623_s26 + $0x7a8] sm:$0xff] }
 0x2f1   : > { %v1493_v36 = vunpack.c.l.s8.bf16 %v1045_v25  ;;  %v1485_v42 = vunpack.c.h.s8.bf16 %v1037_v14  ;;  %v1612_v47 = vunpack.c.h.s8.bf16 %v1100_v45  ;;  %v1477_v48 = vunpack.c.l.s8.bf16 %v1037_v14  ;;  %v1013_v25 = vld [vmem:[%s4623_s26 + $0x528] sm:$0xff] }
 0x2f2   : > { %v2468_v63 = vmax.f32 %v4889_v54, 0.0  ;;  %v4894_v0 = vadd.f32 %v2419_v43, %v2395_v55  ;;  %v2402_v1 = vmul.f32 %v2357_v23, %v1832_v56  ;;  %v1834_v2 = vadd.f32 %v1833_v61, %v1791_v57  ;;  %2099 = vmatpush1.bf16.msra.mxu0 %v1404_v46  ;;  %v981_v23 = vld [vmem:[%s4623_s26 + $0x428] sm:$0xff]  ;;  %v1028_v57 = vld [vmem:[%s4623_s26 + $0x5a0] sm:$0xff] }
 0x2f3   : > { %2142 = vmatpush1.bf16.msra.mxu1 %v1532_v50  ;;  %2100 = vmatprep.subr.bf16.mxu0 %v1397_v52  ;;  %v1373_v28 = vunpack.c.h.s8.bf16 %v981_v23  ;;  %v1365_v35 = vunpack.c.l.s8.bf16 %v981_v23  ;;  %v1484_v46 = vunpack.c.h.s8.bf16 %v1036_v44  ;;  %v1605_v49 = vunpack.c.l.s8.bf16 %v1101_v15  ;;  %v1029_v50 = vld [vmem:[%s4623_s26 + $0x5a8] sm:$0xff] }
 0x2f4   : > { %2143 = vmatprep.subr.bf16.mxu1 %v1525_v53  ;;  %v2469_v9 = vmax.f32 %v4894_v0, 0.0  ;;  %v4899_v10 = vadd.f32 %v2415_v32, %v2402_v1  ;;  %v2403_v11 = vmul.f32 %v2361_v34, %v1834_v2  ;;  %v980_v32 = vld [vmem:[%s4623_s26 + $0x420] sm:$0xff]  ;;  %v1500_v34 = vunpack.c.h.s8.bf16 %v1044_v7  ;;  %v1021_v1 = vld [vmem:[%s4623_s26 + $0x568] sm:$0xff] }
 0x2f5   : > { %v1372_v33 = vunpack.c.h.s8.bf16 %v980_v32  ;;  %v1364_v5 = vunpack.c.l.s8.bf16 %v980_v32  ;;  %v1476_v52 = vunpack.c.l.s8.bf16 %v1036_v44  ;;  %v1604_v53 = vunpack.c.l.s8.bf16 %v1100_v45  ;;  %v1085_v2 = vld [vmem:[%s4623_s26 + $0x768] sm:$0xff]  ;;  %v1012_v7 = vld [vmem:[%s4623_s26 + $0x520] sm:$0xff]  ;;  %v878_v45 = vld [vmem:[%s4623_s26 + $0xf0] sm:$0xff] }
 0x2f6   : > { %v2476_v12 = vmax.f32 %v4899_v10, 0.0  ;;  %v4902_v13 = vadd.f32 %v2419_v43, %v2403_v11  ;;  %2101 = vmatpush1.bf16.msra.mxu0 %v1396_v62  ;;  %v1613_v43 = vunpack.c.h.s8.bf16 %v1101_v15  ;;  %v1469_v55 = vunpack.c.h.s8.bf16 %v1029_v50  ;;  %v1020_v11 = vld [vmem:[%s4623_s26 + $0x560] sm:$0xff]  ;;  %v879_v15 = vld [vmem:[%s4623_s26 + $0xf8] sm:$0xff] }
 0x2f7   : > { %2144 = vmatpush1.bf16.msra.mxu1 %v1524_v29  ;;  %2102 = vmatprep.subr.bf16.mxu0 %v1389_v3  ;;  %v1597_v56 = vunpack.c.h.s8.bf16 %v1093_v51  ;;  %v1468_v59 = vunpack.c.h.s8.bf16 %v1028_v57  ;;  %v1596_v61 = vunpack.c.h.s8.bf16 %v1092_v58  ;;  %v1461_v62 = vunpack.c.l.s8.bf16 %v1029_v50 }
 0x2f8   : > { %2145 = vmatprep.subr.bf16.mxu1 %v1517_v4  ;;  %v2477_v22 = vmax.f32 %v4902_v13, 0.0  ;;  %v1589_v29 = vunpack.c.l.s8.bf16 %v1093_v51  ;;  %v1460_v3 = vunpack.c.l.s8.bf16 %v1028_v57  ;;  %v1588_v4 = vunpack.c.l.s8.bf16 %v1092_v58  ;;  %v871_v51 = vld [vmem:[%s4623_s26 + $0xb8] sm:$0xff] }
 0x2f9   : > { %v1453_v37 = vunpack.c.h.s8.bf16 %v1021_v1  ;;  %v1581_v38 = vunpack.c.h.s8.bf16 %v1085_v2  ;;  %v1573_v23 = vunpack.c.l.s8.bf16 %v1085_v2  ;;  %v1151_v58 = vunpack.c.h.s8.bf16 %v871_v51 }
 0x2fa   : > { %2103 = vmatpush1.bf16.msra.mxu0 %v1388_v16  ;;  %v1084_v16 = vld [vmem:[%s4623_s26 + $0x760] sm:$0xff]  ;;  %v1143_v2 = vunpack.c.l.s8.bf16 %v871_v51 }
 0x2fb   : > { %2146 = vmatpush1.bf16.msra.mxu1 %v1516_v18  ;;  %2104 = vmatprep.subr.bf16.mxu0 %v1381_v19  ;;  %v1452_v18 = vunpack.c.h.s8.bf16 %v1020_v11  ;;  %v1580_v19 = vunpack.c.h.s8.bf16 %v1084_v16 }
 0x2fc   : > { %2147 = vmatprep.subr.bf16.mxu1 %v1509_v21  ;;  %v1445_v21 = vunpack.c.l.s8.bf16 %v1021_v1 }
 0x2fe   : > { %2105 = vmatpush1.bf16.msra.mxu0 %v1380_v26  ;;  %v1077_v26 = vld [vmem:[%s4623_s26 + $0x728] sm:$0xff] }
 0x2ff   : > { %2148 = vmatpush1.bf16.msra.mxu1 %v1508_v27  ;;  %2106 = vmatprep.subr.bf16.mxu0 %v1373_v28  ;;  %v1444_v27 = vunpack.c.l.s8.bf16 %v1020_v11  ;;  %v1572_v28 = vunpack.c.l.s8.bf16 %v1084_v16  ;;  %v1565_v32 = vunpack.c.h.s8.bf16 %v1077_v26  ;;  %v1557_v14 = vunpack.c.l.s8.bf16 %v1077_v26  ;;  %v862_v16 = vld [vmem:[%s4623_s26 + $0x70] sm:$0xff]  ;;  %v855_v26 = vld [vmem:[%s4623_s26 + $0x38] sm:$0xff] }
 0x300   : > { %2149 = vmatprep.subr.bf16.mxu1 %v1501_v31  ;;  %v1437_v31 = vunpack.c.h.s8.bf16 %v1013_v25 }
 0x302   : > { %2107 = vmatpush1.bf16.msra.mxu0 %v1372_v33  ;;  %v1076_v33 = vld [vmem:[%s4623_s26 + $0x720] sm:$0xff] }
 0x303   : > { %2150 = vmatpush1.bf16.msra.mxu1 %v1500_v34  ;;  %2108 = vmatprep.subr.bf16.mxu0 %v1365_v35  ;;  %v1436_v34 = vunpack.c.h.s8.bf16 %v1012_v7  ;;  %v1564_v35 = vunpack.c.h.s8.bf16 %v1076_v33 }
 0x304   : > { %2151 = vmatprep.subr.bf16.mxu1 %v1493_v36  ;;  %v1429_v36 = vunpack.c.l.s8.bf16 %v1013_v25 }
 0x306   : > { %2109 = vmatpush1.bf16.msra.mxu0 %v1364_v5  ;;  %v943_v5 = vld [vmem:[%s4623_s26 + $0x2f8] sm:$0xff] }
 0x307   : > { %2152 = vmatpush1.bf16.msra.mxu1 %v1492_v6  ;;  %2110 = vmatprep.subr.bf16.mxu0 %v1485_v42  ;;  %v1428_v6 = vunpack.c.l.s8.bf16 %v1012_v7  ;;  %v1556_v42 = vunpack.c.l.s8.bf16 %v1076_v33  ;;  %v1295_v44 = vunpack.c.h.s8.bf16 %v943_v5  ;;  %v1287_v50 = vunpack.c.l.s8.bf16 %v943_v5  ;;  %v854_v33 = vld [vmem:[%s4623_s26 + $0x30] sm:$0xff]  ;;  %v911_v5 = vld [vmem:[%s4623_s26 + $0x1f8] sm:$0xff] }
 0x308   : > { %2153 = vmatprep.subr.bf16.mxu1 %v1613_v43  ;;  %v1167_v43 = vunpack.c.h.s8.bf16 %v879_v15 }
 0x30a   : > { %2111 = vmatpush2.bf16.msra.mxu0 %v1484_v46  ;;  %v942_v46 = vld [vmem:[%s4623_s26 + $0x2f0] sm:$0xff] }
 0x30b   : > { %2154 = vmatpush2.bf16.msra.mxu1 %v1612_v47  ;;  %2112 = vmatprep.subr.bf16.mxu0 %v1477_v48  ;;  %v1166_v47 = vunpack.c.h.s8.bf16 %v878_v45  ;;  %v1294_v48 = vunpack.c.h.s8.bf16 %v942_v46  ;;  %v1286_v57 = vunpack.c.l.s8.bf16 %v942_v46  ;;  %v910_v46 = vld [vmem:[%s4623_s26 + $0x1f0] sm:$0xff] }
 0x30c   : > { %2155 = vmatprep.subr.bf16.mxu1 %v1605_v49  ;;  %v1159_v49 = vunpack.c.l.s8.bf16 %v879_v15 }
 0x30e   : > { %2113 = vmatpush2.bf16.msra.mxu0 %v1476_v52  ;;  %v935_v52 = vld [vmem:[%s4623_s26 + $0x2b8] sm:$0xff] }
 0x30f   : > { %2156 = vmatpush2.bf16.msra.mxu1 %v1604_v53  ;;  %2114 = vmatprep.subr.bf16.mxu0 %v1469_v55  ;;  %v4931_v53 = vld [vmem:[#allocation2 + $0x18] ss:$16 sps:$4 sm:$0xff]  }
 0x310   : > { %2157 = vmatprep.subr.bf16.mxu1 %v1597_v56  ;;  %v4934_v55 = vld [vmem:[#allocation2 + $0x10] ss:$40 sps:$4 sm:$0xff]   ;;  %v1158_v56 = vunpack.c.l.s8.bf16 %v878_v45 }
 0x312   : > { %2115 = vmatpush2.bf16.msra.mxu0 %v1468_v59  ;;  %v1279_v59 = vunpack.c.h.s8.bf16 %v935_v52 }
 0x313   : > { %2158 = vmatpush2.bf16.msra.mxu1 %v1596_v61  ;;  %2116 = vmatprep.subr.bf16.mxu0 %v1461_v62  ;;  %v870_v61 = vld [vmem:[%s4623_s26 + $0xb0] sm:$0xff] }
 0x314   : > { %2159 = vmatprep.subr.bf16.mxu1 %v1589_v29  ;;  %v934_v62 = vld [vmem:[%s4623_s26 + $0x2b0] sm:$0xff]  ;;  %v1150_v29 = vunpack.c.h.s8.bf16 %v870_v61 }
 0x315   : > { %v1278_v1 = vunpack.c.h.s8.bf16 %v934_v62  ;;  %v1270_v11 = vunpack.c.l.s8.bf16 %v934_v62  ;;  %v902_v62 = vld [vmem:[%s4623_s26 + $0x1b0] sm:$0xff] }
 0x316   : > { %2117 = vmatpush2.bf16.msra.mxu0 %v1460_v3  ;;  %v1271_v3 = vunpack.c.l.s8.bf16 %v935_v52  ;;  %v903_v52 = vld [vmem:[%s4623_s26 + $0x1b8] sm:$0xff] }
 0x317   : > { %2160 = vmatpush2.bf16.msra.mxu1 %v1588_v4  ;;  %2118 = vmatprep.subr.bf16.mxu0 %v1453_v37  ;;  %v863_v4 = vld [vmem:[%s4623_s26 + $0x78] sm:$0xff] }
 0x318   : > { %2161 = vmatprep.subr.bf16.mxu1 %v1581_v38  ;;  %v927_v37 = vld [vmem:[%s4623_s26 + $0x278] sm:$0xff]  ;;  %v1142_v38 = vunpack.c.l.s8.bf16 %v870_v61 }
 0x319   : > { %v1255_v25 = vunpack.c.l.s8.bf16 %v927_v37 }
 0x31a   : > { %2119 = vmatpush2.bf16.msra.mxu0 %v1452_v18  ;;  %v926_v18 = vld [vmem:[%s4623_s26 + $0x270] sm:$0xff] }
 0x31b   : > { %2162 = vmatpush2.bf16.msra.mxu1 %v1580_v19  ;;  %2120 = vmatprep.subr.bf16.mxu0 %v1445_v21  ;;  %v1134_v19 = vunpack.c.h.s8.bf16 %v862_v16  ;;  %v1262_v21 = vunpack.c.h.s8.bf16 %v926_v18 }
 0x31c   : > { %2163 = vmatprep.subr.bf16.mxu1 %v1573_v23  ;;  %v1127_v23 = vunpack.c.l.s8.bf16 %v863_v4 }
 0x31e   : > { %2121 = vmatpush2.bf16.msra.mxu0 %v1444_v27  ;;  %v919_v27 = vld [vmem:[%s4623_s26 + $0x238] sm:$0xff] }
 0x31f   : > { %2164 = vmatpush2.bf16.msra.mxu1 %v1572_v28  ;;  %2122 = vmatprep.subr.bf16.mxu0 %v1437_v31  ;;  %v1126_v28 = vunpack.c.l.s8.bf16 %v862_v16  ;;  %v1254_v31 = vunpack.c.l.s8.bf16 %v926_v18  ;;  %v1247_v7 = vunpack.c.h.s8.bf16 %v919_v27  ;;  %v1239_v15 = vunpack.c.l.s8.bf16 %v919_v27  ;;  %v894_v18 = vld [vmem:[%s4623_s26 + $0x170] sm:$0xff]  ;;  %v887_v27 = vld [vmem:[%s4623_s26 + $0x138] sm:$0xff] }
 0x320   : > { %2165 = vmatprep.subr.bf16.mxu1 %v1565_v32  ;;  %v1119_v32 = vunpack.c.h.s8.bf16 %v855_v26 }
 0x322   : > { %2123 = vmatpush2.bf16.msra.mxu0 %v1436_v34  ;;  %v918_v34 = vld [vmem:[%s4623_s26 + $0x230] sm:$0xff] }
 0x323   : > { %2166 = vmatpush2.bf16.msra.mxu1 %v1564_v35  ;;  %2124 = vmatprep.subr.bf16.mxu0 %v1429_v36  ;;  %v1118_v35 = vunpack.c.h.s8.bf16 %v854_v33  ;;  %v1246_v36 = vunpack.c.h.s8.bf16 %v918_v34 }
 0x324   : > { %2167 = vmatprep.subr.bf16.mxu1 %v1557_v14  ;;  %v1111_v14 = vunpack.c.l.s8.bf16 %v855_v26 }
 0x326   : > { %2125 = vmatpush2.bf16.msra.mxu0 %v1428_v6  ;;  %v975_v6 = vld [vmem:[%s4623_s26 + $0x3f8] sm:$0xff] }
 0x327   : > { %2168 = vmatpush2.bf16.msra.mxu1 %v1556_v42  ;;  %2180 = vmatprep.subr.bf16.mxu0 %v1167_v43  ;;  %v1110_v42 = vunpack.c.l.s8.bf16 %v854_v33  ;;  %v1238_v43 = vunpack.c.l.s8.bf16 %v918_v34  ;;  %v1359_v45 = vunpack.c.h.s8.bf16 %v975_v6  ;;  %v1351_v51 = vunpack.c.l.s8.bf16 %v975_v6 }
 0x328   : > { %2223 = vmatprep.subr.bf16.mxu1 %v1295_v44  ;;  %v1231_v44 = vunpack.c.h.s8.bf16 %v911_v5  ;;  %v1183_v34 = vunpack.c.h.s8.bf16 %v887_v27 }
 0x329   : > { %2127 = vmatmul.mubr.bf16.vlgmr.msra.gmra.mxu0 %v4931_v53 }
 0x32a   : > { %2170 = vmatmul.mubr.bf16.vlgmr.msra.gmra.mxu1 %v4934_v55  ;;  %2181 = vmatpush1.bf16.msra.mxu0 %v1166_v47  ;;  %v974_v47 = vld [vmem:[%s4623_s26 + $0x3f0] sm:$0xff]  ;;  %v1913_v33 = vpop.f32.mrf.mxu1 }
 0x32b   : > { %2224 = vmatpush1.bf16.msra.mxu1 %v1294_v48  ;;  %2182 = vmatprep.subr.bf16.mxu0 %v1159_v49  ;;  %v1230_v48 = vunpack.c.h.s8.bf16 %v910_v46  ;;  %v1358_v49 = vunpack.c.h.s8.bf16 %v974_v47 }
 0x32c   : > { %2225 = vmatprep.subr.bf16.mxu1 %v1287_v50  ;;  %2212 = vmatprep.mubr.bf16.mxu0 %v4827_v39  ;;  %v1263_v39 = vunpack.c.h.s8.bf16 %v927_v37  ;;  %v1223_v50 = vunpack.c.l.s8.bf16 %v911_v5  ;;  %v895_v37 = vld [vmem:[%s4623_s26 + $0x178] sm:$0xff] }
 0x32d   : > { %2255 = vmatprep.mubr.bf16.mxu1 %v4672_v20  ;;  %v1135_v20 = vunpack.c.h.s8.bf16 %v863_v4 }
 0x32e   : > { %2183 = vmatpush1.bf16.msra.mxu0 %v1158_v56  ;;  %v967_v56 = vld [vmem:[%s4623_s26 + $0x3b8] sm:$0xff] }
 0x32f   : > { %2226 = vmatpush1.bf16.msra.mxu1 %v1286_v57  ;;  %2184 = vmatprep.subr.bf16.mxu0 %v1151_v58  ;;  %v1222_v57 = vunpack.c.l.s8.bf16 %v910_v46  ;;  %v1350_v58 = vunpack.c.l.s8.bf16 %v974_v47  ;;  %v1343_v61 = vunpack.c.h.s8.bf16 %v967_v56  ;;  %v1335_v4 = vunpack.c.l.s8.bf16 %v967_v56  ;;  %v1071_v46 = vld [vmem:[%s4623_s26 + $0x6f8] sm:$0xff]  ;;  %v1006_v56 = vld [vmem:[%s4623_s26 + $0x4f0] sm:$0xff] }
 0x330   : > { %2227 = vmatprep.subr.bf16.mxu1 %v1279_v59  ;;  %v1215_v59 = vunpack.c.h.s8.bf16 %v903_v52 }
 0x332   : > { %2185 = vmatpush1.bf16.msra.mxu0 %v1150_v29  ;;  %v966_v29 = vld [vmem:[%s4623_s26 + $0x3b0] sm:$0xff] }
 0x333   : > { %2228 = vmatpush1.bf16.msra.mxu1 %v1278_v1  ;;  %2186 = vmatprep.subr.bf16.mxu0 %v1143_v2  ;;  %v1214_v1 = vunpack.c.h.s8.bf16 %v902_v62  ;;  %v1342_v2 = vunpack.c.h.s8.bf16 %v966_v29 }
 0x334   : > { %2229 = vmatprep.subr.bf16.mxu1 %v1271_v3  ;;  %v1207_v3 = vunpack.c.l.s8.bf16 %v903_v52  ;;  %v1551_v52 = vunpack.c.h.s8.bf16 %v1071_v46 }
 0x336   : > { %2187 = vmatpush1.bf16.msra.mxu0 %v1142_v38  ;;  %v959_v38 = vld [vmem:[%s4623_s26 + $0x378] sm:$0xff] }
 0x337   : > { %2230 = vmatpush1.bf16.msra.mxu1 %v1270_v11  ;;  %2188 = vmatprep.subr.bf16.mxu0 %v1135_v20  ;;  %v1206_v11 = vunpack.c.l.s8.bf16 %v902_v62  ;;  %v1334_v20 = vunpack.c.l.s8.bf16 %v966_v29  ;;  %v1327_v16 = vunpack.c.h.s8.bf16 %v959_v38  ;;  %v1319_v26 = vunpack.c.l.s8.bf16 %v959_v38  ;;  %v1063_v38 = vld [vmem:[%s4623_s26 + $0x6b8] sm:$0xff] }
 0x338   : > { %2231 = vmatprep.subr.bf16.mxu1 %v1263_v39  ;;  %v1199_v39 = vunpack.c.h.s8.bf16 %v895_v37 }
 0x33a   : > { %2189 = vmatpush1.bf16.msra.mxu0 %v1134_v19  ;;  %v958_v19 = vld [vmem:[%s4623_s26 + $0x370] sm:$0xff] }
 0x33b   : > { %2232 = vmatpush1.bf16.msra.mxu1 %v1262_v21  ;;  %2190 = vmatprep.subr.bf16.mxu0 %v1127_v23  ;;  %v1198_v21 = vunpack.c.h.s8.bf16 %v894_v18  ;;  %v1326_v23 = vunpack.c.h.s8.bf16 %v958_v19 }
 0x33c   : > { %2233 = vmatprep.subr.bf16.mxu1 %v1255_v25  ;;  %v1191_v25 = vunpack.c.l.s8.bf16 %v895_v37  ;;  %v999_v37 = vld [vmem:[%s4623_s26 + $0x4b8] sm:$0xff] }
 0x33e   : > { %2191 = vmatpush1.bf16.msra.mxu0 %v1126_v28  ;;  %v951_v28 = vld [vmem:[%s4623_s26 + $0x338] sm:$0xff] }
 0x33f   : > { %2234 = vmatpush1.bf16.msra.mxu1 %v1254_v31  ;;  %2192 = vmatprep.subr.bf16.mxu0 %v1119_v32  ;;  %v1190_v31 = vunpack.c.l.s8.bf16 %v894_v18  ;;  %v1318_v32 = vunpack.c.l.s8.bf16 %v958_v19  ;;  %v1414_v19 = vunpack.c.l.s8.bf16 %v1006_v56 }
 0x340   : > { %2235 = vmatprep.subr.bf16.mxu1 %v1247_v7  ;;  %v1870_v7 = vpop.f32.mrf.mxu0 }
 0x342   : > { %2193 = vmatpush1.bf16.msra.mxu0 %v1118_v35  ;;  %v1311_v35 = vunpack.c.h.s8.bf16 %v951_v28  ;;  %v1872_v6 = vpop.f32.mrf.mxu0 }
 0x343   : > { %2236 = vmatpush1.bf16.msra.mxu1 %v1246_v36  ;;  %2194 = vmatprep.subr.bf16.mxu0 %v1111_v14  ;;  %v886_v36 = vld [vmem:[%s4623_s26 + $0x130] sm:$0xff] }
 0x344   : > { %2237 = vmatprep.subr.bf16.mxu1 %v1239_v15  ;;  %v950_v14 = vld [vmem:[%s4623_s26 + $0x330] sm:$0xff]  ;;  %v1182_v15 = vunpack.c.h.s8.bf16 %v886_v36  ;;  %v1174_v47 = vunpack.c.l.s8.bf16 %v886_v36 }
 0x345   : > { %v1310_v5 = vunpack.c.h.s8.bf16 %v950_v14 }
 0x346   : > { %2195 = vmatpush1.bf16.msra.mxu0 %v1110_v42  ;;  %v1915_v42 = vpop.f32.mrf.mxu1 }
 0x347   : > { %2238 = vmatpush1.bf16.msra.mxu1 %v1238_v43  ;;  %2196 = vmatprep.subr.bf16.mxu0 %v1231_v44  ;;  %v1175_v43 = vunpack.c.l.s8.bf16 %v887_v27  ;;  %v1303_v44 = vunpack.c.l.s8.bf16 %v951_v28 }
 0x348   : > { %2239 = vmatprep.subr.bf16.mxu1 %v1359_v45  ;;  %v1007_v45 = vld [vmem:[%s4623_s26 + $0x4f8] sm:$0xff] }
 0x34a   : > { %2197 = vmatpush2.bf16.msra.mxu0 %v1230_v48  ;;  %v1302_v48 = vunpack.c.l.s8.bf16 %v950_v14 }
 0x34b   : > { %2240 = vmatpush2.bf16.msra.mxu1 %v1358_v49  ;;  %2198 = vmatprep.subr.bf16.mxu0 %v1223_v50  ;;  %v1874_v49 = vpop.f32.mrf.mxu0  ;;  %v1917_v50 = vpop.f32.mrf.mxu1 }
 0x34c   : > { %2241 = vmatprep.subr.bf16.mxu1 %v1351_v51  ;;  %v1423_v51 = vunpack.c.h.s8.bf16 %v1007_v45 }
 0x34d   : > { %v1876_v62 = vpop.f32.mrf.mxu0  ;;  %v1919_v29 = vpop.f32.mrf.mxu1 }
 0x34e   : > { %2199 = vmatpush2.bf16.msra.mxu0 %v1222_v57  ;;  %v1070_v57 = vld [vmem:[%s4623_s26 + $0x6f0] sm:$0xff] }
 0x34f   : > { %2242 = vmatpush2.bf16.msra.mxu1 %v1350_v58  ;;  %2200 = vmatprep.subr.bf16.mxu0 %v1215_v59  ;;  %v2364_v58 = vsub.s32 2, %v4857_v60  ;;  %v1422_v59 = vunpack.c.h.s8.bf16 %v1006_v56 }
 0x350   : > { %2243 = vmatprep.subr.bf16.mxu1 %v1343_v61  ;;  %v1550_v61 = vunpack.c.h.s8.bf16 %v1070_v57 }
 0x352   : > { %2201 = vmatpush2.bf16.msra.mxu0 %v1214_v1  ;;  %v2368_v1 = vsub.s32 3, %v4857_v60 }
 0x353   : > { %2244 = vmatpush2.bf16.msra.mxu1 %v1342_v2  ;;  %2202 = vmatprep.subr.bf16.mxu0 %v1207_v3  ;;  %v1415_v2 = vunpack.c.l.s8.bf16 %v1007_v45  ;;  %v1543_v3 = vunpack.c.l.s8.bf16 %v1071_v46 }
 0x354   : > { %2245 = vmatprep.subr.bf16.mxu1 %v1335_v4  ;;  %v1914_v4 = vadd.f32 %v1913_v33, %v1870_v7  ;;  %v2369_v28 = vrot.slane %v4864_v8, %v2368_v1 }
 0x356   : > { %2203 = vmatpush2.bf16.msra.mxu0 %v1206_v11 }
 0x357   : > { %2246 = vmatpush2.bf16.msra.mxu1 %v1334_v20  ;;  %2204 = vmatprep.subr.bf16.mxu0 %v1199_v39  ;;  %v2365_v39 = vrot.slane %v4864_v8, %v2364_v58 }
 0x358   : > { %2247 = vmatprep.subr.bf16.mxu1 %v1327_v16  ;;  %v1916_v16 = vadd.f32 %v1915_v42, %v1872_v6 }
 0x35a   : > { %2205 = vmatpush2.bf16.msra.mxu0 %v1198_v21  ;;  %v1542_v21 = vunpack.c.l.s8.bf16 %v1070_v57 }
 0x35b   : > { %2248 = vmatpush2.bf16.msra.mxu1 %v1326_v23  ;;  %2206 = vmatprep.subr.bf16.mxu0 %v1191_v25  ;;  %v998_v23 = vld [vmem:[%s4623_s26 + $0x4b0] sm:$0xff]  ;;  %v2423_v25 = vrot.slane %v4869_v17, %v2364_v58 }
 0x35c   : > { %2249 = vmatprep.subr.bf16.mxu1 %v1319_v26 }
 0x35e   : > { %2207 = vmatpush2.bf16.msra.mxu0 %v1190_v31  ;;  %v1407_v31 = vunpack.c.h.s8.bf16 %v999_v37 }
 0x35f   : > { %2250 = vmatpush2.bf16.msra.mxu1 %v1318_v32  ;;  %2208 = vmatprep.subr.bf16.mxu0 %v1183_v34  ;;  %v1062_v32 = vld [vmem:[%s4623_s26 + $0x6b0] sm:$0xff]  ;;  %v1920_v34 = vadd.f32 %v1919_v29, %v1876_v62 }
 0x360   : > { %2251 = vmatprep.subr.bf16.mxu1 %v1311_v35  ;;  %v2427_v35 = vrot.slane %v4869_v17, %v2368_v1  ;;  %v1534_v42 = vunpack.c.h.s8.bf16 %v1062_v32  ;;  %v990_v62 = vld [vmem:[%s4623_s26 + $0x470] sm:$0xff] }
 0x361   : > { %v1054_v29 = vld [vmem:[%s4623_s26 + $0x670] sm:$0xff] }
 0x362   : > { %2209 = vmatpush2.bf16.msra.mxu0 %v1182_v15  ;;  %v1406_v15 = vunpack.c.h.s8.bf16 %v998_v23 }
 0x363   : > { %2252 = vmatpush2.bf16.msra.mxu1 %v1310_v5  ;;  %2210 = vmatprep.subr.bf16.mxu0 %v1175_v43 }
 0x364   : > { %2253 = vmatprep.subr.bf16.mxu1 %v1303_v44  ;;  %v1527_v44 = vunpack.c.l.s8.bf16 %v1063_v38 }
 0x366   : > { %2211 = vmatpush2.bf16.msra.mxu0 %v1174_v47  ;;  %v991_v47 = vld [vmem:[%s4623_s26 + $0x478] sm:$0xff] }
 0x367   : > { %2254 = vmatpush2.bf16.msra.mxu1 %v1302_v48  ;;  %2266 = vmatprep.subr.bf16.mxu0 %v1423_v51  ;;  %v1055_v48 = vld [vmem:[%s4623_s26 + $0x678] sm:$0xff]  ;;  %v1526_v51 = vunpack.c.l.s8.bf16 %v1062_v32 }
 0x368   : > { %2309 = vmatprep.subr.bf16.mxu1 %v1551_v52 }
 0x369   : > { %v1956_v11 = vpop.f32.mrf.mxu0  ;;  %2213 = vmatmul.mubr.bf16.vlgmr.msra.gmra.mxu0 %v4874_v24  ;;  %v1535_v24 = vunpack.c.h.s8.bf16 %v1063_v38  ;;  %v1390_v38 = vunpack.c.h.s8.bf16 %v990_v62 }
 0x36a   : > { %v1999_v20 = vpop.f32.mrf.mxu1  ;;  %2256 = vmatmul.mubr.bf16.vlgmr.msra.gmra.mxu1 %v4703_v30  ;;  %v1957_v18 = vadd.f32 %v1956_v11, %v1914_v4  ;;  %2267 = vmatpush1.bf16.msra.mxu0 %v1422_v59  ;;  %v1918_v30 = vadd.f32 %v1917_v50, %v1874_v49  ;;  %v1398_v50 = vunpack.c.l.s8.bf16 %v998_v23  ;;  %v1391_v59 = vunpack.c.h.s8.bf16 %v991_v47 }
 0x36b   : > { %2310 = vmatpush1.bf16.msra.mxu1 %v1550_v61  ;;  %v1958_v26 = vpop.f32.mrf.mxu0  ;;  %2268 = vmatprep.subr.bf16.mxu0 %v1415_v2  ;;  %v1519_v61 = vunpack.c.h.s8.bf16 %v1055_v48  ;;  %v1518_v11 = vunpack.c.h.s8.bf16 %v1054_v29  ;;  %v1510_v23 = vunpack.c.l.s8.bf16 %v1054_v29 }
 0x36c   : > { %v2001_v27 = vpop.f32.mrf.mxu1  ;;  %2311 = vmatprep.subr.bf16.mxu1 %v1543_v3  ;;  %v2000_v7 = vadd.f32 %v1999_v20, %v1957_v18  ;;  %v1959_v33 = vadd.f32 %v1958_v26, %v1916_v16  ;;  %2298 = vmatprep.mubr.bf16.mxu0 %v4882_v40  ;;  %v1399_v40 = vunpack.c.l.s8.bf16 %v999_v37  ;;  %v1383_v20 = vunpack.c.l.s8.bf16 %v991_v47  ;;  %v983_v18 = vld [vmem:[%s4623_s26 + $0x438] sm:$0xff] }
 0x36d   : > { %2341 = vmatprep.mubr.bf16.mxu1 %v4885_v41  ;;  %v1960_v36 = vpop.f32.mrf.mxu0  ;;  %v1367_v32 = vunpack.c.l.s8.bf16 %v983_v18 }
 0x36e   : > { %v2003_v14 = vpop.f32.mrf.mxu1  ;;  %v2396_v8 = vmul.f32 %v2365_v39, %v2000_v7  ;;  %v2002_v5 = vadd.f32 %v2001_v27, %v1959_v33  ;;  %v1961_v6 = vadd.f32 %v1960_v36, %v1918_v30  ;;  %2269 = vmatpush1.bf16.msra.mxu0 %v1414_v19  ;;  %v1047_v19 = vld [vmem:[%s4623_s26 + $0x638] sm:$0xff]  ;;  %v982_v27 = vld [vmem:[%s4623_s26 + $0x430] sm:$0xff] }
 0x36f   : > { %2312 = vmatpush1.bf16.msra.mxu1 %v1542_v21  ;;  %v1962_v43 = vpop.f32.mrf.mxu0  ;;  %2270 = vmatprep.subr.bf16.mxu0 %v1407_v31  ;;  %v1382_v21 = vunpack.c.l.s8.bf16 %v990_v62  ;;  %v1503_v26 = vunpack.c.h.s8.bf16 %v1047_v19  ;;  %v1374_v31 = vunpack.c.h.s8.bf16 %v982_v27  ;;  %v1495_v30 = vunpack.c.l.s8.bf16 %v1047_v19  ;;  %v1039_v7 = vld [vmem:[%s4623_s26 + $0x5f8] sm:$0xff] }
 0x370   : > { %2313 = vmatprep.subr.bf16.mxu1 %v1535_v24  ;;  %v4983_v41 = vadd.f32 %v2423_v25, %v2396_v8  ;;  %v2397_v45 = vmul.f32 %v2369_v28, %v2002_v5  ;;  %v2004_v17 = vadd.f32 %v2003_v14, %v1961_v6  ;;  %v1963_v46 = vadd.f32 %v1962_v43, %v1920_v34  ;;  %v2005_v49 = vpop.f32.mrf.mxu1  ;;  %v1103_v33 = vld [vmem:[%s4623_s26 + $0x7f8] sm:$0xff]  ;;  %v1102_v8 = vld [vmem:[%s4623_s26 + $0x7f0] sm:$0xff] }
 0x371   : > { %v1366_v34 = vunpack.c.l.s8.bf16 %v982_v27  ;;  %v1487_v36 = vunpack.c.h.s8.bf16 %v1039_v7  ;;  %v1615_v14 = vunpack.c.h.s8.bf16 %v1103_v33  ;;  %v1614_v6 = vunpack.c.h.s8.bf16 %v1102_v8 }
 0x372   : > { %v2470_v52 = vmax.f32 %v4983_v41, 0.0  ;;  %v4988_v56 = vadd.f32 %v2427_v35, %v2397_v45  ;;  %v2404_v57 = vmul.f32 %v2365_v39, %v2004_v17  ;;  %v2006_v58 = vadd.f32 %v2005_v49, %v1963_v46  ;;  %2271 = vmatpush1.bf16.msra.mxu0 %v1406_v15  ;;  %v1038_v15 = vld [vmem:[%s4623_s26 + $0x5f0] sm:$0xff] }
 0x373   : > { %2314 = vmatpush1.bf16.msra.mxu1 %v1534_v42  ;;  %2272 = vmatprep.subr.bf16.mxu0 %v1399_v40  ;;  %v1511_v39 = vunpack.c.l.s8.bf16 %v1055_v48  ;;  %v1486_v5 = vunpack.c.h.s8.bf16 %v1038_v15  ;;  %v1479_v42 = vunpack.c.l.s8.bf16 %v1039_v7  ;;  %v1607_v43 = vunpack.c.l.s8.bf16 %v1103_v33  ;;  %v1031_v40 = vld [vmem:[%s4623_s26 + $0x5b8] sm:$0xff]  ;;  %v1030_v48 = vld [vmem:[%s4623_s26 + $0x5b0] sm:$0xff] }
 0x374   : > { %2315 = vmatprep.subr.bf16.mxu1 %v1527_v44  ;;  %v2471_v1 = vmax.f32 %v4988_v56, 0.0  ;;  %v4993_v2 = vadd.f32 %v2423_v25, %v2404_v57  ;;  %v2405_v3 = vmul.f32 %v2369_v28, %v2006_v58  ;;  %v1375_v25 = vunpack.c.h.s8.bf16 %v983_v18  ;;  %v1046_v28 = vld [vmem:[%s4623_s26 + $0x630] sm:$0xff]  ;;  %v1095_v44 = vld [vmem:[%s4623_s26 + $0x7b8] sm:$0xff] }
 0x375   : > { %v1502_v24 = vunpack.c.h.s8.bf16 %v1046_v28  ;;  %v1478_v45 = vunpack.c.l.s8.bf16 %v1038_v15  ;;  %v1606_v17 = vunpack.c.l.s8.bf16 %v1102_v8  ;;  %v1471_v46 = vunpack.c.h.s8.bf16 %v1031_v40  ;;  %v1094_v49 = vld [vmem:[%s4623_s26 + $0x7b0] sm:$0xff] }
 0x376   : > { %v2478_v4 = vmax.f32 %v4993_v2, 0.0  ;;  %v4996_v37 = vadd.f32 %v2427_v35, %v2405_v3  ;;  %2273 = vmatpush1.bf16.msra.mxu0 %v1398_v50  ;;  %v1494_v35 = vunpack.c.l.s8.bf16 %v1046_v28  ;;  %v1599_v47 = vunpack.c.h.s8.bf16 %v1095_v44 }
 0x377   : > { %2316 = vmatpush1.bf16.msra.mxu1 %v1526_v51  ;;  %2274 = vmatprep.subr.bf16.mxu0 %v1391_v59  ;;  %v1470_v50 = vunpack.c.h.s8.bf16 %v1030_v48  ;;  %v1598_v51 = vunpack.c.h.s8.bf16 %v1094_v49  ;;  %v1463_v57 = vunpack.c.l.s8.bf16 %v1031_v40  ;;  %v1591_v58 = vunpack.c.l.s8.bf16 %v1095_v44  ;;  %v1023_v59 = vld [vmem:[%s4623_s26 + $0x578] sm:$0xff] }
 0x378   : > { %2317 = vmatprep.subr.bf16.mxu1 %v1519_v61  ;;  %v2479_v16 = vmax.f32 %v4996_v37, 0.0  ;;  %v1087_v61 = vld [vmem:[%s4623_s26 + $0x778] sm:$0xff]  ;;  %v1462_v62 = vunpack.c.l.s8.bf16 %v1030_v48  ;;  %v1590_v29 = vunpack.c.l.s8.bf16 %v1094_v49  ;;  %v1455_v3 = vunpack.c.h.s8.bf16 %v1023_v59 }
 0x379   : > { %v1447_v19 = vunpack.c.l.s8.bf16 %v1023_v59 }
 0x37a   : > { %2275 = vmatpush1.bf16.msra.mxu0 %v1390_v38  ;;  %v1583_v38 = vunpack.c.h.s8.bf16 %v1087_v61 }
 0x37b   : > { %2318 = vmatpush1.bf16.msra.mxu1 %v1518_v11  ;;  %2276 = vmatprep.subr.bf16.mxu0 %v1383_v20  ;;  %v1022_v11 = vld [vmem:[%s4623_s26 + $0x570] sm:$0xff] }
 0x37c   : > { %2319 = vmatprep.subr.bf16.mxu1 %v1511_v39  ;;  %v1086_v20 = vld [vmem:[%s4623_s26 + $0x770] sm:$0xff]  ;;  %v1454_v39 = vunpack.c.h.s8.bf16 %v1022_v11 }
 0x37d   : > { %v1582_v18 = vunpack.c.h.s8.bf16 %v1086_v20  ;;  %v1574_v27 = vunpack.c.l.s8.bf16 %v1086_v20 }
 0x37e   : > { %2277 = vmatpush1.bf16.msra.mxu0 %v1382_v21  ;;  %v1575_v21 = vunpack.c.l.s8.bf16 %v1087_v61 }
 0x37f   : > { %2320 = vmatpush1.bf16.msra.mxu1 %v1510_v23  ;;  %2278 = vmatprep.subr.bf16.mxu0 %v1375_v25  ;;  %v1015_v23 = vld [vmem:[%s4623_s26 + $0x538] sm:$0xff] }
 0x380   : > { %2321 = vmatprep.subr.bf16.mxu1 %v1503_v26  ;;  %v1079_v25 = vld [vmem:[%s4623_s26 + $0x738] sm:$0xff]  ;;  %v1446_v26 = vunpack.c.l.s8.bf16 %v1022_v11  ;;  %v1439_v28 = vunpack.c.h.s8.bf16 %v1015_v23  ;;  %v1431_v33 = vunpack.c.l.s8.bf16 %v1015_v23 }
 0x382   : > { %2279 = vmatpush1.bf16.msra.mxu0 %v1374_v31  ;;  %v1567_v31 = vunpack.c.h.s8.bf16 %v1079_v25 }
 0x383   : > { %2322 = vmatpush1.bf16.msra.mxu1 %v1502_v24  ;;  %2280 = vmatprep.subr.bf16.mxu0 %v1367_v32  ;;  %v1014_v24 = vld [vmem:[%s4623_s26 + $0x530] sm:$0xff] }
 0x384   : > { %2323 = vmatprep.subr.bf16.mxu1 %v1495_v30  ;;  %v1078_v32 = vld [vmem:[%s4623_s26 + $0x730] sm:$0xff]  ;;  %v1438_v30 = vunpack.c.h.s8.bf16 %v1014_v24 }
 0x385   : > { %v1566_v7 = vunpack.c.h.s8.bf16 %v1078_v32 }
 0x386   : > { %2281 = vmatpush1.bf16.msra.mxu0 %v1366_v34  ;;  %v1559_v34 = vunpack.c.l.s8.bf16 %v1079_v25 }
 0x387   : > { %2324 = vmatpush1.bf16.msra.mxu1 %v1494_v35  ;;  %2282 = vmatprep.subr.bf16.mxu0 %v1487_v36  ;;  %v1430_v35 = vunpack.c.l.s8.bf16 %v1014_v24  ;;  %v1558_v36 = vunpack.c.l.s8.bf16 %v1078_v32 }
 0x388   : > { %2325 = vmatprep.subr.bf16.mxu1 %v1615_v14 }
 0x38a   : > { %2283 = vmatpush2.bf16.msra.mxu0 %v1486_v5 }
 0x38b   : > { %2326 = vmatpush2.bf16.msra.mxu1 %v1614_v6  ;;  %2284 = vmatprep.subr.bf16.mxu0 %v1479_v42 }
 0x38c   : > { %2327 = vmatprep.subr.bf16.mxu1 %v1607_v43  ;;  %v2372_v43 = vsub.s32 4, %v4857_v60 }
 0x38e   : > { %2285 = vmatpush2.bf16.msra.mxu0 %v1478_v45 }
 0x38f   : > { %2328 = vmatpush2.bf16.msra.mxu1 %v1606_v17  ;;  %2286 = vmatprep.subr.bf16.mxu0 %v1471_v46  ;;  %v2376_v17 = vsub.s32 5, %v4857_v60 }
 0x390   : > { %2329 = vmatprep.subr.bf16.mxu1 %v1599_v47 }
 0x392   : > { %2287 = vmatpush2.bf16.msra.mxu0 %v1470_v50  ;;  %v5030_v50 = vld [vmem:[%s408_s21] sm:$0xff] }
 0x393   : > { %2330 = vmatpush2.bf16.msra.mxu1 %v1598_v51  ;;  %2288 = vmatprep.subr.bf16.mxu0 %v1463_v57  ;;  %v2431_v51 = vrot.slane %v5030_v50, %v2372_v43 }
 0x394   : > { %2331 = vmatprep.subr.bf16.mxu1 %v1591_v58 }
 0x396   : > { %2289 = vmatpush2.bf16.msra.mxu0 %v1462_v62 }
 0x397   : > { %2332 = vmatpush2.bf16.msra.mxu1 %v1590_v29  ;;  %2290 = vmatprep.subr.bf16.mxu0 %v1455_v3  ;;  %v2435_v3 = vrot.slane %v5030_v50, %v2376_v17 }
 0x398   : > { %2333 = vmatprep.subr.bf16.mxu1 %v1583_v38 }
 0x39a   : > { %2291 = vmatpush2.bf16.msra.mxu0 %v1454_v39 }
 0x39b   : > { %2334 = vmatpush2.bf16.msra.mxu1 %v1582_v18  ;;  %2292 = vmatprep.subr.bf16.mxu0 %v1447_v19 }
 0x39c   : > { %2335 = vmatprep.subr.bf16.mxu1 %v1575_v21 }
 0x39e   : > { %2293 = vmatpush2.bf16.msra.mxu0 %v1446_v26 }
 0x39f   : > { %2336 = vmatpush2.bf16.msra.mxu1 %v1574_v27  ;;  %2294 = vmatprep.subr.bf16.mxu0 %v1439_v28 }
 0x3a0   : > { %2337 = vmatprep.subr.bf16.mxu1 %v1567_v31 }
 0x3a2   : > { %2295 = vmatpush2.bf16.msra.mxu0 %v1438_v30 }
 0x3a3   : > { %2338 = vmatpush2.bf16.msra.mxu1 %v1566_v7  ;;  %2296 = vmatprep.subr.bf16.mxu0 %v1431_v33 }
 0x3a4   : > { %2339 = vmatprep.subr.bf16.mxu1 %v1559_v34 }
 0x3a6   : > { %2297 = vmatpush2.bf16.msra.mxu0 %v1430_v35 }
 0x3a7   : > { %2340 = vmatpush2.bf16.msra.mxu1 %v1558_v36 }
 0x3a9   : > { %2299 = vmatmul.mubr.bf16.vlgmr.msra.gmra.mxu0 %v4931_v53  ;;  %v2042_v14 = vpop.f32.mrf.mxu0 }
 0x3aa   : > { %2342 = vmatmul.mubr.bf16.vlgmr.msra.gmra.mxu1 %v4934_v55  ;;  %v2085_v15 = vpop.f32.mrf.mxu1  ;;  %v5025_v55 = vld [vmem:[%s399_s1] sm:$0xff] }
 0x3ab   : > { %v2044_v8 = vpop.f32.mrf.mxu0  ;;  %v2086_v45 = vadd.f32 %v2085_v15, %v2042_v14  ;;  %v2373_v49 = vrot.slane %v5025_v55, %v2372_v43  ;;  %v2377_v29 = vrot.slane %v5025_v55, %v2376_v17 }
 0x3ac   : > { %v2087_v5 = vpop.f32.mrf.mxu1 }
 0x3ad   : > { %v2046_v6 = vpop.f32.mrf.mxu0  ;;  %v2088_v53 = vadd.f32 %v2087_v5, %v2044_v8 }
 0x3ae   : > { %v2089_v42 = vpop.f32.mrf.mxu1 }
 0x3af   : > { %v2048_v40 = vpop.f32.mrf.mxu0  ;;  %v2090_v59 = vadd.f32 %v2089_v42, %v2046_v6 }
 0x3b0   : > { %v2091_v44 = vpop.f32.mrf.mxu1 }
 0x3b1   : > { %v2092_v20 = vadd.f32 %v2091_v44, %v2048_v40  ;;  %v2380_v40 = vsub.s32 6, %v4857_v60 }
 0x3e9   : > { %v2128_v46 = vpop.f32.mrf.mxu0 }
 0x3ea   : > { %v2171_v47 = vpop.f32.mrf.mxu1  ;;  %v2129_v48 = vadd.f32 %v2128_v46, %v2086_v45  ;;  %v2384_v46 = vsub.s32 7, %v4857_v60 }
 0x3eb   : > { %v2130_v57 = vpop.f32.mrf.mxu0 }
 0x3ec   : > { %v2173_v58 = vpop.f32.mrf.mxu1  ;;  %v2172_v61 = vadd.f32 %v2171_v47, %v2129_v48  ;;  %v2131_v62 = vadd.f32 %v2130_v57, %v2088_v53  ;;  %v2439_v57 = vrot.slane %v5030_v50, %v2380_v40 }
 0x3ed   : > { %v2132_v38 = vpop.f32.mrf.mxu0 }
 0x3ee   : > { %v2175_v11 = vpop.f32.mrf.mxu1  ;;  %v2398_v39 = vmul.f32 %v2373_v49, %v2172_v61  ;;  %v2174_v18 = vadd.f32 %v2173_v58, %v2131_v62  ;;  %v2133_v19 = vadd.f32 %v2132_v38, %v2090_v59  ;;  %v2443_v38 = vrot.slane %v5030_v50, %v2384_v46 }
 0x3ef   : > { %v2134_v21 = vpop.f32.mrf.mxu0 }
 0x3f0   : > { %v5035_v23 = vadd.f32 %v2431_v51, %v2398_v39  ;;  %v2399_v25 = vmul.f32 %v2377_v29, %v2174_v18  ;;  %v2176_v26 = vadd.f32 %v2175_v11, %v2133_v19  ;;  %v2135_v27 = vadd.f32 %v2134_v21, %v2092_v20  ;;  %v2177_v28 = vpop.f32.mrf.mxu1 }
 0x3f2   : > { %v2472_v31 = vmax.f32 %v5035_v23, 0.0  ;;  %v5040_v24 = vadd.f32 %v2435_v3, %v2399_v25  ;;  %v2406_v32 = vmul.f32 %v2373_v49, %v2176_v26  ;;  %v2178_v30 = vadd.f32 %v2177_v28, %v2135_v27 }
 0x3f4   : > { %v2473_v7 = vmax.f32 %v5040_v24, 0.0  ;;  %v5044_v33 = vadd.f32 %v2431_v51, %v2406_v32  ;;  %v2407_v34 = vmul.f32 %v2377_v29, %v2178_v30  ;;  %v2381_v51 = vrot.slane %v5025_v55, %v2380_v40 }
 0x3f6   : > { %v2480_v35 = vmax.f32 %v5044_v33, 0.0  ;;  %v5047_v36 = vadd.f32 %v2435_v3, %v2407_v34  ;;  %v2385_v3 = vrot.slane %v5025_v55, %v2384_v46 }
 0x3f8   : > { %v2481_v14 = vmax.f32 %v5047_v36, 0.0 }
 0x429   : > { %v2214_v15 = vpop.f32.mrf.mxu0 }
 0x42a   : > { %v2257_v8 = vpop.f32.mrf.mxu1 }
 0x42b   : > { %v2216_v5 = vpop.f32.mrf.mxu0  ;;  %v2258_v17 = vadd.f32 %v2257_v8, %v2214_v15 }
 0x42c   : > { %v2259_v6 = vpop.f32.mrf.mxu1 }
 0x42d   : > { %v2218_v42 = vpop.f32.mrf.mxu0  ;;  %v2260_v48 = vadd.f32 %v2259_v6, %v2216_v5 }
 0x42e   : > { %v2261_v43 = vpop.f32.mrf.mxu1 }
 0x42f   : > { %v2220_v44 = vpop.f32.mrf.mxu0  ;;  %v2262_v61 = vadd.f32 %v2261_v43, %v2218_v42 }
 0x430   : > { %v2263_v45 = vpop.f32.mrf.mxu1 }
 0x431   : > { %v2264_v60 = vadd.f32 %v2263_v45, %v2220_v44 }
 0x469   : > { %v2300_v47 = vpop.f32.mrf.mxu0 }
 0x46a   : > { %v2343_v53 = vpop.f32.mrf.mxu1  ;;  %v2301_v49 = vadd.f32 %v2300_v47, %v2258_v17 }
 0x46b   : > { %v2302_v58 = vpop.f32.mrf.mxu0 }
 0x46c   : > { %v2345_v59 = vpop.f32.mrf.mxu1  ;;  %v2344_v62 = vadd.f32 %v2343_v53, %v2301_v49  ;;  %v2303_v29 = vadd.f32 %v2302_v58, %v2260_v48 }
 0x46d   : > { %v2304_v11 = vpop.f32.mrf.mxu0 }
 0x46e   : > { %v2347_v20 = vpop.f32.mrf.mxu1  ;;  %v2400_v39 = vmul.f32 %v2381_v51, %v2344_v62  ;;  %v2346_v18 = vadd.f32 %v2345_v59, %v2303_v29  ;;  %v2305_v19 = vadd.f32 %v2304_v11, %v2262_v61 }
 0x46f   : > { %v2306_v21 = vpop.f32.mrf.mxu0 }
 0x470   : > { %v5058_v25 = vadd.f32 %v2439_v57, %v2400_v39  ;;  %v2401_v26 = vmul.f32 %v2385_v3, %v2346_v18  ;;  %v2348_v27 = vadd.f32 %v2347_v20, %v2305_v19  ;;  %v2307_v28 = vadd.f32 %v2306_v21, %v2264_v60  ;;  %v2349_v32 = vpop.f32.mrf.mxu1 }
 0x472   : > { %v2474_v30 = vmax.f32 %v5058_v25, 0.0  ;;  %v5061_v34 = vadd.f32 %v2443_v38, %v2401_v26  ;;  %v2408_v55 = vmul.f32 %v2381_v51, %v2348_v27  ;;  %v2350_v15 = vadd.f32 %v2349_v32, %v2307_v28 }
 0x474   : > { %v2475_v50 = vmax.f32 %v5061_v34, 0.0  ;;  %v5064_v8 = vadd.f32 %v2439_v57, %v2408_v55  ;;  %v2409_v5 = vmul.f32 %v2385_v3, %v2350_v15  ;;  %2499 = sbr.rel (%p3627_p5) target bundleno = 1154 (0x482), region = 92 }
 0x476   : > { %v2482_v6 = vmax.f32 %v5064_v8, 0.0  ;;  %v5067_v42 = vadd.f32 %v2443_v38, %v2409_v5 }
 0x478   : > { %v2483_v43 = vmax.f32 %v5067_v42, 0.0 }
 0x479   : > { %v2500_v40 = vld [vmem:[#allocation2 + $0x30] sm:$0xff]  ;;  %v2501_v44 = vld [vmem:[#allocation2] sm:$0xff]  ;;  %v2502_v45 = vld [vmem:[#allocation2 + $0x18] sm:$0xff]  ;;  %v3734_v17 = vpack.c.bf16 %v2469_v9, %v2468_v63  ;;  %v3735_v46 = vpack.c.bf16 %v2471_v1, %v2470_v52  ;;  %v3736_v47 = vpack.c.bf16 %v2473_v7, %v2472_v31  ;;  %v3737_v53 = vpack.c.bf16 %v2475_v50, %v2474_v30 }
 0x47a   : > { %2508 = vst [vmem:[#allocation3] sm:$0xff] %v2500_v40  ;;  %2509 = vst [vmem:[#allocation3 + $0x18] sm:$0xff] %v2501_v44  ;;  %v2503_v48 = vld [vmem:[#allocation2 + $0x10] sm:$0xff]  ;;  %v2504_v49 = vld [vmem:[#allocation2 + $0x8] sm:$0xff]  ;;  %v3738_v57 = vpack.c.bf16 %v2477_v22, %v2476_v12  ;;  %v3739_v58 = vpack.c.bf16 %v2479_v16, %v2478_v4  ;;  %v3740_v59 = vpack.c.bf16 %v2481_v14, %v2480_v35 }
 0x47b   : > { %2510 = vst [vmem:[#allocation3 + $0x10] sm:$0xff] %v2502_v45  ;;  %v2505_v51 = vld [vmem:[#allocation2 + $0x20] sm:$0xff]  ;;  %v3741_v61 = vpack.c.bf16 %v2483_v43, %v2482_v6  ;;  %2511 = vst [vmem:[#allocation3 + $0x20] sm:$0xff] %v2503_v48  ;;  %v2506_v62 = vld [vmem:[#allocation2 + $0x28] sm:$0xff] }
 0x47c   : > { %2512 = vst [vmem:[#allocation3 + $0x28] sm:$0xff] %v2504_v49  ;;  %2513 = vst [vmem:[#allocation3 + $0x8] sm:$0xff] %v2505_v51  ;;  %v2507_v29 = vld [vmem:[#allocation2 + $0x38] sm:$0xff] }
 0x47d   : > { %2564 = vst [vmem:[#allocation2 + $0x30] sm:$0xff] %v3734_v17  ;;  %2565 = vst [vmem:[#allocation2] sm:$0xff] %v3735_v46 }
 0x47e   : > { %2566 = vst [vmem:[#allocation2 + $0x18] sm:$0xff] %v3736_v47  ;;  %2567 = vst [vmem:[#allocation2 + $0x10] sm:$0xff] %v3737_v53 }
 0x47f   : > { %2514 = vst [vmem:[#allocation3 + $0x30] sm:$0xff] %v2506_v62  ;;  %2515 = vst [vmem:[#allocation3 + $0x38] sm:$0xff] %v2507_v29 }
 0x480   : > { %2568 = vst [vmem:[#allocation2 + $0x8] sm:$0xff] %v3738_v57  ;;  %2569 = vst [vmem:[#allocation2 + $0x20] sm:$0xff] %v3739_v58 }
 0x481   : > { %2570 = vst [vmem:[#allocation2 + $0x28] sm:$0xff] %v3740_v59  ;;  %2571 = vst [vmem:[#allocation2 + $0x38] sm:$0xff] %v3741_v61 }
 0x482 PF: > { %p3636_p0 = scmp.ne.s32.totalorder %s5217_s13, 1 }
 0x484   : > { %2575 = sbr.rel (%p3636_p0) target bundleno = 1176 (0x498), region = 96 }
 0x489   : > { %v2576_v3 = vld [vmem:[#allocation3] sm:$0xff]  ;;  %v2577_v38 = vld [vmem:[#allocation3 + $0x18] sm:$0xff]  ;;  %v2578_v11 = vld [vmem:[#allocation3 + $0x10] sm:$0xff] }
 0x48a   : > { %v2584_v20 = vunpack.c.l.bf16 %v2576_v3  ;;  %v2585_v60 = vunpack.c.h.bf16 %v2576_v3  ;;  %v2586_v39 = vunpack.c.l.bf16 %v2577_v38  ;;  %v2587_v18 = vunpack.c.h.bf16 %v2577_v38  ;;  %v2579_v19 = vld [vmem:[#allocation3 + $0x20] sm:$0xff]  ;;  %v2580_v32 = vld [vmem:[#allocation3 + $0x28] sm:$0xff]  ;;  %v2582_v0 = vld [vmem:[#allocation3 + $0x30] sm:$0xff] }
 0x48b   : > { %v2588_v21 = vunpack.c.l.bf16 %v2578_v11  ;;  %v2589_v26 = vunpack.c.h.bf16 %v2578_v11  ;;  %v2590_v27 = vunpack.c.l.bf16 %v2579_v19  ;;  %v2591_v28 = vunpack.c.h.bf16 %v2579_v19  ;;  %v2581_v44 = vld [vmem:[#allocation3 + $0x8] sm:$0xff]  ;;  %v2583_v56 = vld [vmem:[#allocation3 + $0x38] sm:$0xff] }
 0x48c   : > { %v2600_v55 = vadd.f32 %v2584_v20, %v2468_v63  ;;  %v2601_v15 = vadd.f32 %v2585_v60, %v2469_v9  ;;  %v2602_v5 = vadd.f32 %v2586_v39, %v2470_v52  ;;  %v2603_v40 = vadd.f32 %v2587_v18, %v2471_v1 }
 0x48d   : > { %v2604_v45 = vadd.f32 %v2588_v21, %v2472_v31  ;;  %v2605_v17 = vadd.f32 %v2589_v26, %v2473_v7  ;;  %v2606_v54 = vadd.f32 %v2590_v27, %v2474_v30  ;;  %v2607_v63 = vadd.f32 %v2591_v28, %v2475_v50 }
 0x48e   : > { %v3742_v9 = vpack.c.bf16 %v2601_v15, %v2600_v55  ;;  %v3743_v41 = vpack.c.bf16 %v2603_v40, %v2602_v5  ;;  %v2592_v52 = vunpack.c.l.bf16 %v2580_v32  ;;  %v2593_v46 = vunpack.c.h.bf16 %v2580_v32 }
 0x48f   : > { %v3744_v1 = vpack.c.bf16 %v2605_v17, %v2604_v45  ;;  %v3745_v47 = vpack.c.bf16 %v2607_v63, %v2606_v54  ;;  %v2594_v53 = vunpack.c.l.bf16 %v2581_v44  ;;  %v2595_v23 = vunpack.c.h.bf16 %v2581_v44 }
 0x490   : > { %2664 = vst [vmem:[#allocation2 + $0x30] sm:$0xff] %v3742_v9  ;;  %2665 = vst [vmem:[#allocation2] sm:$0xff] %v3743_v41  ;;  %v2608_v31 = vadd.f32 %v2592_v52, %v2476_v12  ;;  %v2609_v24 = vadd.f32 %v2593_v46, %v2477_v22  ;;  %v2596_v7 = vunpack.c.l.bf16 %v2582_v0  ;;  %v2597_v25 = vunpack.c.h.bf16 %v2582_v0 }
 0x491   : > { %2666 = vst [vmem:[#allocation2 + $0x18] sm:$0xff] %v3744_v1  ;;  %2667 = vst [vmem:[#allocation2 + $0x10] sm:$0xff] %v3745_v47  ;;  %v2610_v30 = vadd.f32 %v2594_v53, %v2478_v4  ;;  %v2611_v34 = vadd.f32 %v2595_v23, %v2479_v16  ;;  %v2598_v50 = vunpack.c.l.bf16 %v2583_v56  ;;  %v2599_v48 = vunpack.c.h.bf16 %v2583_v56 }
 0x492   : > { %v3746_v49 = vpack.c.bf16 %v2609_v24, %v2608_v31  ;;  %v2612_v10 = vadd.f32 %v2596_v7, %v2480_v35  ;;  %v2613_v12 = vadd.f32 %v2597_v25, %v2481_v14 }
 0x493   : > { %v3747_v13 = vpack.c.bf16 %v2611_v34, %v2610_v30  ;;  %v2614_v22 = vadd.f32 %v2598_v50, %v2482_v6  ;;  %v2615_v2 = vadd.f32 %v2599_v48, %v2483_v43 }
 0x494   : > { %2668 = vst [vmem:[#allocation2 + $0x8] sm:$0xff] %v3746_v49  ;;  %v3748_v4 = vpack.c.bf16 %v2613_v12, %v2612_v10 }
 0x495   : > { %2669 = vst [vmem:[#allocation2 + $0x20] sm:$0xff] %v3747_v13  ;;  %v3749_v37 = vpack.c.bf16 %v2615_v2, %v2614_v22 }
 0x496   : > { %2670 = vst [vmem:[#allocation2 + $0x28] sm:$0xff] %v3748_v4 }
 0x497   : > { %2671 = vst [vmem:[#allocation2 + $0x38] sm:$0xff] %v3749_v37 }
 0x498 PF: > { %p3645_p4 = scmp.ne.s32.totalorder %s4428_s11, 3 }
 0x49a   : > { %2675 = sbr.rel (%p3645_p4) target bundleno = 1455 (0x5af), region = 100 }
 0x49f   : > { %v3972_v16 = vld [vmem:[#allocation15 + $0x78] sm:$0xff]   ;;  %v3976_v14 = vld [vmem:[#allocation15 + $0x70] sm:$0xff]   ;;  %v3980_v43 = vld [vmem:[#allocation15 + $0x68] sm:$0xff]  }
 0x4a0   : > { %v3973_v33 = vld [vmem:[#allocation15 + $0xf8] sm:$0xff]   ;;  %3750 = vmatprep.subr.bf16.mxu0 %v3972_v16  ;;  %v3977_v8 = vld [vmem:[#allocation15 + $0xf0] sm:$0xff]   ;;  %v3981_v51 = vld [vmem:[#allocation15 + $0xe8] sm:$0xff]  }
 0x4a1   : > { %v3974_v35 = vld [vmem:[#allocation15 + $0x38] sm:$0xff]   ;;  %3772 = vmatprep.subr.bf16.mxu1 %v3973_v33  ;;  %v3978_v6 = vld [vmem:[#allocation15 + $0x30] sm:$0xff]   ;;  %v3982_v57 = vld [vmem:[#allocation15 + $0x28] sm:$0xff]  }
 0x4a2   : > { %v3975_v36 = vld [vmem:[#allocation15 + $0xb8] sm:$0xff]   ;;  %3751 = vmatpush3.bf16.msra.mxu0 %v3974_v35  ;;  %v3979_v42 = vld [vmem:[#allocation15 + $0xb0] sm:$0xff]   ;;  %v3983_v58 = vld [vmem:[#allocation15 + $0xa8] sm:$0xff]  }
 0x4a3   : > { %3773 = vmatpush3.bf16.msra.mxu1 %v3975_v36  ;;  %3752 = vmatprep.subr.bf16.mxu0 %v3976_v14  ;;  %v3984_v59 = vld [vmem:[#allocation15 + $0x60] sm:$0xff]   ;;  %v3988_v3 = vld [vmem:[#allocation15 + $0x58] sm:$0xff]   ;;  %v3992_v60 = vld [vmem:[#allocation15 + $0x50] sm:$0xff]  }
 0x4a4   : > { %3774 = vmatprep.subr.bf16.mxu1 %v3977_v8  ;;  %v3985_v61 = vld [vmem:[#allocation15 + $0xe0] sm:$0xff]   ;;  %v3989_v38 = vld [vmem:[#allocation15 + $0xd8] sm:$0xff]   ;;  %v3993_v39 = vld [vmem:[#allocation15 + $0xd0] sm:$0xff]  }
 0x4a5   : > { %v3986_v62 = vld [vmem:[#allocation15 + $0x20] sm:$0xff]   ;;  %v3990_v11 = vld [vmem:[#allocation15 + $0x18] sm:$0xff]   ;;  %v3994_v18 = vld [vmem:[#allocation15 + $0x10] sm:$0xff]  }
 0x4a6   : > { %3753 = vmatpush3.bf16.msra.mxu0 %v3978_v6  ;;  %v3987_v29 = vld [vmem:[#allocation15 + $0xa0] sm:$0xff]   ;;  %v3991_v20 = vld [vmem:[#allocation15 + $0x98] sm:$0xff]   ;;  %v3995_v19 = vld [vmem:[#allocation15 + $0x90] sm:$0xff]  }
 0x4a7   : > { %3775 = vmatpush3.bf16.msra.mxu1 %v3979_v42  ;;  %3754 = vmatprep.subr.bf16.mxu0 %v3980_v43  ;;  %v3996_v21 = vld [vmem:[#allocation15 + $0x48] sm:$0xff]   ;;  %v4000_v32 = vld [vmem:[#allocation15 + $0x40] sm:$0xff]   ;;  %v4004_v40 = vld [vmem:[#allocation2 + $0x30] ss:$-40 sps:$4 sm:$0xff]  }
 0x4a8   : > { %3776 = vmatprep.subr.bf16.mxu1 %v3981_v51  ;;  %v3997_v26 = vld [vmem:[#allocation15 + $0xc8] sm:$0xff]   ;;  %v4001_v55 = vld [vmem:[#allocation15 + $0xc0] sm:$0xff]   ;;  %v4006_v44 = vld [vmem:[#allocation2 + $0x34] ss:$-40 sps:$4 sm:$0xff]  }
 0x4a9   : > { %v3998_v27 = vld [vmem:[#allocation15 + $0x8] sm:$0xff]   ;;  %v4002_v15 = vld [vmem:[#allocation15] sm:$0xff]   ;;  %v4007_v0 = vld [vmem:[#allocation15 + $0x178] sm:$0xff]   ;;  %3275 = vmatprep.mubr.bf16.mxu0 %v4006_v44 }
 0x4aa   : > { %3755 = vmatpush3.bf16.msra.mxu0 %v3982_v57  ;;  %v3999_v28 = vld [vmem:[#allocation15 + $0x88] sm:$0xff]   ;;  %v4003_v5 = vld [vmem:[#allocation15 + $0x80] sm:$0xff]   ;;  %v4008_v9 = vld [vmem:[#allocation15 + $0x1f8] sm:$0xff]  }
 0x4ab   : > { %3777 = vmatpush3.bf16.msra.mxu1 %v3983_v58  ;;  %3756 = vmatprep.subr.bf16.mxu0 %v3984_v59  ;;  %v2677_v45 = vld [vmem:[#allocation2] sm:$0xff]  ;;  %v4009_v41 = vld [vmem:[#allocation15 + $0x138] sm:$0xff]   ;;  %v4011_v46 = vld [vmem:[#allocation15 + $0x170] sm:$0xff]  }
 0x4ac   : > { %3778 = vmatprep.subr.bf16.mxu1 %v3985_v61  ;;  %v2681_v17 = vld [vmem:[#allocation2 + $0x20] sm:$0xff]  ;;  %v4010_v52 = vld [vmem:[#allocation15 + $0x1b8] sm:$0xff]   ;;  %v4012_v56 = vld [vmem:[#allocation15 + $0x1f0] sm:$0xff]  }
 0x4ad   : > { %v3649_v54 = vcombine.low %v2677_v45, %v2681_v17  ;;  %v3650_v63 = vcombine.high %v2677_v45, %v2681_v17  ;;  %v4013_v1 = vld [vmem:[#allocation15 + $0x130] sm:$0xff]   ;;  %v4015_v53 = vld [vmem:[#allocation15 + $0x168] sm:$0xff]   ;;  %v4019_v7 = vld [vmem:[#allocation15 + $0x160] sm:$0xff]  }
 0x4ae   : > { %3757 = vmatpush3.bf16.msra.mxu0 %v3986_v62  ;;  %v4014_v47 = vld [vmem:[#allocation15 + $0x1b0] sm:$0xff]   ;;  %v4016_v23 = vld [vmem:[#allocation15 + $0x1e8] sm:$0xff]   ;;  %v4020_v25 = vld [vmem:[#allocation15 + $0x1e0] sm:$0xff]  }
 0x4af   : > { %3779 = vmatpush3.bf16.msra.mxu1 %v3987_v29  ;;  %3758 = vmatprep.subr.bf16.mxu0 %v3988_v3  ;;  %v4017_v31 = vld [vmem:[#allocation15 + $0x128] sm:$0xff]   ;;  %v4021_v30 = vld [vmem:[#allocation15 + $0x120] sm:$0xff]   ;;  %v4023_v50 = vld [vmem:[#allocation15 + $0x158] sm:$0xff]  }
 0x4b0   : > { %3780 = vmatprep.subr.bf16.mxu1 %v3989_v38  ;;  %3316 = vmatprep.mubr.bf16.mxu1 %v3650_v63  ;;  %v4018_v24 = vld [vmem:[#allocation15 + $0x1a8] sm:$0xff]   ;;  %v4022_v34 = vld [vmem:[#allocation15 + $0x1a0] sm:$0xff]   ;;  %v4024_v48 = vld [vmem:[#allocation15 + $0x1d8] sm:$0xff]  }
 0x4b1   : > { %v4025_v49 = vld [vmem:[#allocation15 + $0x118] sm:$0xff]   ;;  %v4027_v12 = vld [vmem:[#allocation15 + $0x150] sm:$0xff]   ;;  %v4031_v4 = vld [vmem:[#allocation15 + $0x148] sm:$0xff]  }
 0x4b2   : > { %3759 = vmatpush3.bf16.msra.mxu0 %v3990_v11  ;;  %v4026_v10 = vld [vmem:[#allocation15 + $0x198] sm:$0xff]   ;;  %v4028_v13 = vld [vmem:[#allocation15 + $0x1d0] sm:$0xff]   ;;  %v4032_v37 = vld [vmem:[#allocation15 + $0x1c8] sm:$0xff]  }
 0x4b3   : > { %3781 = vmatpush3.bf16.msra.mxu1 %v3991_v20  ;;  %3760 = vmatprep.subr.bf16.mxu0 %v3992_v60  ;;  %v4029_v22 = vld [vmem:[#allocation15 + $0x110] sm:$0xff]   ;;  %v4033_v16 = vld [vmem:[#allocation15 + $0x108] sm:$0xff]   ;;  %v4035_v35 = vld [vmem:[#allocation15 + $0x140] sm:$0xff]  }
 0x4b4   : > { %3782 = vmatprep.subr.bf16.mxu1 %v3993_v39  ;;  %v4030_v2 = vld [vmem:[#allocation15 + $0x190] sm:$0xff]   ;;  %v4034_v33 = vld [vmem:[#allocation15 + $0x188] sm:$0xff]   ;;  %v4036_v36 = vld [vmem:[#allocation15 + $0x1c0] sm:$0xff]  }
 0x4b5   : > { %v4037_v14 = vld [vmem:[#allocation15 + $0x100] sm:$0xff]  }
 0x4b6   : > { %3761 = vmatpush3.bf16.msra.mxu0 %v3994_v18  ;;  %v4038_v8 = vld [vmem:[#allocation15 + $0x180] sm:$0xff]  }
 0x4b7   : > { %3783 = vmatpush3.bf16.msra.mxu1 %v3995_v19  ;;  %3762 = vmatprep.subr.bf16.mxu0 %v3996_v21  ;;  %v4039_v6 = vld [vmem:[#allocation2 + $0x18] ss:$16 sps:$4 sm:$0xff]   ;;  %v4041_v42 = vld [vmem:[#allocation2 + $0x1c] ss:$16 sps:$4 sm:$0xff]  }
 0x4b8   : > { %3784 = vmatprep.subr.bf16.mxu1 %v3997_v26  ;;  %v4042_v43 = vld [vmem:[#allocation2 + $0x10] ss:$40 sps:$4 sm:$0xff]   ;;  %v4044_v51 = vld [vmem:[#allocation2 + $0x14] ss:$40 sps:$4 sm:$0xff]  }
 0x4b9   : > { %v3646_v38 = vld [vmem:[#allocation16] ss:$0 sm:$0xff] }
 0x4ba   : > { %3763 = vmatpush3.bf16.msra.mxu0 %v3998_v27 }
 0x4bb   : > { %3785 = vmatpush3.bf16.msra.mxu1 %v3999_v28  ;;  %3764 = vmatprep.subr.bf16.mxu0 %v4000_v32 }
 0x4bc   : > { %3786 = vmatprep.subr.bf16.mxu1 %v4001_v55 }
 0x4be   : > { %3765 = vmatpush3.bf16.msra.mxu0 %v4002_v15 }
 0x4bf   : > { %3787 = vmatpush3.bf16.msra.mxu1 %v4003_v5  ;;  %3794 = vmatprep.subr.bf16.mxu0 %v4007_v0 }
 0x4c0   : > { %3816 = vmatprep.subr.bf16.mxu1 %v4008_v9 }
 0x4c1   : > { %3276 = vmatmul.mubr.bf16.vlgmr.msra.gmra.mxu0 %v4004_v40 }
 0x4c2   : > { %3317 = vmatmul.mubr.bf16.vlgmr.msra.gmra.mxu1 %v3649_v54  ;;  %3795 = vmatpush3.bf16.msra.mxu0 %v4009_v41 }
 0x4c3   : > { %3817 = vmatpush3.bf16.msra.mxu1 %v4010_v52  ;;  %3796 = vmatprep.subr.bf16.mxu0 %v4011_v46 }
 0x4c4   : > { %3818 = vmatprep.subr.bf16.mxu1 %v4012_v56  ;;  %3357 = vmatprep.mubr.bf16.mxu0 %v4041_v42 }
 0x4c5   : > { %3398 = vmatprep.mubr.bf16.mxu1 %v4044_v51 }
 0x4c6   : > { %3797 = vmatpush3.bf16.msra.mxu0 %v4013_v1 }
 0x4c7   : > { %3819 = vmatpush3.bf16.msra.mxu1 %v4014_v47  ;;  %3798 = vmatprep.subr.bf16.mxu0 %v4015_v53 }
 0x4c8   : > { %3820 = vmatprep.subr.bf16.mxu1 %v4016_v23 }
 0x4ca   : > { %3799 = vmatpush3.bf16.msra.mxu0 %v4017_v31 }
 0x4cb   : > { %3821 = vmatpush3.bf16.msra.mxu1 %v4018_v24  ;;  %3800 = vmatprep.subr.bf16.mxu0 %v4019_v7 }
 0x4cc   : > { %3822 = vmatprep.subr.bf16.mxu1 %v4020_v25 }
 0x4ce   : > { %3801 = vmatpush3.bf16.msra.mxu0 %v4021_v30 }
 0x4cf   : > { %3823 = vmatpush3.bf16.msra.mxu1 %v4022_v34  ;;  %3802 = vmatprep.subr.bf16.mxu0 %v4023_v50 }
 0x4d0   : > { %3824 = vmatprep.subr.bf16.mxu1 %v4024_v48 }
 0x4d2   : > { %3803 = vmatpush3.bf16.msra.mxu0 %v4025_v49 }
 0x4d3   : > { %3825 = vmatpush3.bf16.msra.mxu1 %v4026_v10  ;;  %3804 = vmatprep.subr.bf16.mxu0 %v4027_v12 }
 0x4d4   : > { %3826 = vmatprep.subr.bf16.mxu1 %v4028_v13 }
 0x4d6   : > { %3805 = vmatpush3.bf16.msra.mxu0 %v4029_v22 }
 0x4d7   : > { %3827 = vmatpush3.bf16.msra.mxu1 %v4030_v2  ;;  %3806 = vmatprep.subr.bf16.mxu0 %v4031_v4 }
 0x4d8   : > { %3828 = vmatprep.subr.bf16.mxu1 %v4032_v37 }
 0x4da   : > { %3807 = vmatpush3.bf16.msra.mxu0 %v4033_v16 }
 0x4db   : > { %3829 = vmatpush3.bf16.msra.mxu1 %v4034_v33  ;;  %3808 = vmatprep.subr.bf16.mxu0 %v4035_v35 }
 0x4dc   : > { %3830 = vmatprep.subr.bf16.mxu1 %v4036_v36 }
 0x4de   : > { %3809 = vmatpush3.bf16.msra.mxu0 %v4037_v14 }
 0x4df   : > { %3831 = vmatpush3.bf16.msra.mxu1 %v4038_v8 }
 0x4e1   : > { %3358 = vmatmul.mubr.bf16.vlgmr.msra.gmra.mxu0 %v4039_v6 }
 0x4e2   : > { %3399 = vmatmul.mubr.bf16.vlgmr.msra.gmra.mxu1 %v4042_v43 }
 0x581   : > { %v3766_v57 = vpop.f32.mrf.mxu0 }
 0x582   : > { %v3788_v58 = vpop.f32.mrf.mxu1 }
 0x583   : > { %v3767_v59 = vpop.f32.mrf.mxu0 }
 0x584   : > { %v3789_v61 = vpop.f32.mrf.mxu1  ;;  %v3768_v29 = vadd.f32 %v3767_v59, %v3766_v57 }
 0x585   : > { %v3769_v62 = vpop.f32.mrf.mxu0  ;;  %v3790_v60 = vadd.f32 %v3789_v61, %v3788_v58 }
 0x586   : > { %v3791_v3 = vpop.f32.mrf.mxu1  ;;  %v3278_v20 = vadd.f32 %v3768_v29, %v3646_v38 }
 0x587   : > { %v3770_v11 = vpop.f32.mrf.mxu0 }
 0x588   : > { %v3771_v39 = vadd.f32 %v3770_v11, %v3769_v62  ;;  %v3792_v18 = vpop.f32.mrf.mxu1  ;;  %v3319_v27 = vadd.f32 %v3790_v60, %v3278_v20 }
 0x589   : > { %v3793_v5 = vadd.f32 %v3792_v18, %v3791_v3 }
 0x58a   : > { %v3281_v28 = vadd.f32 %v3771_v39, %v3646_v38 }
 0x58c   : > { %v3322_v54 = vadd.f32 %v3793_v5, %v3281_v28 }
 0x5a1   : > { %v3810_v19 = vpop.f32.mrf.mxu0 }
 0x5a2   : > { %v3832_v21 = vpop.f32.mrf.mxu1 }
 0x5a3   : > { %v3811_v26 = vpop.f32.mrf.mxu0 }
 0x5a4   : > { %v3812_v32 = vadd.f32 %v3811_v26, %v3810_v19  ;;  %v3833_v55 = vpop.f32.mrf.mxu1 }
 0x5a5   : > { %v3813_v15 = vpop.f32.mrf.mxu0  ;;  %v3834_v44 = vadd.f32 %v3833_v55, %v3832_v21 }
 0x5a6   : > { %v3360_v40 = vadd.f32 %v3812_v32, %v3319_v27  ;;  %v3835_v45 = vpop.f32.mrf.mxu1 }
 0x5a7   : > { %v3814_v17 = vpop.f32.mrf.mxu0 }
 0x5a8   : > { %v3401_v63 = vadd.f32 %v3834_v44, %v3360_v40  ;;  %v3815_v0 = vadd.f32 %v3814_v17, %v3813_v15  ;;  %v3836_v9 = vpop.f32.mrf.mxu1 }
 0x5a9   : > { %v3837_v52 = vadd.f32 %v3836_v9, %v3835_v45 }
 0x5aa   : > { %3407 = vst [vmem:[#allocation18] sm:$0xff] %v3401_v63  ;;  %v3363_v41 = vadd.f32 %v3815_v0, %v3322_v54 }
 0x5ac   : > { %v3404_v46 = vadd.f32 %v3837_v52, %v3363_v41 }
 0x5ae   : > { %3408 = vst [vmem:[#allocation18 + $0x8] sm:$0xff] %v3404_v46 }
 0x5af PF: > { %p3905_p11 = scmp.eq.s32.totalorder %s4428_s11, 3  ;;  %s4359_s14 = smov [#allocation18]  }
 0x5b0   : > { %s3415_s6 = sshll.u32 %s4359_s14, 4  ;;  %s3416_s6 = int_to_ptr.vmem [resolvable:$true] %s3415_s6 }
 0x5b1   : > { %s4259_s30 = scalar_lea.vmem %s3416_s6, 256  ;;  %p4266_p2 = scmp.lt.s32.totalorder %s3416_s6, %s3416_s6 }
 0x5b2   : > { %p4260_p6 = scmp.ne.s32.totalorder %s3416_s6, %s4259_s30  ;;  %p4267_p9 = scmp.lt.s32.totalorder %s4259_s30, %s4259_s30 }
 0x5b4   : > { %p4261_p7 = pnand %p4260_p6, %p3905_p11  ;;  %p4268_p1 = por %p4267_p9, %p4266_p2 }
 0x5b6   : > { %p4262_p8 = pneg %p4261_p7 }
 0x5b8   : > { %p4269_p3 = pnand %p4268_p1, %p4262_p8 }
 0x5ba   : > { %4272 = shalt.err (!%p4269_p3)
}
 0x5bb   : > { %s4360_s15 = smov 128   ;;  %s4361_s20 = smov 8  }
 0x5bc   : > { %3865 = dma.vmem_to_hbm [thread:$0]  (%p3905_p11), %s3416_s6, 256, %s5170_s8, [#allocation6], %s4360_s15, %s4360_s15, %s4361_s20  }
 0x5bd   : > { %4324 = dma.done.wait (%p3905_p11), [#allocation6], 256  }
 0x5be   : > { %4326 = vsyncadd (%p3905_p11), [#allocation6], 4294967040 }
 0x5bf PF: > { %p25_p10 = scmp.ge.s32.totalorder %s4469_s9, 6   ;;  %s5210_s27 = smov %s4333_s28 }
 0x5c0   : > { %s5211_s28 = smov %s4337_s29  ;;  %s5212_s29 = smov %s4481_s17 }
 0x5c1   : > { %s5213_s30 = smov %s4469_s9  ;;  %27 = sbr.rel (!%p25_p10) target bundleno = 12 (0xc), region = 150 }
 0x5c6   :  { %3431 = vsyncpa [#allocation5], 1 }
 0x5c7   :  { %3433 = vsyncpa [#allocation5 + $0x1], 1 }
 0x5c8   :  { %3434 = vsyncpa [#allocation8], 1 }
 0x5c9   :  { %3435 = vsyncpa [#allocation11], 1 }
 0x5ca   :  { %3437 = vsyncpa [#allocation11 + $0x1], 1 }
 0x5cb   :  { %3438 = vsyncpa [#allocation14], 1 }
 0x5cc   :  { %3440 = vsyncpa [#allocation14 + $0x1], 1 }
 0x5cd   :  { %3441 = vsyncpa [#allocation17], 1 }
 0x5ce   :  { %3442 = vsyncpa [#allocation6], 1 }
 0x5cf   :  { %3444 = vsyncpa [#allocation6 + $0x1], 1 }

</bundles_post_ra>
